<compile_context>
chip_gen: v7x
topology: tpu7x:2x2x1
jax: 0.10.0
libtpu: 0.0.40
codegen_flags: <defaults>
</compile_context>

<pallas_src>
import math

import jax
import jax.numpy as jnp
from jax import lax
from jax.experimental import pallas as pl
from jax.experimental.pallas import tpu as pltpu

COMPUTE_DTYPE = jnp.bfloat16    # MXU-friendly element dtype; accumulation is f32.
_K_COLLAPSE_MAX = 4096          # contraction dims up to this stay fully VMEM-resident


def _has_bf16_eup():
    """bf16 transcendentals pay off on v6e / v7x; keep f32 exp elsewhere (v5e...)."""
    try:
        kind = jax.devices()[0].device_kind.lower()
    except Exception:
        return False
    return ("v6" in kind) or ("v7" in kind) or ("7x" in kind)


_HAS_BF16_EUP = _has_bf16_eup()


def _tile(dim, target, quantum):
    """Largest tile <= target that divides `dim` and is a multiple of `quantum`.
    Falls back to the full dim (block == array extent is always legal)."""
    t = min(dim, target)
    t -= t % quantum
    while t >= quantum:
        if dim % t == 0:
            return t
        t -= quantum
    return dim


# ----------------------------------------------------------------------------
# GEMM kernels
# ----------------------------------------------------------------------------
def _proj_kernel_noacc(x_ref, w_ref, b_ref, o_ref):
    """Single-pass GEMM: contraction dim fully resident -> no accumulator."""
    acc = jnp.dot(x_ref[...], w_ref[...], preferred_element_type=jnp.float32)
    o_ref[...] = (acc + b_ref[...].astype(jnp.float32)).astype(o_ref.dtype)


def _make_proj_kernel_acc(k_axis):
    """Tiled-K GEMM with f32 VMEM accumulator (fallback for huge contractions)."""
    def kernel(x_ref, w_ref, b_ref, o_ref, acc_ref):
        @pl.when(pl.program_id(k_axis) == 0)
        def _init():
            acc_ref[...] = jnp.zeros(acc_ref.shape, jnp.float32)

        acc_ref[...] += jnp.dot(x_ref[...], w_ref[...],
                                preferred_element_type=jnp.float32)

        @pl.when(pl.program_id(k_axis) == pl.num_programs(k_axis) - 1)
        def _done():
            o_ref[...] = (acc_ref[...] + b_ref[...].astype(jnp.float32)
                          ).astype(o_ref.dtype)
    return kernel


def _make_out_proj_kernel(h):
    """Output projection with the head axis walked inside the kernel (K resident)."""
    def kernel(x_ref, w_ref, b_ref, o_ref):
        acc = jnp.dot(x_ref[0], w_ref[0], preferred_element_type=jnp.float32)
        for hh in range(1, h):
            acc += jnp.dot(x_ref[hh], w_ref[hh], preferred_element_type=jnp.float32)
        o_ref[...] = (acc + b_ref[...].astype(jnp.float32)).astype(o_ref.dtype)
    return kernel


# ----------------------------------------------------------------------------
# Kernel 1: fused Q/K/V projection, head-major output  (3, h, M, d_k)
# ----------------------------------------------------------------------------
def pallas_qkv_proj(x, w_hm, b_hm, *, shared, tm=256):
    """x: (M, Din) if `shared` (activation read once) else (3, M, Din).
    w_hm: (3, h, Din, d_k) bf16, b_hm: (3, h, 1, d_k) f32.
    Returns (3, h, M, d_k)."""
    if shared:
        M, Din = x.shape
    else:
        _, M, Din = x.shape
    _, h, _, d_k = w_hm.shape
    tm = _tile(M, tm, 16)
    sq = pl.Squeezed()
    out_shape = jax.ShapeDtypeStruct((3, h, M, d_k), x.dtype)

    if Din <= _K_COLLAPSE_MAX:
        # No K grid axis: whole contraction resident, no accumulator scratch.
        # Grid ordered (M, proj, head) so the x block index is constant across
        # proj/head -> x tile stays VMEM-resident (no re-DMA amplification).
        if shared:
            x_spec = pl.BlockSpec((tm, Din), lambda i, p, hh: (i, 0))
        else:
            x_spec = pl.BlockSpec((sq, tm, Din), lambda i, p, hh: (p, i, 0))
        return pl.pallas_call(
            _proj_kernel_noacc,
            out_shape=out_shape,
            grid=(M // tm, 3, h),
            in_specs=[
                x_spec,
                pl.BlockSpec((sq, sq, Din, d_k), lambda i, p, hh: (p, hh, 0, 0)),
                pl.BlockSpec((sq, sq, 1, d_k), lambda i, p, hh: (p, hh, 0, 0)),
            ],
            out_specs=pl.BlockSpec((sq, sq, tm, d_k),
                                   lambda i, p, hh: (p, hh, i, 0)),
            compiler_params=pltpu.CompilerParams(
                dimension_semantics=("parallel", "parallel", "parallel")),
        )(x, w_hm, b_hm)

    # Very large Din: tile the reduction with an f32 accumulator (innermost axis).
    tk = _tile(Din, _K_COLLAPSE_MAX, 128)
    if shared:
        x_spec = pl.BlockSpec((tm, tk), lambda i, p, hh, k: (i, k))
    else:
        x_spec = pl.BlockSpec((sq, tm, tk), lambda i, p, hh, k: (p, i, k))
    return pl.pallas_call(
        _make_proj_kernel_acc(k_axis=3),
        out_shape=out_shape,
        grid=(M // tm, 3, h, Din // tk),
        in_specs=[
            x_spec,
            pl.BlockSpec((sq, sq, tk, d_k), lambda i, p, hh, k: (p, hh, k, 0)),
            pl.BlockSpec((sq, sq, 1, d_k), lambda i, p, hh, k: (p, hh, 0, 0)),
        ],
        out_specs=pl.BlockSpec((sq, sq, tm, d_k), lambda i, p, hh, k: (p, hh, i, 0)),
        scratch_shapes=[pltpu.VMEM((tm, d_k), jnp.float32)],
        compiler_params=pltpu.CompilerParams(
            dimension_semantics=("parallel", "parallel", "parallel", "arbitrary")),
    )(x, w_hm, b_hm)


# ----------------------------------------------------------------------------
# Kernel 2: flash-style scaled-dot-product attention (head-major I/O)
#   grid = (B, h, S/tq, S/tkv); KV is the innermost reduction with an
#   online-softmax carry (m/l/acc) in f32 VMEM scratch.  q is pre-scaled by
#   1/sqrt(d_k) (folded into the projection weights).
# ----------------------------------------------------------------------------
def _make_flash_attn_kernel(use_bf16_exp):
    def kernel(q_ref, k_ref, v_ref, o_ref, m_sc, l_sc, acc_sc):
        # TODO(synk): optional attention mask would be applied to `s` here.
        ki = pl.program_id(3)

        @pl.when(ki == 0)
        def _init():
            m_sc[...] = jnp.full(m_sc.shape, -jnp.inf, jnp.float32)
            l_sc[...] = jnp.zeros(l_sc.shape, jnp.float32)
            acc_sc[...] = jnp.zeros(acc_sc.shape, jnp.float32)

        # scores = q @ k^T, contracting d_k directly (no k.T materialized)
        s = lax.dot_general(q_ref[...], k_ref[...],
                            dimension_numbers=(((1,), (1,)), ((), ())),
                            preferred_element_type=jnp.float32)       # (tq, tkv)

        m_prev = m_sc[...]
        m_new = jnp.maximum(m_prev, jnp.max(s, axis=-1, keepdims=True))
        alpha = jnp.exp(m_prev - m_new)
        if use_bf16_exp:
            # bf16 EUP exp (~2x throughput on v6e/v7x); p feeds a bf16 matmul anyway.
            p = jnp.exp((s - m_new).astype(jnp.bfloat16))
            p_sum = jnp.sum(p.astype(jnp.float32), axis=-1, keepdims=True)
        else:
            p = jnp.exp(s - m_new)
            p_sum = jnp.sum(p, axis=-1, keepdims=True)

        l_sc[...] = alpha * l_sc[...] + p_sum
        acc_sc[...] = alpha * acc_sc[...] + jnp.dot(
            p.astype(v_ref.dtype), v_ref[...], preferred_element_type=jnp.float32)
        m_sc[...] = m_new

        @pl.when(ki == pl.num_programs(3) - 1)
        def _done():
            inv_l = pl.reciprocal(l_sc[...], approx=True)   # EUP slot, frees VALU
            o_ref[...] = (acc_sc[...] * inv_l).astype(o_ref.dtype)
    return kernel


def pallas_attention(qkv, *, tq=256, tkv=256, use_bf16_exp=None):
    """qkv: (3, h, B, S, d_k) head-major slab (q/k/v stacked along axis 0).
    Returns the attention context as a head-major (h, B, S, d_k) slab --
    exactly the layout the output projection consumes (contiguous blocks)."""
    _, h, B, S, d_k = qkv.shape
    if use_bf16_exp is None:
        use_bf16_exp = _HAS_BF16_EUP
    tq = _tile(S, tq, 16)
    tkv = _tile(S, tkv, 128) if S % 128 == 0 else _tile(S, tkv, 16)
    grid = (B, h, S // tq, S // tkv)
    sq = pl.Squeezed()

    in_specs = [
        pl.BlockSpec((sq, sq, sq, tq, d_k), lambda b, hh, qi, ki: (0, hh, b, qi, 0)),
        pl.BlockSpec((sq, sq, sq, tkv, d_k), lambda b, hh, qi, ki: (1, hh, b, ki, 0)),
        pl.BlockSpec((sq, sq, sq, tkv, d_k), lambda b, hh, qi, ki: (2, hh, b, ki, 0)),
    ]
    out_specs = pl.BlockSpec((sq, sq, tq, d_k), lambda b, hh, qi, ki: (hh, b, qi, 0))
    scratch = [pltpu.VMEM((tq, 1), jnp.float32),      # running max m
               pltpu.VMEM((tq, 1), jnp.float32),      # running sum l
               pltpu.VMEM((tq, d_k), jnp.float32)]    # output accumulator

    return pl.pallas_call(
        _make_flash_attn_kernel(use_bf16_exp),
        out_shape=jax.ShapeDtypeStruct((h, B, S, d_k), qkv.dtype),
        grid=grid, in_specs=in_specs, out_specs=out_specs,
        scratch_shapes=scratch,
        compiler_params=pltpu.CompilerParams(
            dimension_semantics=("parallel", "parallel", "parallel", "arbitrary")),
    )(qkv, qkv, qkv)


# ----------------------------------------------------------------------------
# Kernel 3: output projection  y = concat_heads(ctx) @ Wo + bo
#   ctx stays head-major (h, M, d_k); the head axis is walked inside the kernel
#   (K fully resident) or, for very large d_model, as an inner reduction axis.
# ----------------------------------------------------------------------------
def pallas_out_proj(ctx, wo_hm, bo, *, out_dtype, tm=256, tn=256):
    """ctx: (h, M, d_k), wo_hm: (h, d_k, d_model) bf16, bo: (1, d_model) f32."""
    h, M, d_k = ctx.shape
    d_model = wo_hm.shape[-1]
    tm = _tile(M, tm, 16)
    tn = _tile(d_model, tn, 128)
    sq = pl.Squeezed()
    out_shape = jax.ShapeDtypeStruct((M, d_model), out_dtype)

    if h * d_k <= _K_COLLAPSE_MAX:
        return pl.pallas_call(
            _make_out_proj_kernel(h),
            out_shape=out_shape,
            grid=(M // tm, d_model // tn),
            in_specs=[
                pl.BlockSpec((h, tm, d_k), lambda i, j: (0, i, 0)),
                pl.BlockSpec((h, d_k, tn), lambda i, j: (0, 0, j)),
                pl.BlockSpec((1, tn), lambda i, j: (0, j)),
            ],
            out_specs=pl.BlockSpec((tm, tn), lambda i, j: (i, j)),
            compiler_params=pltpu.CompilerParams(
                dimension_semantics=("parallel", "parallel")),
        )(ctx, wo_hm, bo)

    # Very large d_model: heads become the innermost reduction axis + f32 acc.
    return pl.pallas_call(
        _make_proj_kernel_acc(k_axis=2),
        out_shape=out_shape,
        grid=(M // tm, d_model // tn, h),
        in_specs=[
            pl.BlockSpec((sq, tm, d_k), lambda i, j, hh: (hh, i, 0)),
            pl.BlockSpec((sq, d_k, tn), lambda i, j, hh: (hh, 0, j)),
            pl.BlockSpec((1, tn), lambda i, j, hh: (0, j)),
        ],
        out_specs=pl.BlockSpec((tm, tn), lambda i, j, hh: (i, j)),
        scratch_shapes=[pltpu.VMEM((tm, tn), jnp.float32)],
        compiler_params=pltpu.CompilerParams(
            dimension_semantics=("parallel", "parallel", "arbitrary")),
    )(ctx, wo_hm, bo)


# ----------------------------------------------------------------------------
# Parameter prep (hoisted out of the per-call path, run once)
# ----------------------------------------------------------------------------
def prepare_params(params, h, compute_dtype=COMPUTE_DTYPE):
    d_model = params["wq"].shape[0]
    d_k = d_model // h
    scale = 1.0 / math.sqrt(d_k)

    # Fold 1/sqrt(d_k) into the Q projection (exact, zero in-kernel cost) and
    # reshape everything to head-major bf16 once.
    w_stack = jnp.stack([params["wq"] * scale, params["wk"], params["wv"]])
    w_qkv = w_stack.reshape(3, d_model, h, d_k).transpose(0, 2, 1, 3) \
                   .astype(compute_dtype)                              # (3,h,D,d_k)
    b_stack = jnp.stack([params["bq"] * scale, params["bk"], params["bv"]])
    b_qkv = b_stack.reshape(3, h, 1, d_k).astype(jnp.float32)          # (3,h,1,d_k)

    wo_hm = params["wo"].reshape(h, d_k, d_model).astype(compute_dtype)  # (h,d_k,D)
    bo = params["bo"].reshape(1, d_model).astype(jnp.float32)

    return {"w_qkv": w_qkv, "b_qkv": b_qkv, "wo_hm": wo_hm, "bo": bo}


# ----------------------------------------------------------------------------
# MultiHeadedAttention forward (glue in plain JAX, hot paths in Pallas kernels)
# ----------------------------------------------------------------------------
def multi_headed_attention(prep, query, key, value, *, shared_qkv=False,
                           compute_dtype=COMPUTE_DTYPE):
    B, S, d_model = query.shape
    h, d_k, _ = prep["wo_hm"].shape
    out_dtype = query.dtype

    qx = query.reshape(B * S, d_model).astype(compute_dtype)
    if shared_qkv:
        x_in = qx                                      # self-attn: read x once
    else:
        x_in = jnp.stack([
            qx,
            key.reshape(B * S, d_model).astype(compute_dtype),
            value.reshape(B * S, d_model).astype(compute_dtype),
        ])                                             # (3, B*S, D)

    qkv = pallas_qkv_proj(x_in, prep["w_qkv"], prep["b_qkv"],
                          shared=shared_qkv)           # (3, h, B*S, d_k)
    qkv = qkv.reshape(3, h, B, S, d_k)                 # free reshape

    ctx = pallas_attention(qkv)                        # (h, B, S, d_k)
    ctx = ctx.reshape(h, B * S, d_k)                   # free reshape

    out = pallas_out_proj(ctx, prep["wo_hm"], prep["bo"],
                          out_dtype=out_dtype)         # (B*S, d_model)
    return out.reshape(B, S, d_model)


# ----------------------------------------------------------------------------
# Pure-JAX f32 reference (for correctness check)
# ----------------------------------------------------------------------------
def reference(params, query, key, value, h):
    B, S, d_model = query.shape
    d_k = d_model // h

    def proj(x, w, b):
        y = jnp.dot(x.reshape(B * S, d_model), w, precision="highest") + b
        return y.reshape(B, S, h, d_k).transpose(0, 2, 1, 3)

    q = proj(query, params["wq"], params["bq"])
    k = proj(key, params["wk"], params["bk"])
    v = proj(value, params["wv"], params["bv"])
    scores = jnp.einsum("bhqd,bhkd->bhqk", q, k,
                        precision="highest") / math.sqrt(d_k)
    p = jax.nn.softmax(scores, axis=-1)
    x = jnp.einsum("bhqk,bhkd->bhqd", p, v, precision="highest")
    x = x.transpose(0, 2, 1, 3).reshape(B * S, d_model)
    y = jnp.dot(x, params["wo"], precision="highest") + params["bo"]
    return y.reshape(B, S, d_model)


if __name__ == "__main__":
    # TPU-aligned demo shapes: d_k = 128 (lane-aligned head blocks), S = 512 so
    # the flash KV reduction runs 2 tiles per q block at tq = tkv = 256.
    B, S, d_model, h = 2, 512, 512, 4

    key0 = jax.random.PRNGKey(0)
    ks = jax.random.split(key0, 12)
    init = lambda k, shape: jax.random.normal(k, shape, jnp.float32) * 0.05

    params = {
        "wq": init(ks[0], (d_model, d_model)), "bq": init(ks[1], (d_model,)),
        "wk": init(ks[2], (d_model, d_model)), "bk": init(ks[3], (d_model,)),
        "wv": init(ks[4], (d_model, d_model)), "bv": init(ks[5], (d_model,)),
        "wo": init(ks[6], (d_model, d_model)), "bo": init(ks[7], (d_model,)),
    }
    query = jax.random.normal(ks[8], (B, S, d_model), jnp.float32)
    key_in = jax.random.normal(ks[9], (B, S, d_model), jnp.float32)
    value = jax.random.normal(ks[10], (B, S, d_model), jnp.float32)

    # One-time weight prep (scale folding, head-major reshape, bf16 cast).
    prep = prepare_params(params, h)
    prep = jax.tree_util.tree_map(jax.block_until_ready, prep)

    forward = jax.jit(multi_headed_attention, static_argnames=("shared_qkv",))
    out = forward(prep, query, key_in, value)
    out = jax.block_until_ready(out)

    ref = reference(params, query, key_in, value, h)
    assert out.shape == (B, S, d_model)
    rel_err = float(jnp.linalg.norm(out - ref) / jnp.linalg.norm(ref))
    # bf16 MXU inputs / bf16 exp with f32 accumulation: expect ~1e-2 rel L2 err.
    assert rel_err < 4e-2, f"mismatch vs reference (rel L2 err = {rel_err:.4f})"

    print("KERNEL_OK")
</pallas_src>

<mosaic_0001>
module attributes {stable_mosaic.version = 11 : i64} {
  func.func @_proj_kernel_noacc(%arg0: i32, %arg1: i32, %arg2: i32, %arg3: memref<1x256x512xbf16, #tpu.memory_space<vmem>>, %arg4: memref<1x1x512x128xbf16, #tpu.memory_space<vmem>>, %arg5: memref<1x1x1x128xf32, #tpu.memory_space<vmem>>, %arg6: memref<1x1x256x128xbf16, #tpu.memory_space<vmem>>) attributes {dimension_semantics = [#tpu.dimension_semantics<parallel>, #tpu.dimension_semantics<parallel>, #tpu.dimension_semantics<parallel>], iteration_bounds = array<i64: 4, 3, 4>, scalar_prefetch = 0 : i64, scratch_operands = 0 : i64, tpu.core_type = #tpu.core_type<tc>, window_params = [{transform_indices = @transform_0, window_bounds = array<i64: 1, 256, 512>}, {transform_indices = @transform_1, window_bounds = array<i64: 1, 1, 512, 128>}, {transform_indices = @transform_2, window_bounds = array<i64: 1, 1, 1, 128>}, {transform_indices = @transform_3, window_bounds = array<i64: 1, 1, 256, 128>}]} {
    %c0 = arith.constant 0 : index
    %c0_0 = arith.constant 0 : index
    %c0_1 = arith.constant 0 : index
    %0 = vector.load %arg3[%c0, %c0_0, %c0_1] : memref<1x256x512xbf16, #tpu.memory_space<vmem>>, vector<1x256x512xbf16>
    %1 = vector.shape_cast %0 : vector<1x256x512xbf16> to vector<256x512xbf16>
    %c0_2 = arith.constant 0 : index
    %c0_3 = arith.constant 0 : index
    %c0_4 = arith.constant 0 : index
    %c0_5 = arith.constant 0 : index
    %2 = vector.load %arg4[%c0_2, %c0_3, %c0_4, %c0_5] : memref<1x1x512x128xbf16, #tpu.memory_space<vmem>>, vector<1x1x512x128xbf16>
    %3 = vector.shape_cast %2 : vector<1x1x512x128xbf16> to vector<512x128xbf16>
    %cst = arith.constant dense<0.000000e+00> : vector<256x128xf32>
    %4 = tpu.matmul %1, %3, %cst {dimension_numbers = #tpu.dot_dimension_numbers<[1], [0], [0], [1], [0, 0, 1, 1], [], []>} : vector<256x512xbf16>, vector<512x128xbf16>, vector<256x128xf32> -> vector<256x128xf32>
    %c0_6 = arith.constant 0 : index
    %c0_7 = arith.constant 0 : index
    %c0_8 = arith.constant 0 : index
    %c0_9 = arith.constant 0 : index
    %5 = vector.load %arg5[%c0_6, %c0_7, %c0_8, %c0_9] : memref<1x1x1x128xf32, #tpu.memory_space<vmem>>, vector<1x1x1x128xf32>
    %6 = vector.shape_cast %5 : vector<1x1x1x128xf32> to vector<1x128xf32>
    %7 = vector.broadcast %6 : vector<1x128xf32> to vector<256x128xf32>
    %8 = arith.addf %4, %7 : vector<256x128xf32>
    %9 = arith.truncf %8 : vector<256x128xf32> to vector<256x128xbf16>
    %c0_10 = arith.constant 0 : index
    %c0_11 = arith.constant 0 : index
    %c0_12 = arith.constant 0 : index
    %c0_13 = arith.constant 0 : index
    %10 = vector.load %arg6[%c0_10, %c0_11, %c0_12, %c0_13] : memref<1x1x256x128xbf16, #tpu.memory_space<vmem>>, vector<1x1x256x128xbf16>
    %11 = vector.shape_cast %10 : vector<1x1x256x128xbf16> to vector<256x128xbf16>
    %12 = vector.shape_cast %9 : vector<256x128xbf16> to vector<1x1x256x128xbf16>
    tpu.vector_store %arg6[%c0_10, %c0_11, %c0_12, %c0_13], %12 {strides = array<i32>} : memref<1x1x256x128xbf16, #tpu.memory_space<vmem>>, vector<1x1x256x128xbf16>,
    return
  }
  func.func @transform_0(%arg0: i32, %arg1: i32, %arg2: i32) -> (i32, i32, i32) {
    %c0_i32 = arith.constant 0 : i32
    %c0_i32_0 = arith.constant 0 : i32
    return %arg1, %arg0, %c0_i32 : i32, i32, i32
  }
  func.func @transform_1(%arg0: i32, %arg1: i32, %arg2: i32) -> (i32, i32, i32, i32) {
    %c0_i32 = arith.constant 0 : i32
    %c0_i32_0 = arith.constant 0 : i32
    %c0_i32_1 = arith.constant 0 : i32
    return %arg1, %arg2, %c0_i32, %c0_i32_0 : i32, i32, i32, i32
  }
  func.func @transform_2(%arg0: i32, %arg1: i32, %arg2: i32) -> (i32, i32, i32, i32) {
    %c0_i32 = arith.constant 0 : i32
    %c0_i32_0 = arith.constant 0 : i32
    %c0_i32_1 = arith.constant 0 : i32
    return %arg1, %arg2, %c0_i32, %c0_i32_0 : i32, i32, i32, i32
  }
  func.func @transform_3(%arg0: i32, %arg1: i32, %arg2: i32) -> (i32, i32, i32, i32) {
    %c0_i32 = arith.constant 0 : i32
    %c0_i32_0 = arith.constant 0 : i32
    return %arg1, %arg2, %arg0, %c0_i32 : i32, i32, i32, i32
  }
}

module attributes {stable_mosaic.version = 11 : i64} {
  func.func @kernel(%arg0: i32, %arg1: i32, %arg2: i32, %arg3: i32, %arg4: memref<1x1x1x256x128xbf16, #tpu.memory_space<vmem>>, %arg5: memref<1x1x1x256x128xbf16, #tpu.memory_space<vmem>>, %arg6: memref<1x1x1x256x128xbf16, #tpu.memory_space<vmem>>, %arg7: memref<1x1x256x128xbf16, #tpu.memory_space<vmem>>, %arg8: memref<256x1xf32, #tpu.memory_space<vmem>>, %arg9: memref<256x1xf32, #tpu.memory_space<vmem>>, %arg10: memref<256x128xf32, #tpu.memory_space<vmem>>) attributes {dimension_semantics = [#tpu.dimension_semantics<parallel>, #tpu.dimension_semantics<parallel>, #tpu.dimension_semantics<parallel>, #tpu.dimension_semantics<arbitrary>], iteration_bounds = array<i64: 2, 4, 2, 2>, scalar_prefetch = 0 : i64, scratch_operands = 3 : i64, tpu.core_type = #tpu.core_type<tc>, window_params = [{transform_indices = @transform_0, window_bounds = array<i64: 1, 1, 1, 256, 128>}, {transform_indices = @transform_1, window_bounds = array<i64: 1, 1, 1, 256, 128>}, {transform_indices = @transform_2, window_bounds = array<i64: 1, 1, 1, 256, 128>}, {transform_indices = @transform_3, window_bounds = array<i64: 1, 1, 256, 128>}]} {
    %c0_i32 = arith.constant 0 : i32
    %0 = arith.cmpi eq, %arg3, %c0_i32 : i32
    %1 = arith.extui %0 : i1 to i32
    %c0_i32_0 = arith.constant 0 : i32
    %2 = arith.cmpi ne, %1, %c0_i32_0 : i32
    scf.if %2 {
      %cst_31 = arith.constant 0xFF800000 : f32
      %36 = vector.broadcast %cst_31 : f32 to vector<256x1xf32>
      %c0_32 = arith.constant 0 : index
      %c0_33 = arith.constant 0 : index
      %37 = vector.load %arg8[%c0_32, %c0_33] : memref<256x1xf32, #tpu.memory_space<vmem>>, vector<256x1xf32>
      tpu.vector_store %arg8[%c0_32, %c0_33], %36 {strides = array<i32>} : memref<256x1xf32, #tpu.memory_space<vmem>>, vector<256x1xf32>,
      %cst_34 = arith.constant 0.000000e+00 : f32
      %38 = vector.broadcast %cst_34 : f32 to vector<256x1xf32>
      %c0_35 = arith.constant 0 : index
      %c0_36 = arith.constant 0 : index
      %39 = vector.load %arg9[%c0_35, %c0_36] : memref<256x1xf32, #tpu.memory_space<vmem>>, vector<256x1xf32>
      tpu.vector_store %arg9[%c0_35, %c0_36], %38 {strides = array<i32>} : memref<256x1xf32, #tpu.memory_space<vmem>>, vector<256x1xf32>,
      %cst_37 = arith.constant 0.000000e+00 : f32
      %40 = vector.broadcast %cst_37 : f32 to vector<256x128xf32>
      %c0_38 = arith.constant 0 : index
      %c0_39 = arith.constant 0 : index
      %41 = vector.load %arg10[%c0_38, %c0_39] : memref<256x128xf32, #tpu.memory_space<vmem>>, vector<256x128xf32>
      tpu.vector_store %arg10[%c0_38, %c0_39], %40 {strides = array<i32>} : memref<256x128xf32, #tpu.memory_space<vmem>>, vector<256x128xf32>,
    } else {
    }
    %c0 = arith.constant 0 : index
    %c0_1 = arith.constant 0 : index
    %c0_2 = arith.constant 0 : index
    %c0_3 = arith.constant 0 : index
    %c0_4 = arith.constant 0 : index
    %3 = vector.load %arg4[%c0, %c0_1, %c0_2, %c0_3, %c0_4] : memref<1x1x1x256x128xbf16, #tpu.memory_space<vmem>>, vector<1x1x1x256x128xbf16>
    %4 = vector.shape_cast %3 : vector<1x1x1x256x128xbf16> to vector<256x128xbf16>
    %c0_5 = arith.constant 0 : index
    %c0_6 = arith.constant 0 : index
    %c0_7 = arith.constant 0 : index
    %c0_8 = arith.constant 0 : index
    %c0_9 = arith.constant 0 : index
    %5 = vector.load %arg5[%c0_5, %c0_6, %c0_7, %c0_8, %c0_9] : memref<1x1x1x256x128xbf16, #tpu.memory_space<vmem>>, vector<1x1x1x256x128xbf16>
    %6 = vector.shape_cast %5 : vector<1x1x1x256x128xbf16> to vector<256x128xbf16>
    %cst = arith.constant dense<0.000000e+00> : vector<256x256xf32>
    %7 = tpu.matmul %4, %6, %cst {dimension_numbers = #tpu.dot_dimension_numbers<[1], [1], [0], [0], [0, 0, 1, 0], [], []>} : vector<256x128xbf16>, vector<256x128xbf16>, vector<256x256xf32> -> vector<256x256xf32>
    %c0_10 = arith.constant 0 : index
    %c0_11 = arith.constant 0 : index
    %8 = vector.load %arg8[%c0_10, %c0_11] : memref<256x1xf32, #tpu.memory_space<vmem>>, vector<256x1xf32>
    %cst_12 = arith.constant dense<0xFF800000> : vector<256xf32>
    %9 = vector.multi_reduction <maximumf>, %7, %cst_12 [1] : vector<256x256xf32> to vector<256xf32>
    %10 = vector.shape_cast %9 : vector<256xf32> to vector<256x1xf32>
    %11 = arith.maximumf %8, %10 : vector<256x1xf32>
    %12 = arith.subf %8, %11 : vector<256x1xf32>
    %13 = math.exp %12 : vector<256x1xf32>
    %14 = vector.broadcast %11 : vector<256x1xf32> to vector<256x256xf32>
    %15 = arith.subf %7, %14 : vector<256x256xf32>
    %16 = math.exp %15 : vector<256x256xf32>
    %cst_13 = arith.constant dense<0.000000e+00> : vector<256xf32>
    %17 = vector.multi_reduction <add>, %16, %cst_13 [1] : vector<256x256xf32> to vector<256xf32>
    %18 = vector.shape_cast %17 : vector<256xf32> to vector<256x1xf32>
    %c0_14 = arith.constant 0 : index
    %c0_15 = arith.constant 0 : index
    %19 = vector.load %arg9[%c0_14, %c0_15] : memref<256x1xf32, #tpu.memory_space<vmem>>, vector<256x1xf32>
    %20 = arith.mulf %13, %19 : vector<256x1xf32>
    %21 = arith.addf %20, %18 : vector<256x1xf32>
    %c0_16 = arith.constant 0 : index
    %c0_17 = arith.constant 0 : index
    %22 = vector.load %arg9[%c0_16, %c0_17] : memref<256x1xf32, #tpu.memory_space<vmem>>, vector<256x1xf32>
    tpu.vector_store %arg9[%c0_16, %c0_17], %21 {strides = array<i32>} : memref<256x1xf32, #tpu.memory_space<vmem>>, vector<256x1xf32>,
    %c0_18 = arith.constant 0 : index
    %c0_19 = arith.constant 0 : index
    %23 = vector.load %arg10[%c0_18, %c0_19] : memref<256x128xf32, #tpu.memory_space<vmem>>, vector<256x128xf32>
    %24 = vector.broadcast %13 : vector<256x1xf32> to vector<256x128xf32>
    %25 = arith.mulf %24, %23 : vector<256x128xf32>
    %26 = arith.truncf %16 : vector<256x256xf32> to vector<256x256xbf16>
    %c0_20 = arith.constant 0 : index
    %c0_21 = arith.constant 0 : index
    %c0_22 = arith.constant 0 : index
    %c0_23 = arith.constant 0 : index
    %c0_24 = arith.constant 0 : index
    %27 = vector.load %arg6[%c0_20, %c0_21, %c0_22, %c0_23, %c0_24] : memref<1x1x1x256x128xbf16, #tpu.memory_space<vmem>>, vector<1x1x1x256x128xbf16>
    %28 = vector.shape_cast %27 : vector<1x1x1x256x128xbf16> to vector<256x128xbf16>
    %cst_25 = arith.constant dense<0.000000e+00> : vector<256x128xf32>
    %29 = tpu.matmul %26, %28, %cst_25 {dimension_numbers = #tpu.dot_dimension_numbers<[1], [0], [0], [1], [0, 0, 1, 1], [], []>} : vector<256x256xbf16>, vector<256x128xbf16>, vector<256x128xf32> -> vector<256x128xf32>
    %30 = arith.addf %25, %29 : vector<256x128xf32>
    %c0_26 = arith.constant 0 : index
    %c0_27 = arith.constant 0 : index
    %31 = vector.load %arg10[%c0_26, %c0_27] : memref<256x128xf32, #tpu.memory_space<vmem>>, vector<256x128xf32>
    tpu.vector_store %arg10[%c0_26, %c0_27], %30 {strides = array<i32>} : memref<256x128xf32, #tpu.memory_space<vmem>>, vector<256x128xf32>,
    %c0_28 = arith.constant 0 : index
    %c0_29 = arith.constant 0 : index
    %32 = vector.load %arg8[%c0_28, %c0_29] : memref<256x1xf32, #tpu.memory_space<vmem>>, vector<256x1xf32>
    tpu.vector_store %arg8[%c0_28, %c0_29], %11 {strides = array<i32>} : memref<256x1xf32, #tpu.memory_space<vmem>>, vector<256x1xf32>,
    %c1_i32 = arith.constant 1 : i32
    %33 = arith.cmpi eq, %arg3, %c1_i32 : i32
    %34 = arith.extui %33 : i1 to i32
    %c0_i32_30 = arith.constant 0 : i32
    %35 = arith.cmpi ne, %34, %c0_i32_30 : i32
    scf.if %35 {
      %c0_31 = arith.constant 0 : index
      %c0_32 = arith.constant 0 : index
      %36 = vector.load %arg9[%c0_31, %c0_32] : memref<256x1xf32, #tpu.memory_space<vmem>>, vector<256x1xf32>
      %37 = tpu.reciprocal %36 {approx = true} : vector<256x1xf32> -> vector<256x1xf32>
      %c0_33 = arith.constant 0 : index
      %c0_34 = arith.constant 0 : index
      %38 = vector.load %arg10[%c0_33, %c0_34] : memref<256x128xf32, #tpu.memory_space<vmem>>, vector<256x128xf32>
      %39 = vector.broadcast %37 : vector<256x1xf32> to vector<256x128xf32>
      %40 = arith.mulf %38, %39 : vector<256x128xf32>
      %41 = arith.truncf %40 : vector<256x128xf32> to vector<256x128xbf16>
      %c0_35 = arith.constant 0 : index
      %c0_36 = arith.constant 0 : index
      %c0_37 = arith.constant 0 : index
      %c0_38 = arith.constant 0 : index
      %42 = vector.load %arg7[%c0_35, %c0_36, %c0_37, %c0_38] : memref<1x1x256x128xbf16, #tpu.memory_space<vmem>>, vector<1x1x256x128xbf16>
      %43 = vector.shape_cast %42 : vector<1x1x256x128xbf16> to vector<256x128xbf16>
      %44 = vector.shape_cast %41 : vector<256x128xbf16> to vector<1x1x256x128xbf16>
      tpu.vector_store %arg7[%c0_35, %c0_36, %c0_37, %c0_38], %44 {strides = array<i32>} : memref<1x1x256x128xbf16, #tpu.memory_space<vmem>>, vector<1x1x256x128xbf16>,
    } else {
    }
    return
  }
  func.func @transform_0(%arg0: i32, %arg1: i32, %arg2: i32, %arg3: i32) -> (i32, i32, i32, i32, i32) {
    %c0_i32 = arith.constant 0 : i32
    %c0_i32_0 = arith.constant 0 : i32
    %c0_i32_1 = arith.constant 0 : i32
    return %c0_i32, %arg1, %arg0, %arg2, %c0_i32_0 : i32, i32, i32, i32, i32
  }
  func.func @transform_1(%arg0: i32, %arg1: i32, %arg2: i32, %arg3: i32) -> (i32, i32, i32, i32, i32) {
    %c1_i32 = arith.constant 1 : i32
    %c0_i32 = arith.constant 0 : i32
    %c0_i32_0 = arith.constant 0 : i32
    return %c1_i32, %arg1, %arg0, %arg3, %c0_i32 : i32, i32, i32, i32, i32
  }
  func.func @transform_2(%arg0: i32, %arg1: i32, %arg2: i32, %arg3: i32) -> (i32, i32, i32, i32, i32) {
    %c2_i32 = arith.constant 2 : i32
    %c0_i32 = arith.constant 0 : i32
    %c0_i32_0 = arith.constant 0 : i32
    return %c2_i32, %arg1, %arg0, %arg3, %c0_i32 : i32, i32, i32, i32, i32
  }
  func.func @transform_3(%arg0: i32, %arg1: i32, %arg2: i32, %arg3: i32) -> (i32, i32, i32, i32) {
    %c0_i32 = arith.constant 0 : i32
    %c0_i32_0 = arith.constant 0 : i32
    return %arg1, %arg0, %arg2, %c0_i32 : i32, i32, i32, i32
  }
}

module attributes {stable_mosaic.version = 11 : i64} {
  func.func @kernel(%arg0: i32, %arg1: i32, %arg2: memref<4x256x128xbf16, #tpu.memory_space<vmem>>, %arg3: memref<4x128x256xbf16, #tpu.memory_space<vmem>>, %arg4: memref<1x256xf32, #tpu.memory_space<vmem>>, %arg5: memref<256x256xf32, #tpu.memory_space<vmem>>) attributes {dimension_semantics = [#tpu.dimension_semantics<parallel>, #tpu.dimension_semantics<parallel>], iteration_bounds = array<i64: 4, 2>, scalar_prefetch = 0 : i64, scratch_operands = 0 : i64, tpu.core_type = #tpu.core_type<tc>, window_params = [{transform_indices = @transform_0, window_bounds = array<i64: 4, 256, 128>}, {transform_indices = @transform_1, window_bounds = array<i64: 4, 128, 256>}, {transform_indices = @transform_2, window_bounds = array<i64: 1, 256>}, {transform_indices = @transform_3, window_bounds = array<i64: 256, 256>}]} {
    %c0 = arith.constant 0 : index
    %c0_0 = arith.constant 0 : index
    %c0_1 = arith.constant 0 : index
    %0 = vector.load %arg2[%c0, %c0_0, %c0_1] : memref<4x256x128xbf16, #tpu.memory_space<vmem>>, vector<1x256x128xbf16>
    %1 = vector.shape_cast %0 : vector<1x256x128xbf16> to vector<256x128xbf16>
    %c0_2 = arith.constant 0 : index
    %c0_3 = arith.constant 0 : index
    %c0_4 = arith.constant 0 : index
    %2 = vector.load %arg3[%c0_2, %c0_3, %c0_4] : memref<4x128x256xbf16, #tpu.memory_space<vmem>>, vector<1x128x256xbf16>
    %3 = vector.shape_cast %2 : vector<1x128x256xbf16> to vector<128x256xbf16>
    %cst = arith.constant dense<0.000000e+00> : vector<256x256xf32>
    %4 = tpu.matmul %1, %3, %cst {dimension_numbers = #tpu.dot_dimension_numbers<[1], [0], [0], [1], [0, 0, 1, 1], [], []>} : vector<256x128xbf16>, vector<128x256xbf16>, vector<256x256xf32> -> vector<256x256xf32>
    %c1 = arith.constant 1 : index
    %c0_5 = arith.constant 0 : index
    %c0_6 = arith.constant 0 : index
    %5 = vector.load %arg2[%c1, %c0_5, %c0_6] : memref<4x256x128xbf16, #tpu.memory_space<vmem>>, vector<1x256x128xbf16>
    %6 = vector.shape_cast %5 : vector<1x256x128xbf16> to vector<256x128xbf16>
    %c1_7 = arith.constant 1 : index
    %c0_8 = arith.constant 0 : index
    %c0_9 = arith.constant 0 : index
    %7 = vector.load %arg3[%c1_7, %c0_8, %c0_9] : memref<4x128x256xbf16, #tpu.memory_space<vmem>>, vector<1x128x256xbf16>
    %8 = vector.shape_cast %7 : vector<1x128x256xbf16> to vector<128x256xbf16>
    %cst_10 = arith.constant dense<0.000000e+00> : vector<256x256xf32>
    %9 = tpu.matmul %6, %8, %cst_10 {dimension_numbers = #tpu.dot_dimension_numbers<[1], [0], [0], [1], [0, 0, 1, 1], [], []>} : vector<256x128xbf16>, vector<128x256xbf16>, vector<256x256xf32> -> vector<256x256xf32>
    %10 = arith.addf %4, %9 : vector<256x256xf32>
    %c2 = arith.constant 2 : index
    %c0_11 = arith.constant 0 : index
    %c0_12 = arith.constant 0 : index
    %11 = vector.load %arg2[%c2, %c0_11, %c0_12] : memref<4x256x128xbf16, #tpu.memory_space<vmem>>, vector<1x256x128xbf16>
    %12 = vector.shape_cast %11 : vector<1x256x128xbf16> to vector<256x128xbf16>
    %c2_13 = arith.constant 2 : index
    %c0_14 = arith.constant 0 : index
    %c0_15 = arith.constant 0 : index
    %13 = vector.load %arg3[%c2_13, %c0_14, %c0_15] : memref<4x128x256xbf16, #tpu.memory_space<vmem>>, vector<1x128x256xbf16>
    %14 = vector.shape_cast %13 : vector<1x128x256xbf16> to vector<128x256xbf16>
    %cst_16 = arith.constant dense<0.000000e+00> : vector<256x256xf32>
    %15 = tpu.matmul %12, %14, %cst_16 {dimension_numbers = #tpu.dot_dimension_numbers<[1], [0], [0], [1], [0, 0, 1, 1], [], []>} : vector<256x128xbf16>, vector<128x256xbf16>, vector<256x256xf32> -> vector<256x256xf32>
    %16 = arith.addf %10, %15 : vector<256x256xf32>
    %c3 = arith.constant 3 : index
    %c0_17 = arith.constant 0 : index
    %c0_18 = arith.constant 0 : index
    %17 = vector.load %arg2[%c3, %c0_17, %c0_18] : memref<4x256x128xbf16, #tpu.memory_space<vmem>>, vector<1x256x128xbf16>
    %18 = vector.shape_cast %17 : vector<1x256x128xbf16> to vector<256x128xbf16>
    %c3_19 = arith.constant 3 : index
    %c0_20 = arith.constant 0 : index
    %c0_21 = arith.constant 0 : index
    %19 = vector.load %arg3[%c3_19, %c0_20, %c0_21] : memref<4x128x256xbf16, #tpu.memory_space<vmem>>, vector<1x128x256xbf16>
    %20 = vector.shape_cast %19 : vector<1x128x256xbf16> to vector<128x256xbf16>
    %cst_22 = arith.constant dense<0.000000e+00> : vector<256x256xf32>
    %21 = tpu.matmul %18, %20, %cst_22 {dimension_numbers = #tpu.dot_dimension_numbers<[1], [0], [0], [1], [0, 0, 1, 1], [], []>} : vector<256x128xbf16>, vector<128x256xbf16>, vector<256x256xf32> -> vector<256x256xf32>
    %22 = arith.addf %16, %21 : vector<256x256xf32>
    %c0_23 = arith.constant 0 : index
    %c0_24 = arith.constant 0 : index
    %23 = vector.load %arg4[%c0_23, %c0_24] : memref<1x256xf32, #tpu.memory_space<vmem>>, vector<1x256xf32>
    %24 = vector.broadcast %23 : vector<1x256xf32> to vector<256x256xf32>
    %25 = arith.addf %22, %24 : vector<256x256xf32>
    %c0_25 = arith.constant 0 : index
    %c0_26 = arith.constant 0 : index
    %26 = vector.load %arg5[%c0_25, %c0_26] : memref<256x256xf32, #tpu.memory_space<vmem>>, vector<256x256xf32>
    tpu.vector_store %arg5[%c0_25, %c0_26], %25 {strides = array<i32>} : memref<256x256xf32, #tpu.memory_space<vmem>>, vector<256x256xf32>,
    return
  }
  func.func @transform_0(%arg0: i32, %arg1: i32) -> (i32, i32, i32) {
    %c0_i32 = arith.constant 0 : i32
    %c0_i32_0 = arith.constant 0 : i32
    %c0_i32_1 = arith.constant 0 : i32
    return %c0_i32, %arg0, %c0_i32_0 : i32, i32, i32
  }
  func.func @transform_1(%arg0: i32, %arg1: i32) -> (i32, i32, i32) {
    %c0_i32 = arith.constant 0 : i32
    %c0_i32_0 = arith.constant 0 : i32
    %c0_i32_1 = arith.constant 0 : i32
    return %c0_i32, %c0_i32_0, %arg1 : i32, i32, i32
  }
  func.func @transform_2(%arg0: i32, %arg1: i32) -> (i32, i32) {
    %c0_i32 = arith.constant 0 : i32
    %c0_i32_0 = arith.constant 0 : i32
    return %c0_i32, %arg1 : i32, i32
  }
  func.func @transform_3(%arg0: i32, %arg1: i32) -> (i32, i32) {
    %c0_i32 = arith.constant 0 : i32
    return %arg0, %arg1 : i32, i32
  }
}

</mosaic_0001>

<bundles_post_ra>
// kernel: multi_headed_attention.3
= control target key start
LH: loop header
LB: loop body
LE: loop exit
PB: predicated region body
PF: predicated region fallthrough
CT: control target
= control target key end

     0   :  { %s2332_s12 = smov 0   ;;  %s2334_s13 = smov 0   ;;  %s2580_s0 = inlined_call_operand.vmem [shape: bf16[3,1024,512], index: 0, kind: input, shape index: {}]   ;;  %s2581_s1 = inlined_call_operand.vmem [shape: bf16[3,4,512,128], index: 1, kind: input, shape index: {}]   ;;  %s2582_s2 = inlined_call_operand.vmem [shape: f32[3,4,1,128], index: 2, kind: input, shape index: {}]   ;;  %s2583_s3 = inlined_call_operand.vmem [shape: bf16[3,4,1024,128], index: 3, kind: output, shape index: {}]  }
   0x1   :  { %s2336_s14 = smov 0   ;;  %s2338_s15 = smov 0  }
   0x2   :  { %s2340_s16 = smov 0   ;;  %s2342_s17 = smov 0  }
   0x3   :  { %s2344_s18 = smov 0  }
   0x4 LB: > { %s25_s19 = sadd.s32 1, %s2298_s15  ;;  %s28_s20 = sadd.s32 1, %s2302_s16  ;;  %s2310_s18 = sphi %s2344_s18, %s13_s18   ;;  %s2306_s17 = sphi %s2342_s17, %s2589_s17   ;;  %s2302_s16 = sphi %s2340_s16, %s2588_s16   ;;  %s2298_s15 = sphi %s2338_s15, %s2587_s15   ;;  %s2294_s14 = sphi %s2336_s14, %s2586_s14   ;;  %s2290_s13 = sphi %s2334_s13, %s2585_s13   ;;  %s2286_s12 = sphi %s2332_s12, %s2584_s12  }
   0x5   : > { %p26_p0 = scmp.ge.s32.totalorder %s25_s19, 4  ;;  %p1577_p1 = scmp.ge.s32.totalorder %s2310_s18, 1 }
   0x6   : > { %p198_p2 = scmp.lt.s32.totalorder %s2310_s18, 49  ;;  %s32_s21 = sadd.s32 1, %s2306_s17 }
   0x7   : > { %s2591_s19 = smov (%p26_p0, %s25_s19), 0  ;;  %s2593_s20 = smov (!%p26_p0, %s28_s20), %s2302_s16 }
   0x8   : > { %p199_p3 = pnand %p1577_p1, %p198_p2  ;;  %p30_p4 = scmp.ge.s32.totalorder %s2593_s20, 3 }
   0x9   : > { %p252_p6 = scmp.lt.s32.totalorder (!%p199_p3), %s2290_s13, 2  ;;  %p264_p7 = scmp.lt.s32.totalorder (!%p199_p3), %s2286_s12, 3 }
   0xa   : > { %s2595_s20 = smov (%p30_p4, %s2593_s20), 0  ;;  %s2597_s21 = smov (!%p30_p4, %s32_s21), %s2306_s17 }
   0xb   : > { %p34_p5 = scmp.ge.s32.totalorder %s2597_s21, 4  ;;  %202 = sbr.rel (%p199_p3) target bundleno = 401 (0x191), region = 32 }
   0xc   : > { %s1578_s29 = sshll.u32 (!%p199_p3), %s2294_s14, 5 }
   0xd   : > { %s2599_s21 = smov (%p34_p5, %s2597_s21), 0  ;;  %p254_p8 = scmp.lt.s32.totalorder (!%p199_p3), %s1578_s29, 127 }
  0x12   : > { %s2601_s13 = smov (!%p252_p6, %s2290_s13), 2  ;;  %s2603_s12 = smov (!%p264_p7, %s2286_s12), 3 }
  0x13   : > { %s1583_s22 = sshll.u32 %s2601_s13, 8  ;;  %s1582_s23 = sshll.u32 %s2603_s12, 6 }
  0x14   : > { %s268_s24 = sadd.s32 %s1583_s22, %s1582_s23  ;;  %s2605_s29 = smov (!%p254_p8, %s1578_s29), 127 }
  0x15   : > { %s1584_s25 = sshll.u32 %s268_s24, 2  ;;  %s1580_s30 = sshll.u32 %s2601_s13, 9 }
  0x16   : > { %s2385_s28 = scalar_lea.vmem %s2581_s1, %s1584_s25  ;;  %s1579_s4 = sshll.u32 %s2605_s29, 2 }
  0x17   : > { %v2128_v0 = vld [vmem:[%s2385_s28 + $0x40] sm:$0xff]   ;;  %v2132_v4 = vld [vmem:[%s2385_s28 + $0x48] sm:$0xff]   ;;  %v2136_v8 = vld [vmem:[%s2385_s28 + $0x50] sm:$0xff]   ;;  %s258_s5 = sadd.s32 %s1580_s30, %s1579_s4  ;;  %s1585_s10 = sshll.u32 %s2601_s13, 2 }
  0x18   : > { %v2129_v1 = vld [vmem:[%s2385_s28 + $0xc0] sm:$0xff]   ;;  %1848 = vmatprep.subr.bf16.mxu0 %v2128_v0  ;;  %v2133_v5 = vld [vmem:[%s2385_s28 + $0xc8] sm:$0xff]   ;;  %v2137_v9 = vld [vmem:[%s2385_s28 + $0xd0] sm:$0xff]   ;;  %s1581_s6 = sshll.u32 %s258_s5, 2  ;;  %s276_s11 = sadd.s32 %s1585_s10, %s2603_s12 }
  0x19   : > { %v2130_v2 = vld [vmem:[%s2385_s28] sm:$0xff]   ;;  %1960 = vmatprep.subr.bf16.mxu1 %v2129_v1  ;;  %v2134_v6 = vld [vmem:[%s2385_s28 + $0x8] sm:$0xff]   ;;  %v2138_v10 = vld [vmem:[%s2385_s28 + $0x10] sm:$0xff]   ;;  %s2427_s9 = scalar_lea.vmem %s2580_s0, %s1581_s6  ;;  %s1587_s14 = sshll.u32 %s2603_s12, 7 }
  0x1a   : > { %v2131_v3 = vld [vmem:[%s2385_s28 + $0x80] sm:$0xff]   ;;  %1849 = vmatpush3.bf16.msra.mxu0 %v2130_v2  ;;  %v2135_v7 = vld [vmem:[%s2385_s28 + $0x88] sm:$0xff]   ;;  %v2139_v11 = vld [vmem:[%s2385_s28 + $0x90] sm:$0xff]   ;;  %s277_s24 = scalar_lea.vmem %s2582_s2, %s276_s11  ;;  %s286_s25 = sadd.s32 %s1587_s14, %s2605_s29 }
  0x1b   : > { %1961 = vmatpush3.bf16.msra.mxu1 %v2131_v3  ;;  %1850 = vmatprep.subr.bf16.mxu0 %v2132_v4  ;;  %v2140_v12 = vld [vmem:[%s2385_s28 + $0x58] sm:$0xff]   ;;  %v2144_v16 = vld [vmem:[%s2385_s28 + $0x60] sm:$0xff]   ;;  %v2148_v20 = vld [vmem:[%s2385_s28 + $0x68] sm:$0xff]   ;;  %s288_s26 = sadd.s32 %s1580_s30, %s286_s25 }
  0x1c   : > { %1962 = vmatprep.subr.bf16.mxu1 %v2133_v5  ;;  %v2141_v13 = vld [vmem:[%s2385_s28 + $0xd8] sm:$0xff]   ;;  %v2145_v17 = vld [vmem:[%s2385_s28 + $0xe0] sm:$0xff]   ;;  %v2149_v21 = vld [vmem:[%s2385_s28 + $0xe8] sm:$0xff]   ;;  %s1589_s12 = sshll.u32 %s288_s26, 2 }
  0x1d   : > { %v2142_v14 = vld [vmem:[%s2385_s28 + $0x18] sm:$0xff]   ;;  %v2146_v18 = vld [vmem:[%s2385_s28 + $0x20] sm:$0xff]   ;;  %v2150_v22 = vld [vmem:[%s2385_s28 + $0x28] sm:$0xff]   ;;  %s2511_s29 = scalar_lea.vmem %s2583_s3, %s1589_s12 }
  0x1e   : > { %1851 = vmatpush3.bf16.msra.mxu0 %v2134_v6  ;;  %v2143_v15 = vld [vmem:[%s2385_s28 + $0x98] sm:$0xff]   ;;  %v2147_v19 = vld [vmem:[%s2385_s28 + $0xa0] sm:$0xff]   ;;  %v2151_v23 = vld [vmem:[%s2385_s28 + $0xa8] sm:$0xff]  }
  0x1f   : > { %1963 = vmatpush3.bf16.msra.mxu1 %v2135_v7  ;;  %1852 = vmatprep.subr.bf16.mxu0 %v2136_v8  ;;  %v2152_v24 = vld [vmem:[%s2385_s28 + $0x70] sm:$0xff]   ;;  %v2156_v28 = vld [vmem:[%s2385_s28 + $0x78] sm:$0xff]  }
  0x20   : > { %1964 = vmatprep.subr.bf16.mxu1 %v2137_v9  ;;  %v2153_v25 = vld [vmem:[%s2385_s28 + $0xf0] sm:$0xff]   ;;  %v2157_v29 = vld [vmem:[%s2385_s28 + $0xf8] sm:$0xff]  }
  0x21   : > { %v2154_v26 = vld [vmem:[%s2385_s28 + $0x30] sm:$0xff]   ;;  %v2158_v30 = vld [vmem:[%s2385_s28 + $0x38] sm:$0xff]  }
  0x22   : > { %1853 = vmatpush3.bf16.msra.mxu0 %v2138_v10  ;;  %v2155_v27 = vld [vmem:[%s2385_s28 + $0xb0] sm:$0xff]   ;;  %v2159_v31 = vld [vmem:[%s2385_s28 + $0xb8] sm:$0xff]  }
  0x23   : > { %1965 = vmatpush3.bf16.msra.mxu1 %v2139_v11  ;;  %1854 = vmatprep.subr.bf16.mxu0 %v2140_v12  ;;  %v2160_v32 = vld [vmem:[%s2427_s9] ss:$16 sps:$4 sm:$0xff]   ;;  %v2162_v33 = vld [vmem:[%s2427_s9 + $0x4] ss:$16 sps:$4 sm:$0xff]   ;;  %v2163_v34 = vld [vmem:[%s2427_s9 + $0x8] ss:$16 sps:$4 sm:$0xff]  }
  0x24   : > { %1966 = vmatprep.subr.bf16.mxu1 %v2141_v13  ;;  %v2165_v35 = vld [vmem:[%s2427_s9 + $0xc] ss:$16 sps:$4 sm:$0xff]   ;;  %972 = vmatprep.mubr.bf16.mxu0 %v2162_v33  ;;  %v2166_v36 = vld [vmem:[%s2427_s9 + $0x24] ss:$16 sps:$4 sm:$0xff]   ;;  %v2170_v38 = vld [vmem:[%s2427_s9 + $0x20] ss:$16 sps:$4 sm:$0xff]  }
  0x25   : > { %1133 = vmatprep.mubr.bf16.mxu1 %v2165_v35  ;;  %v2168_v37 = vld [vmem:[%s2427_s9 + $0x2c] ss:$16 sps:$4 sm:$0xff]   ;;  %v2171_v39 = vld [vmem:[%s2427_s9 + $0x28] ss:$16 sps:$4 sm:$0xff]   ;;  %v2172_v40 = vld [vmem:[%s2427_s9 + $0x44] ss:$16 sps:$4 sm:$0xff]  }
  0x26   : > { %1855 = vmatpush3.bf16.msra.mxu0 %v2142_v14  ;;  %v2174_v41 = vld [vmem:[%s2427_s9 + $0x4c] ss:$16 sps:$4 sm:$0xff]   ;;  %v2176_v42 = vld [vmem:[%s2427_s9 + $0x40] ss:$16 sps:$4 sm:$0xff]   ;;  %v2177_v43 = vld [vmem:[%s2427_s9 + $0x48] ss:$16 sps:$4 sm:$0xff]  }
  0x27   : > { %1967 = vmatpush3.bf16.msra.mxu1 %v2143_v15  ;;  %1856 = vmatprep.subr.bf16.mxu0 %v2144_v16  ;;  %v2178_v44 = vld [vmem:[%s2427_s9 + $0x64] ss:$16 sps:$4 sm:$0xff]   ;;  %v2180_v45 = vld [vmem:[%s2427_s9 + $0x6c] ss:$16 sps:$4 sm:$0xff]   ;;  %v2182_v46 = vld [vmem:[%s2427_s9 + $0x60] ss:$16 sps:$4 sm:$0xff]  }
  0x28   : > { %1968 = vmatprep.subr.bf16.mxu1 %v2145_v17  ;;  %v2183_v47 = vld [vmem:[%s2427_s9 + $0x68] ss:$16 sps:$4 sm:$0xff]   ;;  %v2184_v48 = vld [vmem:[%s2427_s9 + $0x84] ss:$16 sps:$4 sm:$0xff]   ;;  %v2186_v49 = vld [vmem:[%s2427_s9 + $0x8c] ss:$16 sps:$4 sm:$0xff]  }
  0x29   : > { %v2188_v50 = vld [vmem:[%s2427_s9 + $0x80] ss:$16 sps:$4 sm:$0xff]   ;;  %v2189_v51 = vld [vmem:[%s2427_s9 + $0x88] ss:$16 sps:$4 sm:$0xff]   ;;  %v2190_v52 = vld [vmem:[%s2427_s9 + $0xa4] ss:$16 sps:$4 sm:$0xff]  }
  0x2a   : > { %1857 = vmatpush3.bf16.msra.mxu0 %v2146_v18  ;;  %v2192_v53 = vld [vmem:[%s2427_s9 + $0xac] ss:$16 sps:$4 sm:$0xff]   ;;  %v2194_v54 = vld [vmem:[%s2427_s9 + $0xa0] ss:$16 sps:$4 sm:$0xff]   ;;  %v2195_v55 = vld [vmem:[%s2427_s9 + $0xa8] ss:$16 sps:$4 sm:$0xff]  }
  0x2b   : > { %1969 = vmatpush3.bf16.msra.mxu1 %v2147_v19  ;;  %1858 = vmatprep.subr.bf16.mxu0 %v2148_v20  ;;  %v2196_v56 = vld [vmem:[%s2427_s9 + $0xc4] ss:$16 sps:$4 sm:$0xff]   ;;  %v2198_v57 = vld [vmem:[%s2427_s9 + $0xcc] ss:$16 sps:$4 sm:$0xff]   ;;  %v2200_v58 = vld [vmem:[%s2427_s9 + $0xc0] ss:$16 sps:$4 sm:$0xff]  }
  0x2c   : > { %1970 = vmatprep.subr.bf16.mxu1 %v2149_v21  ;;  %v2201_v59 = vld [vmem:[%s2427_s9 + $0xc8] ss:$16 sps:$4 sm:$0xff]   ;;  %v2202_v60 = vld [vmem:[%s2427_s9 + $0xe4] ss:$16 sps:$4 sm:$0xff]   ;;  %v2204_v61 = vld [vmem:[%s2427_s9 + $0xec] ss:$16 sps:$4 sm:$0xff]  }
  0x2d   : > { %v2206_v62 = vld [vmem:[%s2427_s9 + $0xe0] ss:$16 sps:$4 sm:$0xff]   ;;  %v2207_v63 = vld [vmem:[%s2427_s9 + $0xe8] ss:$16 sps:$4 sm:$0xff]   ;;  %v2208_v0 = vld [vmem:[%s2427_s9 + $0x104] ss:$16 sps:$4 sm:$0xff]  }
  0x2e   : > { %1859 = vmatpush3.bf16.msra.mxu0 %v2150_v22  ;;  %v2210_v1 = vld [vmem:[%s2427_s9 + $0x10c] ss:$16 sps:$4 sm:$0xff]   ;;  %v2212_v2 = vld [vmem:[%s2427_s9 + $0x100] ss:$16 sps:$4 sm:$0xff]   ;;  %v2213_v3 = vld [vmem:[%s2427_s9 + $0x108] ss:$16 sps:$4 sm:$0xff]  }
  0x2f   : > { %1971 = vmatpush3.bf16.msra.mxu1 %v2151_v23  ;;  %1860 = vmatprep.subr.bf16.mxu0 %v2152_v24  ;;  %v2214_v4 = vld [vmem:[%s2427_s9 + $0x124] ss:$16 sps:$4 sm:$0xff]   ;;  %v2216_v5 = vld [vmem:[%s2427_s9 + $0x12c] ss:$16 sps:$4 sm:$0xff]   ;;  %v2218_v6 = vld [vmem:[%s2427_s9 + $0x120] ss:$16 sps:$4 sm:$0xff]  }
  0x30   : > { %1972 = vmatprep.subr.bf16.mxu1 %v2153_v25  ;;  %v2219_v7 = vld [vmem:[%s2427_s9 + $0x128] ss:$16 sps:$4 sm:$0xff]   ;;  %v2220_v8 = vld [vmem:[%s2427_s9 + $0x144] ss:$16 sps:$4 sm:$0xff]   ;;  %v2222_v9 = vld [vmem:[%s2427_s9 + $0x14c] ss:$16 sps:$4 sm:$0xff]  }
  0x31   : > { %v2224_v10 = vld [vmem:[%s2427_s9 + $0x140] ss:$16 sps:$4 sm:$0xff]   ;;  %v2225_v11 = vld [vmem:[%s2427_s9 + $0x148] ss:$16 sps:$4 sm:$0xff]   ;;  %v2226_v12 = vld [vmem:[%s2427_s9 + $0x164] ss:$16 sps:$4 sm:$0xff]  }
  0x32   : > { %1861 = vmatpush3.bf16.msra.mxu0 %v2154_v26  ;;  %v2228_v13 = vld [vmem:[%s2427_s9 + $0x16c] ss:$16 sps:$4 sm:$0xff]   ;;  %v2230_v14 = vld [vmem:[%s2427_s9 + $0x160] ss:$16 sps:$4 sm:$0xff]   ;;  %v2231_v15 = vld [vmem:[%s2427_s9 + $0x168] ss:$16 sps:$4 sm:$0xff]  }
  0x33   : > { %1973 = vmatpush3.bf16.msra.mxu1 %v2155_v27  ;;  %1862 = vmatprep.subr.bf16.mxu0 %v2156_v28  ;;  %v2232_v16 = vld [vmem:[%s2427_s9 + $0x184] ss:$16 sps:$4 sm:$0xff]   ;;  %v2234_v17 = vld [vmem:[%s2427_s9 + $0x18c] ss:$16 sps:$4 sm:$0xff]   ;;  %v2236_v18 = vld [vmem:[%s2427_s9 + $0x180] ss:$16 sps:$4 sm:$0xff]  }
  0x34   : > { %1974 = vmatprep.subr.bf16.mxu1 %v2157_v29  ;;  %v2237_v19 = vld [vmem:[%s2427_s9 + $0x188] ss:$16 sps:$4 sm:$0xff]   ;;  %v2238_v20 = vld [vmem:[%s2427_s9 + $0x1a4] ss:$16 sps:$4 sm:$0xff]   ;;  %v2240_v21 = vld [vmem:[%s2427_s9 + $0x1ac] ss:$16 sps:$4 sm:$0xff]  }
  0x35   : > { %v2242_v22 = vld [vmem:[%s2427_s9 + $0x1a0] ss:$16 sps:$4 sm:$0xff]   ;;  %v2243_v23 = vld [vmem:[%s2427_s9 + $0x1a8] ss:$16 sps:$4 sm:$0xff]   ;;  %v2244_v24 = vld [vmem:[%s2427_s9 + $0x1c4] ss:$16 sps:$4 sm:$0xff]  }
  0x36   : > { %1863 = vmatpush3.bf16.msra.mxu0 %v2158_v30  ;;  %v2246_v25 = vld [vmem:[%s2427_s9 + $0x1cc] ss:$16 sps:$4 sm:$0xff]   ;;  %v2248_v26 = vld [vmem:[%s2427_s9 + $0x1c0] ss:$16 sps:$4 sm:$0xff]   ;;  %v2249_v27 = vld [vmem:[%s2427_s9 + $0x1c8] ss:$16 sps:$4 sm:$0xff]  }
  0x37   : > { %1975 = vmatpush3.bf16.msra.mxu1 %v2159_v31  ;;  %v2250_v28 = vld [vmem:[%s2427_s9 + $0x1e4] ss:$16 sps:$4 sm:$0xff]   ;;  %v2252_v29 = vld [vmem:[%s2427_s9 + $0x1ec] ss:$16 sps:$4 sm:$0xff]   ;;  %v2254_v30 = vld [vmem:[%s2427_s9 + $0x1e0] ss:$16 sps:$4 sm:$0xff]  }
  0x38   : > { %v2255_v31 = vld [vmem:[%s2427_s9 + $0x1e8] ss:$16 sps:$4 sm:$0xff]  }
  0x39   : > { %973 = vmatmul.mubr.bf16.vlgmr.msra.gmra.mrb[0].mxu0 %v2160_v32 }
  0x3a   : > { %1134 = vmatmul.mubr.bf16.vlgmr.msra.gmra.mrb[0].mxu1 %v2163_v34  ;;  %980 = vmatprep.mubr.bf16.mxu0 %v2166_v36  ;;  %v2502_v34 = vld [vmem:[%s277_s24] ss:$0 sm:$0xff] }
  0x3b   : > { %1141 = vmatprep.mubr.bf16.mxu1 %v2168_v37 }
  0x41   : > { %981 = vmatmul.mubr.bf16.gmra.mrb[4].mxu0 %v2170_v38 }
  0x42   : > { %1142 = vmatmul.mubr.bf16.gmra.mrb[4].mxu1 %v2171_v39  ;;  %988 = vmatprep.mubr.bf16.mxu0 %v2172_v40 }
  0x43   : > { %1149 = vmatprep.mubr.bf16.mxu1 %v2174_v41 }
  0x49   : > { %989 = vmatmul.mubr.bf16.gmra.mrb[8].mxu0 %v2176_v42 }
  0x4a   : > { %1150 = vmatmul.mubr.bf16.gmra.mrb[8].mxu1 %v2177_v43  ;;  %996 = vmatprep.mubr.bf16.mxu0 %v2178_v44 }
  0x4b   : > { %1157 = vmatprep.mubr.bf16.mxu1 %v2180_v45 }
  0x51   : > { %997 = vmatmul.mubr.bf16.gmra.mrb[12].mxu0 %v2182_v46 }
  0x52   : > { %1158 = vmatmul.mubr.bf16.gmra.mrb[12].mxu1 %v2183_v47  ;;  %1004 = vmatprep.mubr.bf16.mxu0 %v2184_v48 }
  0x53   : > { %1165 = vmatprep.mubr.bf16.mxu1 %v2186_v49 }
  0x59   : > { %1005 = vmatmul.mubr.bf16.gmra.mrb[16].mxu0 %v2188_v50 }
  0x5a   : > { %1166 = vmatmul.mubr.bf16.gmra.mrb[16].mxu1 %v2189_v51  ;;  %1012 = vmatprep.mubr.bf16.mxu0 %v2190_v52 }
  0x5b   : > { %1173 = vmatprep.mubr.bf16.mxu1 %v2192_v53 }
  0x61   : > { %1013 = vmatmul.mubr.bf16.gmra.mrb[20].mxu0 %v2194_v54 }
  0x62   : > { %1174 = vmatmul.mubr.bf16.gmra.mrb[20].mxu1 %v2195_v55  ;;  %1020 = vmatprep.mubr.bf16.mxu0 %v2196_v56 }
  0x63   : > { %1181 = vmatprep.mubr.bf16.mxu1 %v2198_v57 }
  0x69   : > { %1021 = vmatmul.mubr.bf16.gmra.mrb[24].mxu0 %v2200_v58 }
  0x6a   : > { %1182 = vmatmul.mubr.bf16.gmra.mrb[24].mxu1 %v2201_v59  ;;  %1028 = vmatprep.mubr.bf16.mxu0 %v2202_v60 }
  0x6b   : > { %1189 = vmatprep.mubr.bf16.mxu1 %v2204_v61 }
  0x71   : > { %1029 = vmatmul.mubr.bf16.gmra.mrb[28].mxu0 %v2206_v62 }
  0x72   : > { %1190 = vmatmul.mubr.bf16.gmra.mrb[28].mxu1 %v2207_v63  ;;  %1036 = vmatprep.mubr.bf16.mxu0 %v2208_v0 }
  0x73   : > { %1197 = vmatprep.mubr.bf16.mxu1 %v2210_v1 }
  0x79   : > { %1037 = vmatmul.mubr.bf16.gmra.mrb[32].mxu0 %v2212_v2 }
  0x7a   : > { %1198 = vmatmul.mubr.bf16.gmra.mrb[32].mxu1 %v2213_v3  ;;  %1044 = vmatprep.mubr.bf16.mxu0 %v2214_v4 }
  0x7b   : > { %1205 = vmatprep.mubr.bf16.mxu1 %v2216_v5 }
  0x81   : > { %1045 = vmatmul.mubr.bf16.gmra.mrb[36].mxu0 %v2218_v6 }
  0x82   : > { %1206 = vmatmul.mubr.bf16.gmra.mrb[36].mxu1 %v2219_v7  ;;  %1052 = vmatprep.mubr.bf16.mxu0 %v2220_v8 }
  0x83   : > { %1213 = vmatprep.mubr.bf16.mxu1 %v2222_v9 }
  0x89   : > { %1053 = vmatmul.mubr.bf16.gmra.mrb[40].mxu0 %v2224_v10 }
  0x8a   : > { %1214 = vmatmul.mubr.bf16.gmra.mrb[40].mxu1 %v2225_v11  ;;  %1060 = vmatprep.mubr.bf16.mxu0 %v2226_v12 }
  0x8b   : > { %1221 = vmatprep.mubr.bf16.mxu1 %v2228_v13 }
  0x91   : > { %1061 = vmatmul.mubr.bf16.gmra.mrb[44].mxu0 %v2230_v14 }
  0x92   : > { %1222 = vmatmul.mubr.bf16.gmra.mrb[44].mxu1 %v2231_v15  ;;  %1068 = vmatprep.mubr.bf16.mxu0 %v2232_v16 }
  0x93   : > { %1229 = vmatprep.mubr.bf16.mxu1 %v2234_v17 }
  0x99   : > { %1069 = vmatmul.mubr.bf16.gmra.mrb[48].mxu0 %v2236_v18 }
  0x9a   : > { %1230 = vmatmul.mubr.bf16.gmra.mrb[48].mxu1 %v2237_v19  ;;  %1076 = vmatprep.mubr.bf16.mxu0 %v2238_v20 }
  0x9b   : > { %1237 = vmatprep.mubr.bf16.mxu1 %v2240_v21 }
  0xa1   : > { %1077 = vmatmul.mubr.bf16.gmra.mrb[52].mxu0 %v2242_v22 }
  0xa2   : > { %1238 = vmatmul.mubr.bf16.gmra.mrb[52].mxu1 %v2243_v23  ;;  %1084 = vmatprep.mubr.bf16.mxu0 %v2244_v24 }
  0xa3   : > { %1245 = vmatprep.mubr.bf16.mxu1 %v2246_v25 }
  0xa9   : > { %1085 = vmatmul.mubr.bf16.gmra.mrb[56].mxu0 %v2248_v26 }
  0xaa   : > { %1246 = vmatmul.mubr.bf16.gmra.mrb[56].mxu1 %v2249_v27  ;;  %1092 = vmatprep.mubr.bf16.mxu0 %v2250_v28 }
  0xab   : > { %1253 = vmatprep.mubr.bf16.mxu1 %v2252_v29 }
  0xb1   : > { %1093 = vmatmul.mubr.bf16.gmra.mrb[60].mxu0 %v2254_v30 }
  0xb2   : > { %1254 = vmatmul.mubr.bf16.gmra.mrb[60].mxu1 %v2255_v31 }
 0x10c   : > { %v1864_v32 = vpop.f32.mrb[0].mxu0 }
 0x10d   : > { %v1976_v33 = vpop.f32.mrb[0].mxu1  ;;  %v1865_v35 = vpop.f32.mrb[1].mxu0 }
 0x10e   : > { %v1866_v36 = vadd.f32 %v1865_v35, %v1864_v32  ;;  %v1977_v37 = vpop.f32.mrb[1].mxu1  ;;  %v1867_v38 = vpop.f32.mrb[2].mxu0 }
 0x10f   : > { %v1978_v39 = vadd.f32 %v1977_v37, %v1976_v33  ;;  %v1979_v40 = vpop.f32.mrb[2].mxu1  ;;  %v1868_v41 = vpop.f32.mrb[3].mxu0 }
 0x110   : > { %v975_v42 = vadd.f32 %v1866_v36, %v2502_v34  ;;  %v1869_v43 = vadd.f32 %v1868_v41, %v1867_v38  ;;  %v1980_v44 = vpop.f32.mrb[3].mxu1 }
 0x111   : > { %v1981_v45 = vadd.f32 %v1980_v44, %v1979_v40 }
 0x112   : > { %v1136_v46 = vadd.f32 %v1978_v39, %v975_v42  ;;  %v978_v47 = vadd.f32 %v1869_v43, %v2502_v34 }
 0x114   : > { %v1139_v48 = vadd.f32 %v1981_v45, %v978_v47  ;;  %v1870_v49 = vpop.f32.mrb[4].mxu0 }
 0x115   : > { %v1982_v50 = vpop.f32.mrb[4].mxu1  ;;  %v1871_v51 = vpop.f32.mrb[5].mxu0 }
 0x116   : > { %v1756_v52 = vpack.c.bf16 %v1139_v48, %v1136_v46  ;;  %v1872_v53 = vadd.f32 %v1871_v51, %v1870_v49  ;;  %v1983_v54 = vpop.f32.mrb[5].mxu1  ;;  %v1873_v55 = vpop.f32.mrb[6].mxu0 }
 0x117   : > { %v1984_v56 = vadd.f32 %v1983_v54, %v1982_v50  ;;  %v1985_v57 = vpop.f32.mrb[6].mxu1  ;;  %v1874_v58 = vpop.f32.mrb[7].mxu0 }
 0x118   : > { %1757 = vst [vmem:[%s2511_s29] sm:$0xff] %v1756_v52   ;;  %v983_v59 = vadd.f32 %v1872_v53, %v2502_v34  ;;  %v1875_v60 = vadd.f32 %v1874_v58, %v1873_v55  ;;  %v1986_v61 = vpop.f32.mrb[7].mxu1 }
 0x119   : > { %v1987_v62 = vadd.f32 %v1986_v61, %v1985_v57 }
 0x11a   : > { %v1144_v63 = vadd.f32 %v1984_v56, %v983_v59  ;;  %v986_v0 = vadd.f32 %v1875_v60, %v2502_v34 }
 0x11c   : > { %v1147_v1 = vadd.f32 %v1987_v62, %v986_v0  ;;  %v1876_v2 = vpop.f32.mrb[8].mxu0 }
 0x11d   : > { %v1988_v3 = vpop.f32.mrb[8].mxu1  ;;  %v1877_v4 = vpop.f32.mrb[9].mxu0 }
 0x11e   : > { %v1761_v5 = vpack.c.bf16 %v1147_v1, %v1144_v63  ;;  %v1878_v6 = vadd.f32 %v1877_v4, %v1876_v2  ;;  %v1989_v7 = vpop.f32.mrb[9].mxu1  ;;  %v1879_v8 = vpop.f32.mrb[10].mxu0 }
 0x11f   : > { %v1990_v9 = vadd.f32 %v1989_v7, %v1988_v3  ;;  %v1991_v10 = vpop.f32.mrb[10].mxu1  ;;  %v1880_v11 = vpop.f32.mrb[11].mxu0 }
 0x120   : > { %1833 = vst [vmem:[%s2511_s29 + $0x8] sm:$0xff] %v1761_v5   ;;  %v991_v12 = vadd.f32 %v1878_v6, %v2502_v34  ;;  %v1881_v13 = vadd.f32 %v1880_v11, %v1879_v8  ;;  %v1992_v14 = vpop.f32.mrb[11].mxu1 }
 0x121   : > { %v1993_v15 = vadd.f32 %v1992_v14, %v1991_v10 }
 0x122   : > { %v1152_v16 = vadd.f32 %v1990_v9, %v991_v12  ;;  %v994_v17 = vadd.f32 %v1881_v13, %v2502_v34 }
 0x124   : > { %v1155_v18 = vadd.f32 %v1993_v15, %v994_v17  ;;  %v1882_v19 = vpop.f32.mrb[12].mxu0 }
 0x125   : > { %v1994_v20 = vpop.f32.mrb[12].mxu1  ;;  %v1883_v21 = vpop.f32.mrb[13].mxu0 }
 0x126   : > { %v1766_v22 = vpack.c.bf16 %v1155_v18, %v1152_v16  ;;  %v1884_v23 = vadd.f32 %v1883_v21, %v1882_v19  ;;  %v1995_v24 = vpop.f32.mrb[13].mxu1  ;;  %v1885_v25 = vpop.f32.mrb[14].mxu0 }
 0x127   : > { %v1996_v26 = vadd.f32 %v1995_v24, %v1994_v20  ;;  %v1997_v27 = vpop.f32.mrb[14].mxu1  ;;  %v1886_v28 = vpop.f32.mrb[15].mxu0 }
 0x128   : > { %1834 = vst [vmem:[%s2511_s29 + $0x10] sm:$0xff] %v1766_v22   ;;  %v999_v29 = vadd.f32 %v1884_v23, %v2502_v34  ;;  %v1887_v30 = vadd.f32 %v1886_v28, %v1885_v25  ;;  %v1998_v31 = vpop.f32.mrb[15].mxu1 }
 0x129   : > { %v1999_v32 = vadd.f32 %v1998_v31, %v1997_v27 }
 0x12a   : > { %v1160_v33 = vadd.f32 %v1996_v26, %v999_v29  ;;  %v1002_v35 = vadd.f32 %v1887_v30, %v2502_v34 }
 0x12c   : > { %v1163_v36 = vadd.f32 %v1999_v32, %v1002_v35  ;;  %v1888_v37 = vpop.f32.mrb[16].mxu0 }
 0x12d   : > { %v2000_v38 = vpop.f32.mrb[16].mxu1  ;;  %v1889_v39 = vpop.f32.mrb[17].mxu0 }
 0x12e   : > { %v1771_v40 = vpack.c.bf16 %v1163_v36, %v1160_v33  ;;  %v1890_v41 = vadd.f32 %v1889_v39, %v1888_v37  ;;  %v2001_v42 = vpop.f32.mrb[17].mxu1  ;;  %v1891_v43 = vpop.f32.mrb[18].mxu0 }
 0x12f   : > { %v2002_v44 = vadd.f32 %v2001_v42, %v2000_v38  ;;  %v2003_v45 = vpop.f32.mrb[18].mxu1  ;;  %v1892_v46 = vpop.f32.mrb[19].mxu0 }
 0x130   : > { %1835 = vst [vmem:[%s2511_s29 + $0x18] sm:$0xff] %v1771_v40   ;;  %v1007_v47 = vadd.f32 %v1890_v41, %v2502_v34  ;;  %v1893_v48 = vadd.f32 %v1892_v46, %v1891_v43  ;;  %v2004_v49 = vpop.f32.mrb[19].mxu1 }
 0x131   : > { %v2005_v50 = vadd.f32 %v2004_v49, %v2003_v45 }
 0x132   : > { %v1168_v51 = vadd.f32 %v2002_v44, %v1007_v47  ;;  %v1010_v52 = vadd.f32 %v1893_v48, %v2502_v34 }
 0x134   : > { %v1171_v53 = vadd.f32 %v2005_v50, %v1010_v52  ;;  %v1894_v54 = vpop.f32.mrb[20].mxu0 }
 0x135   : > { %v2006_v55 = vpop.f32.mrb[20].mxu1  ;;  %v1895_v56 = vpop.f32.mrb[21].mxu0 }
 0x136   : > { %v1776_v57 = vpack.c.bf16 %v1171_v53, %v1168_v51  ;;  %v1896_v58 = vadd.f32 %v1895_v56, %v1894_v54  ;;  %v2007_v59 = vpop.f32.mrb[21].mxu1  ;;  %v1897_v60 = vpop.f32.mrb[22].mxu0 }
 0x137   : > { %v2008_v61 = vadd.f32 %v2007_v59, %v2006_v55  ;;  %v2009_v62 = vpop.f32.mrb[22].mxu1  ;;  %v1898_v63 = vpop.f32.mrb[23].mxu0 }
 0x138   : > { %1836 = vst [vmem:[%s2511_s29 + $0x20] sm:$0xff] %v1776_v57   ;;  %v1015_v0 = vadd.f32 %v1896_v58, %v2502_v34  ;;  %v1899_v1 = vadd.f32 %v1898_v63, %v1897_v60  ;;  %v2010_v2 = vpop.f32.mrb[23].mxu1 }
 0x139   : > { %v2011_v3 = vadd.f32 %v2010_v2, %v2009_v62 }
 0x13a   : > { %v1176_v4 = vadd.f32 %v2008_v61, %v1015_v0  ;;  %v1018_v5 = vadd.f32 %v1899_v1, %v2502_v34 }
 0x13c   : > { %v1179_v6 = vadd.f32 %v2011_v3, %v1018_v5  ;;  %v1900_v7 = vpop.f32.mrb[24].mxu0 }
 0x13d   : > { %v2012_v8 = vpop.f32.mrb[24].mxu1  ;;  %v1901_v9 = vpop.f32.mrb[25].mxu0 }
 0x13e   : > { %v1781_v10 = vpack.c.bf16 %v1179_v6, %v1176_v4  ;;  %v1902_v11 = vadd.f32 %v1901_v9, %v1900_v7  ;;  %v2013_v12 = vpop.f32.mrb[25].mxu1  ;;  %v1903_v13 = vpop.f32.mrb[26].mxu0 }
 0x13f   : > { %v2014_v14 = vadd.f32 %v2013_v12, %v2012_v8  ;;  %v2015_v15 = vpop.f32.mrb[26].mxu1  ;;  %v1904_v16 = vpop.f32.mrb[27].mxu0 }
 0x140   : > { %1837 = vst [vmem:[%s2511_s29 + $0x28] sm:$0xff] %v1781_v10   ;;  %v1023_v17 = vadd.f32 %v1902_v11, %v2502_v34  ;;  %v1905_v18 = vadd.f32 %v1904_v16, %v1903_v13  ;;  %v2016_v19 = vpop.f32.mrb[27].mxu1 }
 0x141   : > { %v2017_v20 = vadd.f32 %v2016_v19, %v2015_v15 }
 0x142   : > { %v1184_v21 = vadd.f32 %v2014_v14, %v1023_v17  ;;  %v1026_v22 = vadd.f32 %v1905_v18, %v2502_v34 }
 0x144   : > { %v1187_v23 = vadd.f32 %v2017_v20, %v1026_v22  ;;  %v1906_v24 = vpop.f32.mrb[28].mxu0 }
 0x145   : > { %v2018_v25 = vpop.f32.mrb[28].mxu1  ;;  %v1907_v26 = vpop.f32.mrb[29].mxu0 }
 0x146   : > { %v1786_v27 = vpack.c.bf16 %v1187_v23, %v1184_v21  ;;  %v1908_v28 = vadd.f32 %v1907_v26, %v1906_v24  ;;  %v2019_v29 = vpop.f32.mrb[29].mxu1  ;;  %v1909_v30 = vpop.f32.mrb[30].mxu0 }
 0x147   : > { %v2020_v31 = vadd.f32 %v2019_v29, %v2018_v25  ;;  %v2021_v32 = vpop.f32.mrb[30].mxu1  ;;  %v1910_v33 = vpop.f32.mrb[31].mxu0 }
 0x148   : > { %1838 = vst [vmem:[%s2511_s29 + $0x30] sm:$0xff] %v1786_v27   ;;  %v1031_v35 = vadd.f32 %v1908_v28, %v2502_v34  ;;  %v1911_v36 = vadd.f32 %v1910_v33, %v1909_v30  ;;  %v2022_v37 = vpop.f32.mrb[31].mxu1 }
 0x149   : > { %v2023_v38 = vadd.f32 %v2022_v37, %v2021_v32 }
 0x14a   : > { %v1192_v39 = vadd.f32 %v2020_v31, %v1031_v35  ;;  %v1034_v40 = vadd.f32 %v1911_v36, %v2502_v34 }
 0x14c   : > { %v1195_v41 = vadd.f32 %v2023_v38, %v1034_v40  ;;  %v1912_v42 = vpop.f32.mrb[32].mxu0 }
 0x14d   : > { %v2024_v43 = vpop.f32.mrb[32].mxu1  ;;  %v1913_v44 = vpop.f32.mrb[33].mxu0 }
 0x14e   : > { %v1791_v45 = vpack.c.bf16 %v1195_v41, %v1192_v39  ;;  %v1914_v46 = vadd.f32 %v1913_v44, %v1912_v42  ;;  %v2025_v47 = vpop.f32.mrb[33].mxu1  ;;  %v1915_v48 = vpop.f32.mrb[34].mxu0 }
 0x14f   : > { %v2026_v49 = vadd.f32 %v2025_v47, %v2024_v43  ;;  %v2027_v50 = vpop.f32.mrb[34].mxu1  ;;  %v1916_v51 = vpop.f32.mrb[35].mxu0 }
 0x150   : > { %1839 = vst [vmem:[%s2511_s29 + $0x38] sm:$0xff] %v1791_v45   ;;  %v1039_v52 = vadd.f32 %v1914_v46, %v2502_v34  ;;  %v1917_v53 = vadd.f32 %v1916_v51, %v1915_v48  ;;  %v2028_v54 = vpop.f32.mrb[35].mxu1 }
 0x151   : > { %v2029_v55 = vadd.f32 %v2028_v54, %v2027_v50 }
 0x152   : > { %v1200_v56 = vadd.f32 %v2026_v49, %v1039_v52  ;;  %v1042_v57 = vadd.f32 %v1917_v53, %v2502_v34 }
 0x154   : > { %v1203_v58 = vadd.f32 %v2029_v55, %v1042_v57  ;;  %v1918_v59 = vpop.f32.mrb[36].mxu0 }
 0x155   : > { %v2030_v60 = vpop.f32.mrb[36].mxu1  ;;  %v1919_v61 = vpop.f32.mrb[37].mxu0 }
 0x156   : > { %v1796_v62 = vpack.c.bf16 %v1203_v58, %v1200_v56  ;;  %v1920_v63 = vadd.f32 %v1919_v61, %v1918_v59  ;;  %v2031_v0 = vpop.f32.mrb[37].mxu1  ;;  %v1921_v1 = vpop.f32.mrb[38].mxu0 }
 0x157   : > { %v2032_v2 = vadd.f32 %v2031_v0, %v2030_v60  ;;  %v2033_v3 = vpop.f32.mrb[38].mxu1  ;;  %v1922_v4 = vpop.f32.mrb[39].mxu0 }
 0x158   : > { %1840 = vst [vmem:[%s2511_s29 + $0x40] sm:$0xff] %v1796_v62   ;;  %v1047_v5 = vadd.f32 %v1920_v63, %v2502_v34  ;;  %v1923_v6 = vadd.f32 %v1922_v4, %v1921_v1  ;;  %v2034_v7 = vpop.f32.mrb[39].mxu1 }
 0x159   : > { %v2035_v8 = vadd.f32 %v2034_v7, %v2033_v3 }
 0x15a   : > { %v1208_v9 = vadd.f32 %v2032_v2, %v1047_v5  ;;  %v1050_v10 = vadd.f32 %v1923_v6, %v2502_v34 }
 0x15c   : > { %v1211_v11 = vadd.f32 %v2035_v8, %v1050_v10  ;;  %v1924_v12 = vpop.f32.mrb[40].mxu0 }
 0x15d   : > { %v2036_v13 = vpop.f32.mrb[40].mxu1  ;;  %v1925_v14 = vpop.f32.mrb[41].mxu0 }
 0x15e   : > { %v1801_v15 = vpack.c.bf16 %v1211_v11, %v1208_v9  ;;  %v1926_v16 = vadd.f32 %v1925_v14, %v1924_v12  ;;  %v2037_v17 = vpop.f32.mrb[41].mxu1  ;;  %v1927_v18 = vpop.f32.mrb[42].mxu0 }
 0x15f   : > { %v2038_v19 = vadd.f32 %v2037_v17, %v2036_v13  ;;  %v2039_v20 = vpop.f32.mrb[42].mxu1  ;;  %v1928_v21 = vpop.f32.mrb[43].mxu0 }
 0x160   : > { %1841 = vst [vmem:[%s2511_s29 + $0x48] sm:$0xff] %v1801_v15   ;;  %v1055_v22 = vadd.f32 %v1926_v16, %v2502_v34  ;;  %v1929_v23 = vadd.f32 %v1928_v21, %v1927_v18  ;;  %v2040_v24 = vpop.f32.mrb[43].mxu1 }
 0x161   : > { %v2041_v25 = vadd.f32 %v2040_v24, %v2039_v20 }
 0x162   : > { %v1216_v26 = vadd.f32 %v2038_v19, %v1055_v22  ;;  %v1058_v27 = vadd.f32 %v1929_v23, %v2502_v34 }
 0x164   : > { %v1219_v28 = vadd.f32 %v2041_v25, %v1058_v27  ;;  %v1930_v29 = vpop.f32.mrb[44].mxu0 }
 0x165   : > { %v2042_v30 = vpop.f32.mrb[44].mxu1  ;;  %v1931_v31 = vpop.f32.mrb[45].mxu0 }
 0x166   : > { %v1806_v32 = vpack.c.bf16 %v1219_v28, %v1216_v26  ;;  %v1932_v33 = vadd.f32 %v1931_v31, %v1930_v29  ;;  %v2043_v35 = vpop.f32.mrb[45].mxu1  ;;  %v1933_v36 = vpop.f32.mrb[46].mxu0 }
 0x167   : > { %v2044_v37 = vadd.f32 %v2043_v35, %v2042_v30  ;;  %v2045_v38 = vpop.f32.mrb[46].mxu1  ;;  %v1934_v39 = vpop.f32.mrb[47].mxu0 }
 0x168   : > { %1842 = vst [vmem:[%s2511_s29 + $0x50] sm:$0xff] %v1806_v32   ;;  %v1063_v40 = vadd.f32 %v1932_v33, %v2502_v34  ;;  %v1935_v41 = vadd.f32 %v1934_v39, %v1933_v36  ;;  %v2046_v42 = vpop.f32.mrb[47].mxu1 }
 0x169   : > { %v2047_v43 = vadd.f32 %v2046_v42, %v2045_v38 }
 0x16a   : > { %v1224_v44 = vadd.f32 %v2044_v37, %v1063_v40  ;;  %v1066_v45 = vadd.f32 %v1935_v41, %v2502_v34 }
 0x16c   : > { %v1227_v46 = vadd.f32 %v2047_v43, %v1066_v45  ;;  %v1936_v47 = vpop.f32.mrb[48].mxu0 }
 0x16d   : > { %v2048_v48 = vpop.f32.mrb[48].mxu1  ;;  %v1937_v49 = vpop.f32.mrb[49].mxu0 }
 0x16e   : > { %v1811_v50 = vpack.c.bf16 %v1227_v46, %v1224_v44  ;;  %v1938_v51 = vadd.f32 %v1937_v49, %v1936_v47  ;;  %v2049_v52 = vpop.f32.mrb[49].mxu1  ;;  %v1939_v53 = vpop.f32.mrb[50].mxu0 }
 0x16f   : > { %v2050_v54 = vadd.f32 %v2049_v52, %v2048_v48  ;;  %v2051_v55 = vpop.f32.mrb[50].mxu1  ;;  %v1940_v56 = vpop.f32.mrb[51].mxu0 }
 0x170   : > { %1843 = vst [vmem:[%s2511_s29 + $0x58] sm:$0xff] %v1811_v50   ;;  %v1071_v57 = vadd.f32 %v1938_v51, %v2502_v34  ;;  %v1941_v58 = vadd.f32 %v1940_v56, %v1939_v53  ;;  %v2052_v59 = vpop.f32.mrb[51].mxu1 }
 0x171   : > { %v2053_v60 = vadd.f32 %v2052_v59, %v2051_v55 }
 0x172   : > { %v1232_v61 = vadd.f32 %v2050_v54, %v1071_v57  ;;  %v1074_v62 = vadd.f32 %v1941_v58, %v2502_v34 }
 0x174   : > { %v1235_v63 = vadd.f32 %v2053_v60, %v1074_v62  ;;  %v1942_v0 = vpop.f32.mrb[52].mxu0 }
 0x175   : > { %v2054_v1 = vpop.f32.mrb[52].mxu1  ;;  %v1943_v2 = vpop.f32.mrb[53].mxu0 }
 0x176   : > { %v1816_v3 = vpack.c.bf16 %v1235_v63, %v1232_v61  ;;  %v1944_v4 = vadd.f32 %v1943_v2, %v1942_v0  ;;  %v2055_v5 = vpop.f32.mrb[53].mxu1  ;;  %v1945_v6 = vpop.f32.mrb[54].mxu0 }
 0x177   : > { %v2056_v7 = vadd.f32 %v2055_v5, %v2054_v1  ;;  %v2057_v8 = vpop.f32.mrb[54].mxu1  ;;  %v1946_v9 = vpop.f32.mrb[55].mxu0 }
 0x178   : > { %1844 = vst [vmem:[%s2511_s29 + $0x60] sm:$0xff] %v1816_v3   ;;  %v1079_v10 = vadd.f32 %v1944_v4, %v2502_v34  ;;  %v1947_v11 = vadd.f32 %v1946_v9, %v1945_v6  ;;  %v2058_v12 = vpop.f32.mrb[55].mxu1 }
 0x179   : > { %v2059_v13 = vadd.f32 %v2058_v12, %v2057_v8 }
 0x17a   : > { %v1240_v14 = vadd.f32 %v2056_v7, %v1079_v10  ;;  %v1082_v15 = vadd.f32 %v1947_v11, %v2502_v34 }
 0x17c   : > { %v1243_v16 = vadd.f32 %v2059_v13, %v1082_v15  ;;  %v1948_v17 = vpop.f32.mrb[56].mxu0 }
 0x17d   : > { %v2060_v18 = vpop.f32.mrb[56].mxu1  ;;  %v1949_v19 = vpop.f32.mrb[57].mxu0 }
 0x17e   : > { %v1821_v20 = vpack.c.bf16 %v1243_v16, %v1240_v14  ;;  %v1950_v21 = vadd.f32 %v1949_v19, %v1948_v17  ;;  %v2061_v22 = vpop.f32.mrb[57].mxu1  ;;  %v1951_v23 = vpop.f32.mrb[58].mxu0 }
 0x17f   : > { %v2062_v24 = vadd.f32 %v2061_v22, %v2060_v18  ;;  %v2063_v25 = vpop.f32.mrb[58].mxu1  ;;  %v1952_v26 = vpop.f32.mrb[59].mxu0 }
 0x180   : > { %1845 = vst [vmem:[%s2511_s29 + $0x68] sm:$0xff] %v1821_v20   ;;  %v1087_v27 = vadd.f32 %v1950_v21, %v2502_v34  ;;  %v1953_v28 = vadd.f32 %v1952_v26, %v1951_v23  ;;  %v2064_v29 = vpop.f32.mrb[59].mxu1 }
 0x181   : > { %v2065_v30 = vadd.f32 %v2064_v29, %v2063_v25 }
 0x182   : > { %v1248_v31 = vadd.f32 %v2062_v24, %v1087_v27  ;;  %v1090_v32 = vadd.f32 %v1953_v28, %v2502_v34 }
 0x184   : > { %v1251_v33 = vadd.f32 %v2065_v30, %v1090_v32  ;;  %v1954_v35 = vpop.f32.mrb[60].mxu0 }
 0x185   : > { %v2066_v36 = vpop.f32.mrb[60].mxu1  ;;  %v1955_v37 = vpop.f32.mrb[61].mxu0 }
 0x186   : > { %v1826_v38 = vpack.c.bf16 %v1251_v33, %v1248_v31  ;;  %v1956_v39 = vadd.f32 %v1955_v37, %v1954_v35  ;;  %v2067_v40 = vpop.f32.mrb[61].mxu1  ;;  %v1957_v41 = vpop.f32.mrb[62].mxu0 }
 0x187   : > { %v2068_v42 = vadd.f32 %v2067_v40, %v2066_v36  ;;  %v2069_v43 = vpop.f32.mrb[62].mxu1  ;;  %v1958_v44 = vpop.f32.mrb[63].mxu0 }
 0x188   : > { %1846 = vst [vmem:[%s2511_s29 + $0x70] sm:$0xff] %v1826_v38   ;;  %v1095_v45 = vadd.f32 %v1956_v39, %v2502_v34  ;;  %v1959_v46 = vadd.f32 %v1958_v44, %v1957_v41  ;;  %v2070_v47 = vpop.f32.mrb[63].mxu1 }
 0x189   : > { %v2071_v48 = vadd.f32 %v2070_v47, %v2069_v43 }
 0x18a   : > { %v1256_v49 = vadd.f32 %v2068_v42, %v1095_v45  ;;  %v1098_v50 = vadd.f32 %v1959_v46, %v2502_v34 }
 0x18c   : > { %v1259_v51 = vadd.f32 %v2071_v48, %v1098_v50 }
 0x18e   : > { %v1831_v52 = vpack.c.bf16 %v1259_v51, %v1256_v49 }
 0x190   : > { %1847 = vst [vmem:[%s2511_s29 + $0x78] sm:$0xff] %v1831_v52  }
 0x191 PF: > { %s13_s18 = sadd.s32 1, %s2310_s18   ;;  %s2584_s12 = smov %s2298_s15 }
 0x192   : > { %p10_p9 = scmp.ge.s32.totalorder %s13_s18, 50   ;;  %s2585_s13 = smov %s2302_s16 }
 0x193   : > { %s2586_s14 = smov %s2306_s17  ;;  %s2587_s15 = smov %s2591_s19 }
 0x194   : > { %s2588_s16 = smov %s2595_s20  ;;  %s2589_s17 = smov %s2599_s21 }
 0x195   :  { %12 = sbr.rel (!%p10_p9) target bundleno = 4 (0x4), region = 68 }

// kernel: multi_headed_attention.4
= control target key start
LH: loop header
LB: loop body
LE: loop exit
PB: predicated region body
PF: predicated region fallthrough
CT: control target
= control target key end

     0   :  { %s3945_s12 = smov 0   ;;  %s3947_s13 = smov 0   ;;  %s5261_s0 = inlined_call_operand.vmem [shape: bf16[3,4,2,512,128], index: 0, kind: input, shape index: {}, may-alias: {0,1,2}]   ;;  %s5262_s1 = inlined_call_operand.vmem [shape: bf16[3,4,2,512,128], index: 1, kind: input, shape index: {}, may-alias: {0,1,2}]   ;;  %s5263_s2 = inlined_call_operand.vmem [shape: bf16[3,4,2,512,128], index: 2, kind: input, shape index: {}, may-alias: {0,1,2}]   ;;  %s5264_s3 = inlined_call_operand.vmem [shape: bf16[4,2,512,128], index: 3, kind: output, shape index: {}]  }
   0x1   :  { %s3949_s14 = smov 0   ;;  %s3951_s15 = smov 0  }
   0x2   :  { %s3953_s16 = smov 0   ;;  %s3955_s17 = smov 0  }
   0x3   :  { %s3957_s18 = smov 0   ;;  %s3959_s19 = smov 0  }
   0x4   :  { %s3961_s20 = smov 0  }
   0x5 LB: > { %s28_s21 = sadd.s32 1, %s3903_s16  ;;  %s31_s22 = sadd.s32 1, %s3907_s17  ;;  %s3919_s20 = sphi %s3961_s20, %s13_s20   ;;  %s3915_s19 = sphi %s3959_s19, %s5575_s19   ;;  %s3911_s18 = sphi %s3957_s18, %s5574_s18   ;;  %s3907_s17 = sphi %s3955_s17, %s5573_s17   ;;  %s3903_s16 = sphi %s3953_s16, %s5572_s16   ;;  %s3899_s15 = sphi %s3951_s15, %s5571_s15   ;;  %s3895_s14 = sphi %s3949_s14, %s5570_s14   ;;  %s3891_s13 = sphi %s3947_s13, %s5569_s13   ;;  %s3887_s12 = sphi %s3945_s12, %s5568_s12  }
   0x6   : > { %p29_p0 = scmp.ge.s32.totalorder %s28_s21, 2  ;;  %p3013_p1 = scmp.ge.s32.totalorder %s3919_s20, 1 }
   0x7   : > { %p228_p2 = scmp.lt.s32.totalorder %s3919_s20, 33  ;;  %s35_s23 = sadd.s32 1, %s3911_s18 }
   0x8   : > { %s5577_s21 = smov (%p29_p0, %s28_s21), 0  ;;  %s5579_s22 = smov (!%p29_p0, %s31_s22), %s3907_s17 }
   0x9   : > { %p33_p3 = scmp.ge.s32.totalorder %s5579_s22, 2  ;;  %p229_p4 = pnand %p3013_p1, %p228_p2 }
   0xa   : > { %s39_s24 = sadd.s32 1, %s3915_s19 }
   0xb   : > { %s5581_s22 = smov (%p33_p3, %s5579_s22), 0  ;;  %s5583_s23 = smov (!%p33_p3, %s35_s23), %s3911_s18 }
   0xc   : > { %p37_p5 = scmp.ge.s32.totalorder %s5583_s23, 4  ;;  %232 = sbr.rel (%p229_p4) target bundleno = 1234 (0x4d2), region = 32 }
   0xe   : > { %s5585_s23 = smov (%p37_p5, %s5583_s23), 0  ;;  %s5587_s24 = smov (!%p37_p5, %s39_s24), %s3915_s19 }
   0xf   : > { %p41_p6 = scmp.ge.s32.totalorder %s5587_s24, 2 }
  0x11   : > { %s5589_s24 = smov (%p41_p6, %s5587_s24), 0 }
  0x12   : > { %5354 = sst [smem:[#allocation5_spill]] %s5589_s24 }
  0x13   : > { %s3014_s25 = sshll.u32 %s3891_s13, 5  ;;  %p297_p7 = scmp.lt.s32.totalorder %s3895_s14, 3 }
  0x14   : > { %p299_p8 = scmp.lt.s32.totalorder %s3899_s15, 1  ;;  %p301_p9 = scmp.lt.s32.totalorder %s3014_s25, 63 }
  0x15   : > { %s5591_s14 = smov (!%p297_p7, %s3895_s14), 3  ;;  %s3018_s29 = sshll.u32 %s3887_s12, 5 }
  0x16   : > { %s5593_s15 = smov (!%p299_p8, %s3899_s15), 1  ;;  %s5595_s25 = smov (!%p301_p9, %s3014_s25), 63 }
  0x17   : > { %s3015_s26 = sshll.u32 %s5593_s15, 6  ;;  %s3016_s27 = sshll.u32 %s5591_s14, 7 }
  0x18   : > { %s304_s28 = sadd.s32 %s3015_s26, %s5595_s25  ;;  %p315_p10 = scmp.lt.s32.totalorder %s3018_s29, 63 }
  0x19   : > { %s306_s30 = sadd.s32 %s3016_s27, %s304_s28  ;;  %p3030_p11 = scmp.ne.s32.totalorder %s3887_s12, 0 }
  0x1a   : > { %s3017_s4 = sshll.u32 %s306_s30, 2  ;;  %s5597_s29 = smov (!%p315_p10, %s3018_s29), 63  ;;  %vm359_vm0 = vcmask (!%p3030_p11), 7168   ;;  %v3921_v0 = vmov (!%p3030_p11), -inf   ;;  %v3922_v1 = vmov (!%p3030_p11), 0.0  }
  0x1b   : > { %s4016_s7 = scalar_lea.vmem %s5261_s0, %s3017_s4  ;;  %s4021_s10 = scalar_lea.vmem %s5264_s3, %s3017_s4  ;;  %360 = vst.msk [vmem:[#allocation2] sm:$0xff] (!%p3030_p11), %vm359_vm0, %v3921_v0  ;;  %361 = vst.msk [vmem:[#allocation2 + $0x8] sm:$0xff] (!%p3030_p11), %vm359_vm0, %v3921_v0 }
  0x1c   : > { %s2922_s11 = sadd.s32 %s3015_s26, %s5597_s29  ;;  %358 = sbr.rel (%p3030_p11) target bundleno = 75 (0x4b), region = 36  ;;  %362 = vst.msk [vmem:[#allocation2 + $0x10] sm:$0xff] (!%p3030_p11), %vm359_vm0, %v3921_v0  ;;  %363 = vst.msk [vmem:[#allocation2 + $0x18] sm:$0xff] (!%p3030_p11), %vm359_vm0, %v3921_v0 }
  0x1d   : > { %s2924_s13 = sadd.s32 %s3016_s27, %s2922_s11  ;;  %364 = vst.msk [vmem:[#allocation2 + $0x20] sm:$0xff] (!%p3030_p11), %vm359_vm0, %v3921_v0  ;;  %365 = vst.msk [vmem:[#allocation2 + $0x28] sm:$0xff] (!%p3030_p11), %vm359_vm0, %v3921_v0 }
  0x1e   : > { %s3021_s15 = sshll.u32 %s2924_s13, 2  ;;  %366 = vst.msk [vmem:[#allocation2 + $0x30] sm:$0xff] (!%p3030_p11), %vm359_vm0, %v3921_v0  ;;  %367 = vst.msk [vmem:[#allocation2 + $0x38] sm:$0xff] (!%p3030_p11), %vm359_vm0, %v3921_v0 }
  0x1f   : > { %s4026_s28 = scalar_lea.vmem %s5262_s1, %s3021_s15  ;;  %s4031_s5 = scalar_lea.vmem %s5263_s2, %s3021_s15  ;;  %368 = vst.msk [vmem:[#allocation2 + $0x40] sm:$0xff] (!%p3030_p11), %vm359_vm0, %v3921_v0  ;;  %369 = vst.msk [vmem:[#allocation2 + $0x48] sm:$0xff] (!%p3030_p11), %vm359_vm0, %v3921_v0 }
  0x20   : > { %370 = vst.msk [vmem:[#allocation2 + $0x50] sm:$0xff] (!%p3030_p11), %vm359_vm0, %v3921_v0  ;;  %371 = vst.msk [vmem:[#allocation2 + $0x58] sm:$0xff] (!%p3030_p11), %vm359_vm0, %v3921_v0 }
  0x21   : > { %372 = vst.msk [vmem:[#allocation2 + $0x60] sm:$0xff] (!%p3030_p11), %vm359_vm0, %v3921_v0  ;;  %373 = vst.msk [vmem:[#allocation2 + $0x68] sm:$0xff] (!%p3030_p11), %vm359_vm0, %v3921_v0 }
  0x22   : > { %374 = vst.msk [vmem:[#allocation2 + $0x70] sm:$0xff] (!%p3030_p11), %vm359_vm0, %v3921_v0  ;;  %375 = vst.msk [vmem:[#allocation2 + $0x78] sm:$0xff] (!%p3030_p11), %vm359_vm0, %v3921_v0 }
  0x23   : > { %376 = vst.msk [vmem:[#allocation2 + $0x80] sm:$0xff] %vm359_vm0, %v3921_v0  ;;  %377 = vst.msk [vmem:[#allocation2 + $0x88] sm:$0xff] %vm359_vm0, %v3921_v0 }
  0x24   : > { %378 = vst.msk [vmem:[#allocation2 + $0x90] sm:$0xff] %vm359_vm0, %v3921_v0  ;;  %379 = vst.msk [vmem:[#allocation2 + $0x98] sm:$0xff] %vm359_vm0, %v3921_v0 }
  0x25   : > { %380 = vst.msk [vmem:[#allocation2 + $0xa0] sm:$0xff] %vm359_vm0, %v3921_v0  ;;  %381 = vst.msk [vmem:[#allocation2 + $0xa8] sm:$0xff] %vm359_vm0, %v3921_v0 }
  0x26   : > { %382 = vst.msk [vmem:[#allocation2 + $0xb0] sm:$0xff] %vm359_vm0, %v3921_v0  ;;  %383 = vst.msk [vmem:[#allocation2 + $0xb8] sm:$0xff] %vm359_vm0, %v3921_v0 }
  0x27   : > { %384 = vst.msk [vmem:[#allocation2 + $0xc0] sm:$0xff] %vm359_vm0, %v3921_v0  ;;  %385 = vst.msk [vmem:[#allocation2 + $0xc8] sm:$0xff] %vm359_vm0, %v3921_v0 }
  0x28   : > { %386 = vst.msk [vmem:[#allocation2 + $0xd0] sm:$0xff] %vm359_vm0, %v3921_v0  ;;  %387 = vst.msk [vmem:[#allocation2 + $0xd8] sm:$0xff] %vm359_vm0, %v3921_v0 }
  0x29   : > { %388 = vst.msk [vmem:[#allocation2 + $0xe0] sm:$0xff] %vm359_vm0, %v3921_v0  ;;  %389 = vst.msk [vmem:[#allocation2 + $0xe8] sm:$0xff] %vm359_vm0, %v3921_v0 }
  0x2a   : > { %390 = vst.msk [vmem:[#allocation2 + $0xf0] sm:$0xff] %vm359_vm0, %v3921_v0  ;;  %391 = vst.msk [vmem:[#allocation2 + $0xf8] sm:$0xff] %vm359_vm0, %v3921_v0 }
  0x2b   : > { %392 = vst.msk [vmem:[#allocation3] sm:$0xff] %vm359_vm0, %v3922_v1  ;;  %393 = vst.msk [vmem:[#allocation3 + $0x8] sm:$0xff] %vm359_vm0, %v3922_v1 }
  0x2c   : > { %394 = vst.msk [vmem:[#allocation3 + $0x10] sm:$0xff] %vm359_vm0, %v3922_v1  ;;  %395 = vst.msk [vmem:[#allocation3 + $0x18] sm:$0xff] %vm359_vm0, %v3922_v1 }
  0x2d   : > { %396 = vst.msk [vmem:[#allocation3 + $0x20] sm:$0xff] %vm359_vm0, %v3922_v1  ;;  %397 = vst.msk [vmem:[#allocation3 + $0x28] sm:$0xff] %vm359_vm0, %v3922_v1 }
  0x2e   : > { %398 = vst.msk [vmem:[#allocation3 + $0x30] sm:$0xff] %vm359_vm0, %v3922_v1  ;;  %399 = vst.msk [vmem:[#allocation3 + $0x38] sm:$0xff] %vm359_vm0, %v3922_v1 }
  0x2f   : > { %400 = vst.msk [vmem:[#allocation3 + $0x40] sm:$0xff] %vm359_vm0, %v3922_v1  ;;  %401 = vst.msk [vmem:[#allocation3 + $0x48] sm:$0xff] %vm359_vm0, %v3922_v1 }
  0x30   : > { %402 = vst.msk [vmem:[#allocation3 + $0x50] sm:$0xff] %vm359_vm0, %v3922_v1  ;;  %403 = vst.msk [vmem:[#allocation3 + $0x58] sm:$0xff] %vm359_vm0, %v3922_v1 }
  0x31   : > { %404 = vst.msk [vmem:[#allocation3 + $0x60] sm:$0xff] %vm359_vm0, %v3922_v1  ;;  %405 = vst.msk [vmem:[#allocation3 + $0x68] sm:$0xff] %vm359_vm0, %v3922_v1 }
  0x32   : > { %406 = vst.msk [vmem:[#allocation3 + $0x70] sm:$0xff] %vm359_vm0, %v3922_v1  ;;  %407 = vst.msk [vmem:[#allocation3 + $0x78] sm:$0xff] %vm359_vm0, %v3922_v1 }
  0x33   : > { %408 = vst.msk [vmem:[#allocation3 + $0x80] sm:$0xff] %vm359_vm0, %v3922_v1  ;;  %409 = vst.msk [vmem:[#allocation3 + $0x88] sm:$0xff] %vm359_vm0, %v3922_v1 }
  0x34   : > { %410 = vst.msk [vmem:[#allocation3 + $0x90] sm:$0xff] %vm359_vm0, %v3922_v1  ;;  %411 = vst.msk [vmem:[#allocation3 + $0x98] sm:$0xff] %vm359_vm0, %v3922_v1 }
  0x35   : > { %412 = vst.msk [vmem:[#allocation3 + $0xa0] sm:$0xff] %vm359_vm0, %v3922_v1  ;;  %413 = vst.msk [vmem:[#allocation3 + $0xa8] sm:$0xff] %vm359_vm0, %v3922_v1 }
  0x36   : > { %414 = vst.msk [vmem:[#allocation3 + $0xb0] sm:$0xff] %vm359_vm0, %v3922_v1  ;;  %415 = vst.msk [vmem:[#allocation3 + $0xb8] sm:$0xff] %vm359_vm0, %v3922_v1 }
  0x37   : > { %416 = vst.msk [vmem:[#allocation3 + $0xc0] sm:$0xff] %vm359_vm0, %v3922_v1  ;;  %417 = vst.msk [vmem:[#allocation3 + $0xc8] sm:$0xff] %vm359_vm0, %v3922_v1 }
  0x38   : > { %418 = vst.msk [vmem:[#allocation3 + $0xd0] sm:$0xff] %vm359_vm0, %v3922_v1  ;;  %419 = vst.msk [vmem:[#allocation3 + $0xd8] sm:$0xff] %vm359_vm0, %v3922_v1 }
  0x39   : > { %420 = vst.msk [vmem:[#allocation3 + $0xe0] sm:$0xff] %vm359_vm0, %v3922_v1  ;;  %421 = vst.msk [vmem:[#allocation3 + $0xe8] sm:$0xff] %vm359_vm0, %v3922_v1 }
  0x3a   : > { %422 = vst.msk [vmem:[#allocation3 + $0xf0] sm:$0xff] %vm359_vm0, %v3922_v1  ;;  %423 = vst.msk [vmem:[#allocation3 + $0xf8] sm:$0xff] %vm359_vm0, %v3922_v1 }
  0x3b   : > { %424 = vst [vmem:[#allocation4] sm:$0xff] %v3922_v1  ;;  %425 = vst [vmem:[#allocation4 + $0x8] sm:$0xff] %v3922_v1 }
  0x3c   : > { %426 = vst [vmem:[#allocation4 + $0x10] sm:$0xff] %v3922_v1  ;;  %427 = vst [vmem:[#allocation4 + $0x18] sm:$0xff] %v3922_v1 }
  0x3d   : > { %428 = vst [vmem:[#allocation4 + $0x20] sm:$0xff] %v3922_v1  ;;  %429 = vst [vmem:[#allocation4 + $0x28] sm:$0xff] %v3922_v1 }
  0x3e   : > { %430 = vst [vmem:[#allocation4 + $0x30] sm:$0xff] %v3922_v1  ;;  %431 = vst [vmem:[#allocation4 + $0x38] sm:$0xff] %v3922_v1 }
  0x3f   : > { %432 = vst [vmem:[#allocation4 + $0x40] sm:$0xff] %v3922_v1  ;;  %433 = vst [vmem:[#allocation4 + $0x48] sm:$0xff] %v3922_v1 }
  0x40   : > { %434 = vst [vmem:[#allocation4 + $0x50] sm:$0xff] %v3922_v1  ;;  %435 = vst [vmem:[#allocation4 + $0x58] sm:$0xff] %v3922_v1 }
  0x41   : > { %436 = vst [vmem:[#allocation4 + $0x60] sm:$0xff] %v3922_v1  ;;  %437 = vst [vmem:[#allocation4 + $0x68] sm:$0xff] %v3922_v1 }
  0x42   : > { %438 = vst [vmem:[#allocation4 + $0x70] sm:$0xff] %v3922_v1  ;;  %439 = vst [vmem:[#allocation4 + $0x78] sm:$0xff] %v3922_v1 }
  0x43   : > { %440 = vst [vmem:[#allocation4 + $0x80] sm:$0xff] %v3922_v1  ;;  %441 = vst [vmem:[#allocation4 + $0x88] sm:$0xff] %v3922_v1 }
  0x44   : > { %442 = vst [vmem:[#allocation4 + $0x90] sm:$0xff] %v3922_v1  ;;  %443 = vst [vmem:[#allocation4 + $0x98] sm:$0xff] %v3922_v1 }
  0x45   : > { %444 = vst [vmem:[#allocation4 + $0xa0] sm:$0xff] %v3922_v1  ;;  %445 = vst [vmem:[#allocation4 + $0xa8] sm:$0xff] %v3922_v1 }
  0x46   : > { %446 = vst [vmem:[#allocation4 + $0xb0] sm:$0xff] %v3922_v1  ;;  %447 = vst [vmem:[#allocation4 + $0xb8] sm:$0xff] %v3922_v1 }
  0x47   : > { %448 = vst [vmem:[#allocation4 + $0xc0] sm:$0xff] %v3922_v1  ;;  %449 = vst [vmem:[#allocation4 + $0xc8] sm:$0xff] %v3922_v1 }
  0x48   : > { %450 = vst [vmem:[#allocation4 + $0xd0] sm:$0xff] %v3922_v1  ;;  %451 = vst [vmem:[#allocation4 + $0xd8] sm:$0xff] %v3922_v1 }
  0x49   : > { %452 = vst [vmem:[#allocation4 + $0xe0] sm:$0xff] %v3922_v1  ;;  %453 = vst [vmem:[#allocation4 + $0xe8] sm:$0xff] %v3922_v1 }
  0x4a   : > { %454 = vst [vmem:[#allocation4 + $0xf0] sm:$0xff] %v3922_v1  ;;  %455 = vst [vmem:[#allocation4 + $0xf8] sm:$0xff] %v3922_v1 }
  0x4b PF: > { %v3543_v2 = vld [vmem:[%s4026_s28 + $0x840] sm:$0xff]   ;;  %v3545_v4 = vld [vmem:[%s4026_s28 + $0x848] sm:$0xff]   ;;  %v3547_v6 = vld [vmem:[%s4026_s28 + $0x850] sm:$0xff]   ;;  %v3923_v51 = vmov 0   ;;  %vm1705_vm1 = vcmask 7168   ;;  %p3143_p12 = scmp.ne.s32.totalorder %s3887_s12, 1 }
  0x4c   : > { %v3544_v3 = vld [vmem:[%s4026_s28 + $0x800] sm:$0xff]   ;;  %3305 = vmatprep.subr.bf16.mxu0 %v3543_v2  ;;  %v3546_v5 = vld [vmem:[%s4026_s28 + $0x808] sm:$0xff]   ;;  %v3548_v7 = vld [vmem:[%s4026_s28 + $0x810] sm:$0xff]   ;;  %3541 = vset.pattern.permute.xlu0 %v3923_v51 }
  0x4d   : > { %3306 = vmatpush3.bf16.xpose.msra.mxu0 %v3544_v3  ;;  %v3549_v8 = vld [vmem:[%s4026_s28 + $0x858] sm:$0xff]   ;;  %v3559_v9 = vld [vmem:[%s4016_s7] sm:$0xff]   ;;  %v3553_v13 = vld [vmem:[%s4026_s28 + $0x868] sm:$0xff]   ;;  %3542 = vset.pattern.permute.xlu1 %v3923_v51 }
  0x4e   : > { %3307 = vmatprep.subr.bf16.mxu0 %v3545_v4  ;;  %3321 = vmatprep.mubr.bf16.mxu0 %v3559_v9  ;;  %v3550_v10 = vld [vmem:[%s4026_s28 + $0x818] sm:$0xff]   ;;  %v3551_v11 = vld [vmem:[%s4026_s28 + $0x860] sm:$0xff]   ;;  %v3554_v14 = vld [vmem:[%s4026_s28 + $0x828] sm:$0xff]  }
  0x4f   : > { %v3552_v12 = vld [vmem:[%s4026_s28 + $0x820] sm:$0xff]   ;;  %v3555_v15 = vld [vmem:[%s4026_s28 + $0x870] sm:$0xff]   ;;  %v3557_v17 = vld [vmem:[%s4026_s28 + $0x878] sm:$0xff]  }
  0x50   : > { %v3556_v16 = vld [vmem:[%s4026_s28 + $0x830] sm:$0xff]   ;;  %v3558_v18 = vld [vmem:[%s4026_s28 + $0x838] sm:$0xff]   ;;  %v3560_v19 = vld [vmem:[%s4016_s7 + $0x8] sm:$0xff]  }
  0x51   : > { %v3561_v20 = vld [vmem:[%s4016_s7 + $0x10] sm:$0xff]   ;;  %v3562_v21 = vld [vmem:[%s4016_s7 + $0x18] sm:$0xff]   ;;  %v3563_v22 = vld [vmem:[%s4016_s7 + $0x20] sm:$0xff]  }
  0x52   : > { %v3564_v23 = vld [vmem:[%s4016_s7 + $0x28] sm:$0xff]   ;;  %v3565_v24 = vld [vmem:[%s4016_s7 + $0x30] sm:$0xff]   ;;  %v3566_v25 = vld [vmem:[%s4016_s7 + $0x38] sm:$0xff]  }
  0x53   : > { %v3567_v26 = vld [vmem:[%s4016_s7 + $0x40] sm:$0xff]   ;;  %v3568_v27 = vld [vmem:[%s4016_s7 + $0x48] sm:$0xff]   ;;  %v3569_v28 = vld [vmem:[%s4016_s7 + $0x50] sm:$0xff]  }
  0x54   : > { %v3570_v29 = vld [vmem:[%s4016_s7 + $0x58] sm:$0xff]   ;;  %v3571_v30 = vld [vmem:[%s4016_s7 + $0x60] sm:$0xff]   ;;  %v3572_v31 = vld [vmem:[%s4016_s7 + $0x68] sm:$0xff]  }
  0x55   : > { %3308 = vmatpush3.bf16.xpose.msra.mxu0 %v3546_v5  ;;  %v3573_v32 = vld [vmem:[%s4016_s7 + $0x70] sm:$0xff]   ;;  %v3574_v33 = vld [vmem:[%s4016_s7 + $0x78] sm:$0xff]  }
  0x56   : > { %3309 = vmatprep.subr.bf16.mxu0 %v3547_v6 }
  0x5d   : > { %3310 = vmatpush3.bf16.xpose.msra.mxu0 %v3548_v7 }
  0x5e   : > { %3311 = vmatprep.subr.bf16.mxu0 %v3549_v8 }
  0x65   : > { %3312 = vmatpush3.bf16.xpose.msra.mxu0 %v3550_v10 }
  0x66   : > { %3313 = vmatprep.subr.bf16.mxu0 %v3551_v11 }
  0x6d   : > { %3314 = vmatpush3.bf16.xpose.msra.mxu0 %v3552_v12 }
  0x6e   : > { %3315 = vmatprep.subr.bf16.mxu0 %v3553_v13 }
  0x75   : > { %3316 = vmatpush3.bf16.xpose.msra.mxu0 %v3554_v14 }
  0x76   : > { %3317 = vmatprep.subr.bf16.mxu0 %v3555_v15 }
  0x7d   : > { %3318 = vmatpush3.bf16.xpose.msra.mxu0 %v3556_v16 }
  0x7e   : > { %3319 = vmatprep.subr.bf16.mxu0 %v3557_v17 }
  0x85   : > { %3320 = vmatpush3.bf16.xpose.msra.mxu0 %v3558_v18 }
  0x8c   : > { %3322 = vmatmul.mubr.bf16.vlgmr.msra.gmra.mrb[0].mxu0 %v3559_v9 }
  0x8d   : > { %3323 = vmatprep.mubr.bf16.mxu0 %v3560_v19 }
  0x94   : > { %3324 = vmatmul.mubr.bf16.gmra.mrb[4].mxu0 %v3560_v19 }
  0x95   : > { %3325 = vmatprep.mubr.bf16.mxu0 %v3561_v20 }
  0x9c   : > { %3326 = vmatmul.mubr.bf16.gmra.mrb[8].mxu0 %v3561_v20 }
  0x9d   : > { %3327 = vmatprep.mubr.bf16.mxu0 %v3562_v21 }
  0xa4   : > { %3328 = vmatmul.mubr.bf16.gmra.mrb[12].mxu0 %v3562_v21 }
  0xa5   : > { %3329 = vmatprep.mubr.bf16.mxu0 %v3563_v22 }
  0xac   : > { %3330 = vmatmul.mubr.bf16.gmra.mrb[16].mxu0 %v3563_v22 }
  0xad   : > { %3331 = vmatprep.mubr.bf16.mxu0 %v3564_v23 }
  0xb4   : > { %3332 = vmatmul.mubr.bf16.gmra.mrb[20].mxu0 %v3564_v23 }
  0xb5   : > { %3333 = vmatprep.mubr.bf16.mxu0 %v3565_v24 }
  0xbc   : > { %3334 = vmatmul.mubr.bf16.gmra.mrb[24].mxu0 %v3565_v24 }
  0xbd   : > { %3335 = vmatprep.mubr.bf16.mxu0 %v3566_v25 }
  0xc4   : > { %3336 = vmatmul.mubr.bf16.gmra.mrb[28].mxu0 %v3566_v25 }
  0xc5   : > { %3337 = vmatprep.mubr.bf16.mxu0 %v3567_v26 }
  0xcc   : > { %3338 = vmatmul.mubr.bf16.gmra.mrb[32].mxu0 %v3567_v26 }
  0xcd   : > { %3339 = vmatprep.mubr.bf16.mxu0 %v3568_v27 }
  0xd4   : > { %3340 = vmatmul.mubr.bf16.gmra.mrb[36].mxu0 %v3568_v27 }
  0xd5   : > { %3341 = vmatprep.mubr.bf16.mxu0 %v3569_v28 }
  0xdc   : > { %3342 = vmatmul.mubr.bf16.gmra.mrb[40].mxu0 %v3569_v28 }
  0xdd   : > { %3343 = vmatprep.mubr.bf16.mxu0 %v3570_v29 }
  0xe4   : > { %3344 = vmatmul.mubr.bf16.gmra.mrb[44].mxu0 %v3570_v29 }
  0xe5   : > { %3345 = vmatprep.mubr.bf16.mxu0 %v3571_v30 }
  0xec   : > { %3346 = vmatmul.mubr.bf16.gmra.mrb[48].mxu0 %v3571_v30 }
  0xed   : > { %3347 = vmatprep.mubr.bf16.mxu0 %v3572_v31 }
  0xf4   : > { %3348 = vmatmul.mubr.bf16.gmra.mrb[52].mxu0 %v3572_v31 }
  0xf5   : > { %3349 = vmatprep.mubr.bf16.mxu0 %v3573_v32 }
  0xfc   : > { %3350 = vmatmul.mubr.bf16.gmra.mrb[56].mxu0 %v3573_v32 }
  0xfd   : > { %3351 = vmatprep.mubr.bf16.mxu0 %v3574_v33 }
 0x104   : > { %3352 = vmatmul.mubr.bf16.gmra.mrb[60].mxu0 %v3574_v33 }
 0x15f   : > { %v4194_v34 = vpop.f32.mrb[0].mxu0 }
 0x160   : > { %v4196_v35 = vpop.f32.mrb[1].mxu0 }
 0x161   : > { %v4198_v36 = vpop.f32.mrb[2].mxu0  ;;  %v937_v37 = vmax.f32 %v4194_v34, %v4196_v35 }
 0x162   : > { %v4202_v38 = vpop.f32.mrb[3].mxu0 }
 0x163   : > { %938 = vmax.xlane.f32.xlu0 %v937_v37  ;;  %v940_v39 = vmax.f32 %v4198_v36, %v4202_v38 }
 0x167   : > { %941 = vmax.xlane.f32.xlu0 %v940_v39  ;;  %v4206_v40 = vpop.f32.mrb[4].mxu0 }
 0x168   : > { %v4208_v41 = vpop.f32.mrb[5].mxu0 }
 0x169   : > { %v4210_v42 = vpop.f32.mrb[6].mxu0  ;;  %v943_v43 = vmax.f32 %v4206_v40, %v4208_v41 }
 0x16a   : > { %v4214_v44 = vpop.f32.mrb[7].mxu0 }
 0x16b   : > { %944 = vmax.xlane.f32.xlu1 %v943_v43  ;;  %v946_v45 = vmax.f32 %v4210_v42, %v4214_v44 }
 0x16f   : > { %947 = vmax.xlane.f32.xlu1 %v946_v45  ;;  %v4218_v46 = vpop.f32.mrb[8].mxu0 }
 0x170   : > { %v4220_v47 = vpop.f32.mrb[9].mxu0 }
 0x171   : > { %v4222_v48 = vpop.f32.mrb[10].mxu0  ;;  %v949_v49 = vmax.f32 %v4218_v46, %v4220_v47 }
 0x172   : > { %v4226_v50 = vpop.f32.mrb[11].mxu0 }
 0x173   : > { %950 = vmax.xlane.f32.xlu0 %v949_v49  ;;  %v952_v52 = vmax.f32 %v4222_v48, %v4226_v50 }
 0x175   : > { %953 = vmax.xlane.f32.xlu1 %v952_v52 }
 0x177   : > { %v4230_v53 = vpop.f32.mrb[12].mxu0 }
 0x178   : > { %v4232_v54 = vpop.f32.mrb[13].mxu0 }
 0x179   : > { %v4234_v55 = vpop.f32.mrb[14].mxu0  ;;  %v955_v56 = vmax.f32 %v4230_v53, %v4232_v54 }
 0x17a   : > { %v4238_v57 = vpop.f32.mrb[15].mxu0 }
 0x17b   : > { %956 = vmax.xlane.f32.xlu0 %v955_v56  ;;  %v958_v58 = vmax.f32 %v4234_v55, %v4238_v57 }
 0x17d   : > { %959 = vmax.xlane.f32.xlu1 %v958_v58 }
 0x17f   : > { %v4242_v59 = vpop.f32.mrb[16].mxu0 }
 0x180   : > { %v4244_v60 = vpop.f32.mrb[17].mxu0 }
 0x181   : > { %v4246_v61 = vpop.f32.mrb[18].mxu0  ;;  %v961_v62 = vmax.f32 %v4242_v59, %v4244_v60 }
 0x182   : > { %v4250_v63 = vpop.f32.mrb[19].mxu0 }
 0x183   : > { %962 = vmax.xlane.f32.xlu0 %v961_v62  ;;  %v964_v0 = vmax.f32 %v4246_v61, %v4250_v63 }
 0x185   : > { %965 = vmax.xlane.f32.xlu1 %v964_v0 }
 0x187   : > { %v4254_v1 = vpop.f32.mrb[20].mxu0 }
 0x188   : > { %v4256_v2 = vpop.f32.mrb[21].mxu0 }
 0x189   : > { %v4258_v3 = vpop.f32.mrb[22].mxu0  ;;  %v967_v4 = vmax.f32 %v4254_v1, %v4256_v2 }
 0x18a   : > { %v4262_v5 = vpop.f32.mrb[23].mxu0 }
 0x18b   : > { %968 = vmax.xlane.f32.xlu0 %v967_v4  ;;  %v970_v6 = vmax.f32 %v4258_v3, %v4262_v5 }
 0x18d   : > { %971 = vmax.xlane.f32.xlu1 %v970_v6 }
 0x18f   : > { %v4266_v7 = vpop.f32.mrb[24].mxu0 }
 0x190   : > { %5355 = vst [vmem:[#allocation6_spill] sm:$0xff] %v4266_v7  ;;  %v4268_v8 = vpop.f32.mrb[25].mxu0 }
 0x191   : > { %5356 = vst [vmem:[#allocation7_spill] sm:$0xff] %v4268_v8  ;;  %v4270_v9 = vpop.f32.mrb[26].mxu0  ;;  %v973_v10 = vmax.f32 %v4266_v7, %v4268_v8 }
 0x192   : > { %5357 = vst [vmem:[#allocation8_spill] sm:$0xff] %v4270_v9  ;;  %v4274_v11 = vpop.f32.mrb[27].mxu0 }
 0x193   : > { %5358 = vst [vmem:[#allocation9_spill] sm:$0xff] %v4274_v11  ;;  %974 = vmax.xlane.f32.xlu0 %v973_v10  ;;  %v976_v12 = vmax.f32 %v4270_v9, %v4274_v11  ;;  %v4540_v11 = vld [vmem:[#allocation2 + $0x70] sm:$0xff]  ;;  %v4542_v9 = vld [vmem:[#allocation2 + $0x78] sm:$0xff] }
 0x194   : > { %5401 = vst [vmem:[#allocation52_spill] sm:$0xff] %v4540_v11  ;;  %5402 = vst [vmem:[#allocation53_spill] sm:$0xff] %v4542_v9 }
 0x195   : > { %977 = vmax.xlane.f32.xlu1 %v976_v12 }
 0x197   : > { %v4278_v13 = vpop.f32.mrb[28].mxu0 }
 0x198   : > { %5359 = vst [vmem:[#allocation10_spill] sm:$0xff] %v4278_v13  ;;  %v4280_v14 = vpop.f32.mrb[29].mxu0 }
 0x199   : > { %5360 = vst [vmem:[#allocation11_spill] sm:$0xff] %v4280_v14  ;;  %v4282_v15 = vpop.f32.mrb[30].mxu0  ;;  %v979_v16 = vmax.f32 %v4278_v13, %v4280_v14 }
 0x19a   : > { %5361 = vst [vmem:[#allocation12_spill] sm:$0xff] %v4282_v15  ;;  %v4286_v17 = vpop.f32.mrb[31].mxu0 }
 0x19b   : > { %5362 = vst [vmem:[#allocation13_spill] sm:$0xff] %v4286_v17  ;;  %980 = vmax.xlane.f32.xlu0 %v979_v16  ;;  %v982_v18 = vmax.f32 %v4282_v15, %v4286_v17  ;;  %v4524_v17 = vld [vmem:[#allocation2 + $0x68] sm:$0xff] }
 0x19c   : > { %5400 = vst [vmem:[#allocation51_spill] sm:$0xff] %v4524_v17 }
 0x19d   : > { %983 = vmax.xlane.f32.xlu1 %v982_v18 }
 0x19f   : > { %v4290_v19 = vpop.f32.mrb[32].mxu0 }
 0x1a0   : > { %5363 = vst [vmem:[#allocation14_spill] sm:$0xff] %v4290_v19  ;;  %v4292_v20 = vpop.f32.mrb[33].mxu0 }
 0x1a1   : > { %5364 = vst [vmem:[#allocation15_spill] sm:$0xff] %v4292_v20  ;;  %v4294_v21 = vpop.f32.mrb[34].mxu0  ;;  %v985_v22 = vmax.f32 %v4290_v19, %v4292_v20 }
 0x1a2   : > { %5365 = vst [vmem:[#allocation16_spill] sm:$0xff] %v4294_v21  ;;  %v4298_v23 = vpop.f32.mrb[35].mxu0 }
 0x1a3   : > { %5366 = vst [vmem:[#allocation17_spill] sm:$0xff] %v4298_v23  ;;  %986 = vmax.xlane.f32.xlu0 %v985_v22  ;;  %v988_v24 = vmax.f32 %v4294_v21, %v4298_v23  ;;  %v4504_v23 = vld [vmem:[#allocation2 + $0x58] sm:$0xff] }
 0x1a4   : > { %5396 = vst [vmem:[#allocation47_spill] sm:$0xff] %v4504_v23 }
 0x1a5   : > { %989 = vmax.xlane.f32.xlu1 %v988_v24 }
 0x1a7   : > { %v4302_v25 = vpop.f32.mrb[36].mxu0 }
 0x1a8   : > { %5367 = vst [vmem:[#allocation18_spill] sm:$0xff] %v4302_v25  ;;  %v4304_v26 = vpop.f32.mrb[37].mxu0 }
 0x1a9   : > { %5368 = vst [vmem:[#allocation19_spill] sm:$0xff] %v4304_v26  ;;  %v4306_v27 = vpop.f32.mrb[38].mxu0  ;;  %v991_v28 = vmax.f32 %v4302_v25, %v4304_v26  ;;  %v4461_v26 = vld [vmem:[#allocation2 + $0x30] sm:$0xff] }
 0x1aa   : > { %5369 = vst [vmem:[#allocation20_spill] sm:$0xff] %v4306_v27  ;;  %v4310_v29 = vpop.f32.mrb[39].mxu0 }
 0x1ab   : > { %5370 = vst [vmem:[#allocation21_spill] sm:$0xff] %v4310_v29  ;;  %992 = vmax.xlane.f32.xlu0 %v991_v28  ;;  %v994_v30 = vmax.f32 %v4306_v27, %v4310_v29  ;;  %v4433_v29 = vld [vmem:[#allocation2 + $0x20] sm:$0xff] }
 0x1ad   : > { %995 = vmax.xlane.f32.xlu1 %v994_v30 }
 0x1af   : > { %v4314_v31 = vpop.f32.mrb[40].mxu0 }
 0x1b0   : > { %5371 = vst [vmem:[#allocation22_spill] sm:$0xff] %v4314_v31  ;;  %v4316_v32 = vpop.f32.mrb[41].mxu0 }
 0x1b1   : > { %5372 = vst [vmem:[#allocation23_spill] sm:$0xff] %v4316_v32  ;;  %v4318_v33 = vpop.f32.mrb[42].mxu0  ;;  %v997_v37 = vmax.f32 %v4314_v31, %v4316_v32  ;;  %v3583_v32 = vld [vmem:[%s4031_s5 + $0x1060] sm:$0xff]  }
 0x1b2   : > { %5373 = vst [vmem:[#allocation24_spill] sm:$0xff] %v4318_v33  ;;  %v4322_v39 = vpop.f32.mrb[43].mxu0  ;;  %v3584_v31 = vld [vmem:[%s4031_s5 + $0x1020] sm:$0xff]  }
 0x1b3   : > { %5374 = vst [vmem:[#allocation25_spill] sm:$0xff] %v4322_v39  ;;  %998 = vmax.xlane.f32.xlu1 %v997_v37  ;;  %v1000_v43 = vmax.f32 %v4318_v33, %v4322_v39 }
 0x1b5   : > { %1001 = vmax.xlane.f32.xlu0 %v1000_v43 }
 0x1b7   : > { %v4326_v45 = vpop.f32.mrb[44].mxu0 }
 0x1b8   : > { %5375 = vst [vmem:[#allocation26_spill] sm:$0xff] %v4326_v45  ;;  %v4328_v49 = vpop.f32.mrb[45].mxu0 }
 0x1b9   : > { %5376 = vst [vmem:[#allocation27_spill] sm:$0xff] %v4328_v49  ;;  %v4330_v51 = vpop.f32.mrb[46].mxu0  ;;  %v1003_v52 = vmax.f32 %v4326_v45, %v4328_v49  ;;  %v4390_v49 = vld [vmem:[#allocation2] sm:$0xff]  ;;  %v3579_v45 = vld [vmem:[%s4031_s5 + $0x1050] sm:$0xff]  }
 0x1ba   : > { %5377 = vst [vmem:[#allocation28_spill] sm:$0xff] %v4330_v51  ;;  %v4334_v56 = vpop.f32.mrb[47].mxu0 }
 0x1bb   : > { %5378 = vst [vmem:[#allocation29_spill] sm:$0xff] %v4334_v56  ;;  %1004 = vmax.xlane.f32.xlu1 %v1003_v52  ;;  %v1006_v58 = vmax.f32 %v4330_v51, %v4334_v56 }
 0x1bd   : > { %1007 = vmax.xlane.f32.xlu0 %v1006_v58 }
 0x1bf   : > { %v4338_v62 = vpop.f32.mrb[48].mxu0 }
 0x1c0   : > { %5379 = vst [vmem:[#allocation30_spill] sm:$0xff] %v4338_v62  ;;  %v4340_v0 = vpop.f32.mrb[49].mxu0 }
 0x1c1   : > { %5380 = vst [vmem:[#allocation31_spill] sm:$0xff] %v4340_v0  ;;  %v4342_v4 = vpop.f32.mrb[50].mxu0  ;;  %v1009_v6 = vmax.f32 %v4338_v62, %v4340_v0  ;;  %v3575_v0 = vld [vmem:[%s4031_s5 + $0x1040] sm:$0xff]  }
 0x1c2   : > { %5381 = vst [vmem:[#allocation32_spill] sm:$0xff] %v4342_v4  ;;  %v4346_v10 = vpop.f32.mrb[51].mxu0  ;;  %v3576_v62 = vld [vmem:[%s4031_s5 + $0x1000] sm:$0xff]   ;;  %3353 = vmatprep.subr.bf16.mxu1 %v3575_v0 }
 0x1c3   : > { %5382 = vst [vmem:[#allocation33_spill] sm:$0xff] %v4346_v10  ;;  %1010 = vmax.xlane.f32.xlu0 %v1009_v6  ;;  %v1012_v12 = vmax.f32 %v4342_v4, %v4346_v10  ;;  %3354 = vmatpush3.bf16.msra.mxu1 %v3576_v62  ;;  %v3588_v10 = vld [vmem:[%s4031_s5 + $0x1030] sm:$0xff]  }
 0x1c5   : > { %1013 = vmax.xlane.f32.xlu1 %v1012_v12 }
 0x1c7   : > { %v4350_v16 = vpop.f32.mrb[52].mxu0 }
 0x1c8   : > { %5383 = vst [vmem:[#allocation34_spill] sm:$0xff] %v4350_v16  ;;  %v4352_v18 = vpop.f32.mrb[53].mxu0 }
 0x1c9   : > { %5384 = vst [vmem:[#allocation35_spill] sm:$0xff] %v4352_v18  ;;  %v4354_v22 = vpop.f32.mrb[54].mxu0  ;;  %v1015_v24 = vmax.f32 %v4350_v16, %v4352_v18 }
 0x1ca   : > { %5385 = vst [vmem:[#allocation36_spill] sm:$0xff] %v4354_v22  ;;  %v4358_v28 = vpop.f32.mrb[55].mxu0 }
 0x1cb   : > { %5386 = vst [vmem:[#allocation37_spill] sm:$0xff] %v4358_v28  ;;  %1016 = vmax.xlane.f32.xlu1 %v1015_v24  ;;  %v1018_v30 = vmax.f32 %v4354_v22, %v4358_v28  ;;  %v4421_v28 = vld [vmem:[#allocation2 + $0x18] sm:$0xff]  ;;  %v3586_v22 = vld [vmem:[%s4031_s5 + $0x1028] sm:$0xff]  }
 0x1cd   : > { %1019 = vmax.xlane.f32.xlu0 %v1018_v30 }
 0x1cf   : > { %v4362_v37 = vpop.f32.mrb[56].mxu0 }
 0x1d0   : > { %5387 = vst [vmem:[#allocation38_spill] sm:$0xff] %v4362_v37  ;;  %v4364_v43 = vpop.f32.mrb[57].mxu0 }
 0x1d1   : > { %5388 = vst [vmem:[#allocation39_spill] sm:$0xff] %v4364_v43  ;;  %v4366_v52 = vpop.f32.mrb[58].mxu0  ;;  %v1021_v58 = vmax.f32 %v4362_v37, %v4364_v43  ;;  %v4397_v37 = vld [vmem:[#allocation2 + $0x8] sm:$0xff] }
 0x1d2   : > { %5389 = vst [vmem:[#allocation40_spill] sm:$0xff] %v4366_v52  ;;  %v4370_v6 = vpop.f32.mrb[59].mxu0 }
 0x1d3   : > { %5390 = vst [vmem:[#allocation41_spill] sm:$0xff] %v4370_v6  ;;  %v1024_v12 = vmax.f32 %v4366_v52, %v4370_v6  ;;  %1022 = vmax.xlane.f32.xlu0 %v1021_v58  ;;  %v3577_v58 = vld [vmem:[%s4031_s5 + $0x1048] sm:$0xff]   ;;  %v3580_v6 = vld [vmem:[%s4031_s5 + $0x1010] sm:$0xff]  }
 0x1d4   : > { %3355 = vmatprep.subr.bf16.mxu1 %v3577_v58  ;;  %v3581_v58 = vld [vmem:[%s4031_s5 + $0x1058] sm:$0xff]  }
 0x1d5   : > { %1025 = vmax.xlane.f32.xlu1 %v1024_v12  ;;  %v3578_v12 = vld [vmem:[%s4031_s5 + $0x1008] sm:$0xff]  }
 0x1d6   : > { %3356 = vmatpush3.bf16.msra.mxu1 %v3578_v12 }
 0x1d7   : > { %v4374_v24 = vpop.f32.mrb[60].mxu0  ;;  %3357 = vmatprep.subr.bf16.mxu1 %v3579_v45  ;;  %v4409_v45 = vld [vmem:[#allocation2 + $0x10] sm:$0xff] }
 0x1d8   : > { %5391 = vst [vmem:[#allocation42_spill] sm:$0xff] %v4374_v24  ;;  %v4376_v30 = vpop.f32.mrb[61].mxu0 }
 0x1d9   : > { %5392 = vst [vmem:[#allocation43_spill] sm:$0xff] %v4376_v30  ;;  %v4378_v18 = vpop.f32.mrb[62].mxu0 }
 0x1da   : > { %5393 = vst [vmem:[#allocation44_spill] sm:$0xff] %v4378_v18  ;;  %v4382_v43 = vpop.f32.mrb[63].mxu0  ;;  %3358 = vmatpush3.bf16.msra.mxu1 %v3580_v6  ;;  %v3585_v6 = vld [vmem:[%s4031_s5 + $0x1068] sm:$0xff]  }
 0x1db   : > { %5394 = vst [vmem:[#allocation45_spill] sm:$0xff] %v4382_v43  ;;  %3359 = vmatprep.subr.bf16.mxu1 %v3581_v58  ;;  %v4440_v58 = vld [vmem:[#allocation2 + $0x28] sm:$0xff] }
 0x1f0   : > { %v939_v16 = vpop.xlane.xlu0 %938 }
 0x1f1   : > { %v4395_v52 = vmax.f32 %v4390_v49, %v939_v16  ;;  %v3582_v16 = vld [vmem:[%s4031_s5 + $0x1018] sm:$0xff]  }
 0x1f2   : > { %3360 = vmatpush3.bf16.msra.mxu1 %v3582_v16 }
 0x1f3   : > { %2347 = vst.msk [vmem:[#allocation2] sm:$0xff] %vm1705_vm1, %v4395_v52  ;;  %1163 = vperm.xlu0 %3541, %v4395_v52   ;;  %3361 = vmatprep.subr.bf16.mxu1 %v3583_v32 }
 0x1f4   : > { %v942_v0 = vpop.xlane.xlu0 %941 }
 0x1f5   : > { %v4406_v12 = vmax.f32 %v4397_v37, %v942_v0 }
 0x1f6   : > { %3362 = vmatpush3.bf16.msra.mxu1 %v3584_v31 }
 0x1f7   : > { %2348 = vst.msk [vmem:[#allocation2 + $0x8] sm:$0xff] %vm1705_vm1, %v4406_v12  ;;  %1168 = vperm.xlu1 %3542, %v4406_v12   ;;  %3363 = vmatprep.subr.bf16.mxu1 %v3585_v6 }
 0x1f8   : > { %v945_v62 = vpop.xlane.xlu1 %944 }
 0x1f9   : > { %v4418_v0 = vmax.f32 %v4409_v45, %v945_v62 }
 0x1fa   : > { %3364 = vmatpush3.bf16.msra.mxu1 %v3586_v22  ;;  %v3589_v22 = vld [vmem:[%s4031_s5 + $0x1078] sm:$0xff]  }
 0x1fb   : > { %2349 = vst.msk [vmem:[#allocation2 + $0x10] sm:$0xff] %vm1705_vm1, %v4418_v0  ;;  %1173 = vperm.xlu1 %3542, %v4418_v0  }
 0x1fc   : > { %v948_v16 = vpop.xlane.xlu1 %947 }
 0x1fd   : > { %v4430_v62 = vmax.f32 %v4421_v28, %v948_v16  ;;  %v3587_v16 = vld [vmem:[%s4031_s5 + $0x1070] sm:$0xff]  }
 0x1fe   : > { %3365 = vmatprep.subr.bf16.mxu1 %v3587_v16  ;;  %v3590_v16 = vld [vmem:[%s4031_s5 + $0x1038] sm:$0xff]  }
 0x1ff   : > { %2350 = vst.msk [vmem:[#allocation2 + $0x18] sm:$0xff] %vm1705_vm1, %v4430_v62  ;;  %1178 = vperm.xlu1 %3542, %v4430_v62   ;;  %3366 = vmatpush3.bf16.msra.mxu1 %v3588_v10 }
 0x200   : > { %v951_v31 = vpop.xlane.xlu0 %950  ;;  %3367 = vmatprep.subr.bf16.mxu1 %v3589_v22 }
 0x201   : > { %v4444_v27 = vmax.f32 %v4433_v29, %v951_v31  ;;  %v4484_v31 = vld [vmem:[#allocation2 + $0x48] sm:$0xff] }
 0x202   : > { %v954_v6 = vpop.xlane.xlu1 %953 }
 0x203   : > { %2351 = vst.msk [vmem:[#allocation2 + $0x20] sm:$0xff] %vm1705_vm1, %v4444_v27  ;;  %v4452_v4 = vmax.f32 %v4440_v58, %v954_v6  ;;  %1183 = vperm.xlu0 %3541, %v4444_v27   ;;  %3368 = vmatpush3.bf16.msra.mxu1 %v3590_v16  ;;  %v4464_v6 = vld [vmem:[#allocation2 + $0x38] sm:$0xff] }
 0x205   : > { %2352 = vst.msk [vmem:[#allocation2 + $0x28] sm:$0xff] %vm1705_vm1, %v4452_v4 }
 0x207   : > { %1188 = vperm.xlu0 %3541, %v4452_v4  }
 0x208   : > { %v957_v32 = vpop.xlane.xlu0 %956 }
 0x209   : > { %v4467_v25 = vmax.f32 %v4461_v26, %v957_v32  ;;  %v4481_v32 = vld [vmem:[#allocation2 + $0x40] sm:$0xff] }
 0x20a   : > { %v960_v10 = vpop.xlane.xlu1 %959 }
 0x20b   : > { %2353 = vst.msk [vmem:[#allocation2 + $0x30] sm:$0xff] %vm1705_vm1, %v4467_v25  ;;  %v4474_v56 = vmax.f32 %v4464_v6, %v960_v10  ;;  %1193 = vperm.xlu1 %3542, %v4467_v25  }
 0x20d   : > { %2354 = vst.msk [vmem:[#allocation2 + $0x38] sm:$0xff] %vm1705_vm1, %v4474_v56 }
 0x20f   : > { %1198 = vperm.xlu1 %3542, %v4474_v56  }
 0x210   : > { %v963_v16 = vpop.xlane.xlu0 %962 }
 0x211   : > { %v4487_v51 = vmax.f32 %v4481_v32, %v963_v16  ;;  %v4501_v16 = vld [vmem:[#allocation2 + $0x50] sm:$0xff] }
 0x212   : > { %v966_v10 = vpop.xlane.xlu1 %965  ;;  %5395 = vst [vmem:[#allocation46_spill] sm:$0xff] %v4501_v16 }
 0x213   : > { %2355 = vst.msk [vmem:[#allocation2 + $0x40] sm:$0xff] %vm1705_vm1, %v4487_v51  ;;  %v4494_v22 = vmax.f32 %v4484_v31, %v966_v10  ;;  %1203 = vperm.xlu0 %3541, %v4487_v51  }
 0x215   : > { %2356 = vst.msk [vmem:[#allocation2 + $0x48] sm:$0xff] %vm1705_vm1, %v4494_v22 }
 0x217   : > { %1208 = vperm.xlu0 %3541, %v4494_v22  }
 0x218   : > { %v969_v39 = vpop.xlane.xlu0 %968 }
 0x219   : > { %v4507_v33 = vmax.f32 %v4501_v16, %v969_v39  ;;  %v4521_v39 = vld [vmem:[#allocation2 + $0x60] sm:$0xff] }
 0x21a   : > { %v972_v10 = vpop.xlane.xlu1 %971  ;;  %5399 = vst [vmem:[#allocation50_spill] sm:$0xff] %v4521_v39 }
 0x21b   : > { %5397 = vst [vmem:[#allocation48_spill] sm:$0xff] %v4507_v33  ;;  %2357 = vst.msk [vmem:[#allocation2 + $0x50] sm:$0xff] %vm1705_vm1, %v4507_v33  ;;  %v4514_v21 = vmax.f32 %v4504_v23, %v972_v10  ;;  %1213 = vperm.xlu1 %3542, %v4507_v33  }
 0x21d   : > { %5398 = vst [vmem:[#allocation49_spill] sm:$0xff] %v4514_v21  ;;  %2358 = vst.msk [vmem:[#allocation2 + $0x58] sm:$0xff] %vm1705_vm1, %v4514_v21 }
 0x21f   : > { %1218 = vperm.xlu1 %3542, %v4514_v21  }
 0x220   : > { %v975_v20 = vpop.xlane.xlu0 %974 }
 0x221   : > { %v4527_v19 = vmax.f32 %v4521_v39, %v975_v20  ;;  %v4560_v39 = vld [vmem:[#allocation2 + $0x88] sm:$0xff] }
 0x222   : > { %v978_v10 = vpop.xlane.xlu1 %977  ;;  %5405 = vst [vmem:[#allocation56_spill] sm:$0xff] %v4560_v39 }
 0x223   : > { %2359 = vst.msk [vmem:[#allocation2 + $0x60] sm:$0xff] %vm1705_vm1, %v4527_v19  ;;  %v4534_v15 = vmax.f32 %v4524_v17, %v978_v10  ;;  %v4558_v17 = vld [vmem:[#allocation2 + $0x80] sm:$0xff] }
 0x224   : > { %5404 = vst [vmem:[#allocation55_spill] sm:$0xff] %v4558_v17 }
 0x225   : > { %2360 = vst.msk [vmem:[#allocation2 + $0x68] sm:$0xff] %vm1705_vm1, %v4534_v15 }
 0x228   : > { %v981_v20 = vpop.xlane.xlu0 %980 }
 0x229   : > { %v4545_v8 = vmax.f32 %v4540_v11, %v981_v20  ;;  %v4581_v11 = vld [vmem:[#allocation2 + $0x98] sm:$0xff] }
 0x22a   : > { %v984_v14 = vpop.xlane.xlu1 %983  ;;  %5409 = vst [vmem:[#allocation59_spill] sm:$0xff] %v4581_v11 }
 0x22b   : > { %5403 = vst [vmem:[#allocation54_spill] sm:$0xff] %v4545_v8  ;;  %2361 = vst.msk [vmem:[#allocation2 + $0x70] sm:$0xff] %vm1705_vm1, %v4545_v8  ;;  %v4552_v10 = vmax.f32 %v4542_v9, %v984_v14  ;;  %v4579_v9 = vld [vmem:[#allocation2 + $0x90] sm:$0xff] }
 0x22c   : > { %5408 = vst [vmem:[#allocation58_spill] sm:$0xff] %v4579_v9 }
 0x22d   : > { %2362 = vst.msk [vmem:[#allocation2 + $0x78] sm:$0xff] %vm1705_vm1, %v4552_v10 }
 0x230   : > { %v987_v20 = vpop.xlane.xlu0 %986 }
 0x231   : > { %v4563_v21 = vmax.f32 %v4558_v17, %v987_v20  ;;  %v5407_v20 = vmax.f32 %v4378_v18, %v4382_v43  ;;  %v4597_v43 = vld [vmem:[#allocation2 + $0xa0] sm:$0xff]  ;;  %v4599_v18 = vld [vmem:[#allocation2 + $0xa8] sm:$0xff] }
 0x232   : > { %v990_v7 = vpop.xlane.xlu1 %989  ;;  %5410 = vst [vmem:[#allocation60_spill] sm:$0xff] %v4597_v43  ;;  %5411 = vst [vmem:[#allocation61_spill] sm:$0xff] %v4599_v18 }
 0x233   : > { %5406 = vst [vmem:[#allocation57_spill] sm:$0xff] %v4563_v21  ;;  %2363 = vst.msk [vmem:[#allocation2 + $0x80] sm:$0xff] %vm1705_vm1, %v4563_v21  ;;  %v4570_v14 = vmax.f32 %v4560_v39, %v990_v7 }
 0x235   : > { %2364 = vst.msk [vmem:[#allocation2 + $0x88] sm:$0xff] %vm1705_vm1, %v4570_v14 }
 0x236   : > { %1031 = vmax.xlane.f32.xlu0 %v5407_v20 }
 0x238   : > { %v993_v23 = vpop.xlane.xlu0 %992 }
 0x239   : > { %v4584_v17 = vmax.f32 %v4579_v9, %v993_v23  ;;  %v5412_v9 = vmax.f32 %v4374_v24, %v4376_v30  ;;  %v4620_v30 = vld [vmem:[#allocation2 + $0xb8] sm:$0xff]  ;;  %v4640_v24 = vld [vmem:[#allocation2 + $0xc8] sm:$0xff] }
 0x23a   : > { %v996_v7 = vpop.xlane.xlu1 %995  ;;  %5415 = vst [vmem:[#allocation64_spill] sm:$0xff] %v4620_v30  ;;  %5419 = vst [vmem:[#allocation68_spill] sm:$0xff] %v4640_v24 }
 0x23b   : > { %2365 = vst.msk [vmem:[#allocation2 + $0x90] sm:$0xff] %vm1705_vm1, %v4584_v17  ;;  %v4591_v13 = vmax.f32 %v4581_v11, %v996_v7 }
 0x23d   : > { %2366 = vst.msk [vmem:[#allocation2 + $0x98] sm:$0xff] %vm1705_vm1, %v4591_v13 }
 0x240   : > { %v999_v23 = vpop.xlane.xlu1 %998 }
 0x241   : > { %v4602_v39 = vmax.f32 %v4597_v43, %v999_v23  ;;  %v4618_v23 = vld [vmem:[#allocation2 + $0xb0] sm:$0xff] }
 0x242   : > { %v1002_v33 = vpop.xlane.xlu0 %1001  ;;  %5414 = vst [vmem:[#allocation63_spill] sm:$0xff] %v4618_v23 }
 0x243   : > { %1028 = vmax.xlane.f32.xlu1 %v5412_v9  ;;  %2367 = vst.msk [vmem:[#allocation2 + $0xa0] sm:$0xff] %vm1705_vm1, %v4602_v39  ;;  %v4612_v20 = vmax.f32 %v4599_v18, %v1002_v33 }
 0x245   : > { %5413 = vst [vmem:[#allocation62_spill] sm:$0xff] %v4612_v20  ;;  %2368 = vst.msk [vmem:[#allocation2 + $0xa8] sm:$0xff] %vm1705_vm1, %v4612_v20 }
 0x248   : > { %v1005_v16 = vpop.xlane.xlu1 %1004 }
 0x249   : > { %v4623_v9 = vmax.f32 %v4618_v23, %v1005_v16  ;;  %v4637_v16 = vld [vmem:[#allocation2 + $0xc0] sm:$0xff] }
 0x24a   : > { %v1008_v7 = vpop.xlane.xlu0 %1007  ;;  %5418 = vst [vmem:[#allocation67_spill] sm:$0xff] %v4637_v16 }
 0x24b   : > { %5416 = vst [vmem:[#allocation65_spill] sm:$0xff] %v4623_v9  ;;  %2369 = vst.msk [vmem:[#allocation2 + $0xb0] sm:$0xff] %vm1705_vm1, %v4623_v9  ;;  %v4630_v33 = vmax.f32 %v4620_v30, %v1008_v7 }
 0x24c   : > { %1223 = vperm.xlu0 %3541, %v4527_v19  }
 0x24d   : > { %5417 = vst [vmem:[#allocation66_spill] sm:$0xff] %v4630_v33  ;;  %2370 = vst.msk [vmem:[#allocation2 + $0xb8] sm:$0xff] %vm1705_vm1, %v4630_v33 }
 0x250   : > { %1228 = vperm.xlu0 %3541, %v4534_v15   ;;  %v1011_v18 = vpop.xlane.xlu0 %1010 }
 0x251   : > { %v4643_v23 = vmax.f32 %v4637_v16, %v1011_v18  ;;  %v4658_v18 = vld [vmem:[#allocation2 + $0xd0] sm:$0xff]  ;;  %v4662_v16 = vld [vmem:[#allocation2 + $0xd8] sm:$0xff] }
 0x252   : > { %v1014_v7 = vpop.xlane.xlu1 %1013  ;;  %5422 = vst [vmem:[#allocation71_spill] sm:$0xff] %v4658_v18  ;;  %5423 = vst [vmem:[#allocation72_spill] sm:$0xff] %v4662_v16 }
 0x253   : > { %5420 = vst [vmem:[#allocation69_spill] sm:$0xff] %v4643_v23  ;;  %2371 = vst.msk [vmem:[#allocation2 + $0xc0] sm:$0xff] %vm1705_vm1, %v4643_v23  ;;  %v4650_v11 = vmax.f32 %v4640_v24, %v1014_v7 }
 0x254   : > { %1243 = vperm.xlu1 %3542, %v4563_v21   ;;  %1233 = vperm.xlu0 %3541, %v4545_v8   ;;  %v4684_v8 = vld [vmem:[#allocation2 + $0xe8] sm:$0xff] }
 0x255   : > { %5421 = vst [vmem:[#allocation70_spill] sm:$0xff] %v4650_v11  ;;  %2372 = vst.msk [vmem:[#allocation2 + $0xc8] sm:$0xff] %vm1705_vm1, %v4650_v11 }
 0x256   : > { %5426 = vst [vmem:[#allocation75_spill] sm:$0xff] %v4684_v8 }
 0x258   : > { %1268 = vperm.xlu1 %3542, %v4612_v20   ;;  %1238 = vperm.xlu0 %3541, %v4552_v10   ;;  %v1017_v43 = vpop.xlane.xlu1 %1016 }
 0x259   : > { %v4665_v7 = vmax.f32 %v4658_v18, %v1017_v43  ;;  %v4680_v43 = vld [vmem:[#allocation2 + $0xe0] sm:$0xff] }
 0x25a   : > { %v1020_v21 = vpop.xlane.xlu0 %1019  ;;  %5425 = vst [vmem:[#allocation74_spill] sm:$0xff] %v4680_v43 }
 0x25b   : > { %2373 = vst.msk [vmem:[#allocation2 + $0xd0] sm:$0xff] %vm1705_vm1, %v4665_v7  ;;  %v4672_v30 = vmax.f32 %v4662_v16, %v1020_v21 }
 0x25c   : > { %1278 = vperm.xlu1 %3542, %v4630_v33   ;;  %1248 = vperm.xlu0 %3541, %v4570_v14  }
 0x25d   : > { %5424 = vst [vmem:[#allocation73_spill] sm:$0xff] %v4672_v30  ;;  %2374 = vst.msk [vmem:[#allocation2 + $0xd8] sm:$0xff] %vm1705_vm1, %v4672_v30 }
 0x260   : > { %1288 = vperm.xlu1 %3542, %v4650_v11   ;;  %1253 = vperm.xlu0 %3541, %v4584_v17   ;;  %v1023_v21 = vpop.xlane.xlu0 %1022 }
 0x261   : > { %v4687_v18 = vmax.f32 %v4680_v43, %v1023_v21 }
 0x262   : > { %v1026_v33 = vpop.xlane.xlu1 %1025 }
 0x263   : > { %v4690_v20 = vmax.f32 %v4684_v8, %v1026_v33  ;;  %2375 = vst.msk [vmem:[#allocation2 + $0xe0] sm:$0xff] %vm1705_vm1, %v4687_v18 }
 0x264   : > { %1298 = vperm.xlu1 %3542, %v4672_v30   ;;  %1258 = vperm.xlu0 %3541, %v4591_v13  }
 0x265   : > { %5427 = vst [vmem:[#allocation76_spill] sm:$0xff] %v4690_v20  ;;  %2376 = vst.msk [vmem:[#allocation2 + $0xe8] sm:$0xff] %vm1705_vm1, %v4690_v20 }
 0x268   : > { %1308 = vperm.xlu1 %3542, %v4690_v20   ;;  %1263 = vperm.xlu0 %3541, %v4602_v39  }
 0x26c   : > { %1273 = vperm.xlu0 %3541, %v4623_v9  }
 0x270   : > { %1283 = vperm.xlu0 %3541, %v4643_v23  }
 0x272   : > { %v1164_v33 = vpop.permute.xlu0 %1163 }
 0x273   : > { %v1321_v21 = vsub.f32 %v4194_v34, %v1164_v33  ;;  %v1322_v24 = vsub.f32 %v4196_v35, %v1164_v33 }
 0x274   : > { %1293 = vperm.xlu0 %3541, %v4665_v7  }
 0x275   : > { %v1385_v43 = vmul.f32 1.442695, %v1321_v21  ;;  %v1387_v16 = vmul.f32 1.442695, %v1322_v24 }
 0x276   : > { %v1169_v8 = vpop.permute.xlu1 %1168 }
 0x277   : > { %3591 = vpow2.f32 %v1385_v43  ;;  %v1323_v30 = vsub.f32 %v4198_v36, %v1169_v8  ;;  %v1324_v20 = vsub.f32 %v4202_v38, %v1169_v8 }
 0x278   : > { %3593 = vpow2.f32 %v1387_v16  ;;  %1303 = vperm.xlu0 %3541, %v4687_v18  }
 0x279   : > { %v1389_v11 = vmul.f32 1.442695, %v1323_v30  ;;  %v1391_v23 = vmul.f32 1.442695, %v1324_v20 }
 0x27a   : > { %v1174_v9 = vpop.permute.xlu1 %1173 }
 0x27b   : > { %3595 = vpow2.f32 %v1389_v11  ;;  %v1325_v34 = vsub.f32 %v4206_v40, %v1174_v9  ;;  %v1326_v35 = vsub.f32 %v4208_v41, %v1174_v9 }
 0x27c   : > { %3597 = vpow2.f32 %v1391_v23 }
 0x27d   : > { %v1393_v33 = vmul.f32 1.442695, %v1325_v34  ;;  %v1395_v24 = vmul.f32 1.442695, %v1326_v35 }
 0x27e   : > { %v1179_v21 = vpop.permute.xlu1 %1178 }
 0x27f   : > { %3599 = vpow2.f32 %v1393_v33  ;;  %v1327_v36 = vsub.f32 %v4210_v42, %v1179_v21  ;;  %v1328_v38 = vsub.f32 %v4214_v44, %v1179_v21 }
 0x280   : > { %3601 = vpow2.f32 %v1395_v24 }
 0x281   : > { %v3592_v8 = vpop.eup %3591  ;;  %v1397_v16 = vmul.f32 1.442695, %v1327_v36  ;;  %v1399_v30 = vmul.f32 1.442695, %v1328_v38 }
 0x282   : > { %v3594_v20 = vpop.eup %3593  ;;  %v1184_v43 = vpop.permute.xlu0 %1183 }
 0x283   : > { %3603 = vpow2.f32 %v1397_v16  ;;  %v1329_v40 = vsub.f32 %v4218_v46, %v1184_v43  ;;  %v1330_v41 = vsub.f32 %v4220_v47, %v1184_v43  ;;  %v4718_v11 = vadd.f32 %v3594_v20, %v3592_v8 }
 0x284   : > { %3605 = vpow2.f32 %v1399_v30 }
 0x285   : > { %v3596_v23 = vpop.eup %3595  ;;  %v1401_v9 = vmul.f32 1.442695, %v1329_v40  ;;  %v1403_v34 = vmul.f32 1.442695, %v1330_v41 }
 0x286   : > { %v3598_v42 = vpop.eup %3597  ;;  %v1189_v35 = vpop.permute.xlu0 %1188  ;;  %v1962_v44 = vpack.c.bf16 %v3596_v23, %v3592_v8 }
 0x287   : > { %3607 = vpow2.f32 %v1401_v9  ;;  %v1331_v33 = vsub.f32 %v4222_v48, %v1189_v35  ;;  %v1332_v24 = vsub.f32 %v4226_v50, %v1189_v35  ;;  %v1963_v21 = vpack.c.bf16 %v3598_v42, %v3594_v20 }
 0x288   : > { %3609 = vpow2.f32 %v1403_v34  ;;  %v4722_v36 = vadd.f32 %v3598_v42, %v3596_v23 }
 0x289   : > { %v3600_v46 = vpop.eup %3599  ;;  %v1405_v47 = vmul.f32 1.442695, %v1331_v33  ;;  %v1407_v38 = vmul.f32 1.442695, %v1332_v24  ;;  %2154 = vmatprep.mubr.bf16.mxu1 %v1963_v21 }
 0x28a   : > { %v3602_v16 = vpop.eup %3601  ;;  %2155 = vmatmul.mubr.bf16.vlgmr.msra.gmra.mrb[0].mxu1 %v1962_v44  ;;  %v1194_v30 = vpop.permute.xlu1 %1193 }
 0x28b   : > { %3611 = vpow2.f32 %v1405_v47  ;;  %v1333_v43 = vsub.f32 %v4230_v53, %v1194_v30  ;;  %v1334_v8 = vsub.f32 %v4232_v54, %v1194_v30  ;;  %v4726_v40 = vadd.f32 %v3602_v16, %v3600_v46 }
 0x28c   : > { %3613 = vpow2.f32 %v1407_v38 }
 0x28d   : > { %v3604_v48 = vpop.eup %3603  ;;  %v1409_v50 = vmul.f32 1.442695, %v1333_v43  ;;  %v1411_v20 = vmul.f32 1.442695, %v1334_v8 }
 0x28e   : > { %v3606_v41 = vpop.eup %3605  ;;  %v1199_v23 = vpop.permute.xlu1 %1198  ;;  %v1964_v9 = vpack.c.bf16 %v3604_v48, %v3600_v46 }
 0x28f   : > { %3615 = vpow2.f32 %v1409_v50  ;;  %v1335_v34 = vsub.f32 %v4234_v55, %v1199_v23  ;;  %v1336_v42 = vsub.f32 %v4238_v57, %v1199_v23  ;;  %v1965_v35 = vpack.c.bf16 %v3606_v41, %v3602_v16 }
 0x290   : > { %3617 = vpow2.f32 %v1411_v20  ;;  %v4730_v44 = vadd.f32 %v3606_v41, %v3604_v48 }
 0x291   : > { %v3608_v53 = vpop.eup %3607  ;;  %v1413_v54 = vmul.f32 1.442695, %v1335_v34  ;;  %v1415_v33 = vmul.f32 1.442695, %v1336_v42  ;;  %2162 = vmatprep.mubr.bf16.mxu1 %v1965_v35 }
 0x292   : > { %v3610_v24 = vpop.eup %3609  ;;  %2163 = vmatmul.mubr.bf16.gmra.mrb[4].mxu1 %v1964_v9  ;;  %v1204_v21 = vpop.permute.xlu0 %1203 }
 0x293   : > { %3619 = vpow2.f32 %v1413_v54  ;;  %v1337_v47 = vsub.f32 %v4242_v59, %v1204_v21  ;;  %v1338_v46 = vsub.f32 %v4244_v60, %v1204_v21  ;;  %v4734_v38 = vadd.f32 %v3610_v24, %v3608_v53 }
 0x294   : > { %3621 = vpow2.f32 %v1415_v33 }
 0x295   : > { %v3612_v55 = vpop.eup %3611  ;;  %v1417_v57 = vmul.f32 1.442695, %v1337_v47  ;;  %v1419_v16 = vmul.f32 1.442695, %v1338_v46 }
 0x296   : > { %v3614_v30 = vpop.eup %3613  ;;  %v1209_v43 = vpop.permute.xlu0 %1208  ;;  %v1966_v8 = vpack.c.bf16 %v3612_v55, %v3608_v53 }
 0x297   : > { %3623 = vpow2.f32 %v1417_v57  ;;  %v1339_v48 = vsub.f32 %v4246_v61, %v1209_v43  ;;  %v1340_v50 = vsub.f32 %v4250_v63, %v1209_v43  ;;  %v1967_v20 = vpack.c.bf16 %v3614_v30, %v3610_v24 }
 0x298   : > { %3625 = vpow2.f32 %v1419_v16  ;;  %v4738_v41 = vadd.f32 %v3614_v30, %v3612_v55 }
 0x299   : > { %v3616_v59 = vpop.eup %3615  ;;  %v1421_v60 = vmul.f32 1.442695, %v1339_v48  ;;  %v1423_v23 = vmul.f32 1.442695, %v1340_v50  ;;  %2170 = vmatprep.mubr.bf16.mxu1 %v1967_v20 }
 0x29a   : > { %v3618_v9 = vpop.eup %3617  ;;  %2171 = vmatmul.mubr.bf16.gmra.mrb[8].mxu1 %v1966_v8  ;;  %v1214_v34 = vpop.permute.xlu1 %1213 }
 0x29b   : > { %3627 = vpow2.f32 %v1421_v60  ;;  %v1341_v42 = vsub.f32 %v4254_v1, %v1214_v34  ;;  %v1342_v35 = vsub.f32 %v4256_v2, %v1214_v34  ;;  %v4742_v53 = vadd.f32 %v3618_v9, %v3616_v59 }
 0x29c   : > { %3629 = vpow2.f32 %v1423_v23 }
 0x29d   : > { %v3620_v61 = vpop.eup %3619  ;;  %v1425_v63 = vmul.f32 1.442695, %v1341_v42  ;;  %v1427_v54 = vmul.f32 1.442695, %v1342_v35 }
 0x29e   : > { %v3622_v33 = vpop.eup %3621  ;;  %v1219_v24 = vpop.permute.xlu1 %1218  ;;  %v1968_v21 = vpack.c.bf16 %v3620_v61, %v3616_v59 }
 0x29f   : > { %3631 = vpow2.f32 %v1425_v63  ;;  %v1343_v47 = vsub.f32 %v4258_v3, %v1219_v24  ;;  %v1344_v46 = vsub.f32 %v4262_v5, %v1219_v24  ;;  %v1969_v55 = vpack.c.bf16 %v3622_v33, %v3618_v9 }
 0x2a0   : > { %3633 = vpow2.f32 %v1427_v54  ;;  %v4746_v57 = vadd.f32 %v3622_v33, %v3620_v61  ;;  %v5428_v61 = vsub.f32 %v4390_v49, %v4395_v52  ;;  %v5429_v54 = vsub.f32 %v4397_v37, %v4406_v12 }
 0x2a1   : > { %v3624_v1 = vpop.eup %3623  ;;  %v1429_v2 = vmul.f32 1.442695, %v1343_v47  ;;  %v1431_v16 = vmul.f32 1.442695, %v1344_v46  ;;  %2178 = vmatprep.mubr.bf16.mxu1 %v1969_v55  ;;  %v5430_v24 = vsub.f32 %v4409_v45, %v4418_v0  ;;  %v5431_v47 = vsub.f32 %v4421_v28, %v4430_v62 }
 0x2a2   : > { %v3626_v30 = vpop.eup %3625  ;;  %2179 = vmatmul.mubr.bf16.gmra.mrb[12].mxu1 %v1968_v21  ;;  %v1097_v63 = vmul.f32 1.442695, %v5428_v61  ;;  %v1099_v33 = vmul.f32 1.442695, %v5429_v54  ;;  %v5432_v55 = vsub.f32 %v4433_v29, %v4444_v27  ;;  %v5433_v49 = vsub.f32 %v4440_v58, %v4452_v4  ;;  %v4786_v58 = vld [vmem:[#allocation2 + $0xf8] sm:$0xff] }
 0x2a3   : > { %3635 = vpow2.f32 %v1429_v2  ;;  %v4748_v43 = vadd.f32 %v3626_v30, %v3624_v1  ;;  %v1101_v21 = vmul.f32 1.442695, %v5430_v24  ;;  %v1103_v46 = vmul.f32 1.442695, %v5431_v47  ;;  %v5455_v24 = vld [vmem:[#allocation57_spill] sm:$0xff] }
 0x2a4   : > { %3637 = vpow2.f32 %v1431_v16  ;;  %v1107_v52 = vmul.f32 1.442695, %v5433_v49  ;;  %v5434_v37 = vsub.f32 %v4461_v26, %v4467_v25  ;;  %v5435_v28 = vsub.f32 %v4464_v6, %v4474_v56  ;;  %v5438_v25 = vld [vmem:[#allocation46_spill] sm:$0xff]  ;;  %v5439_v26 = vld [vmem:[#allocation48_spill] sm:$0xff]  ;;  %v5441_v56 = vld [vmem:[#allocation47_spill] sm:$0xff] }
 0x2a5   : > { %v3628_v8 = vpop.eup %3627  ;;  %3639 = vpow2.f32 %v1097_v63  ;;  %v5436_v27 = vsub.f32 %v4481_v32, %v4487_v51  ;;  %v5437_v4 = vsub.f32 %v4484_v31, %v4494_v22  ;;  %v5440_v62 = vsub.f32 %v5438_v25, %v5439_v26  ;;  %v5442_v6 = vld [vmem:[#allocation49_spill] sm:$0xff]  ;;  %v5444_v51 = vld [vmem:[#allocation50_spill] sm:$0xff]  ;;  %v5446_v22 = vld [vmem:[#allocation51_spill] sm:$0xff] }
 0x2a6   : > { %v3630_v48 = vpop.eup %3629  ;;  %v1970_v50 = vpack.c.bf16 %v3628_v8, %v3624_v1  ;;  %v1105_v1 = vmul.f32 1.442695, %v5432_v55  ;;  %3641 = vpow2.f32 %v1099_v33  ;;  %v1109_v12 = vmul.f32 1.442695, %v5434_v37  ;;  %v5454_v33 = vld [vmem:[#allocation55_spill] sm:$0xff]  ;;  %v5458_v55 = vld [vmem:[#allocation56_spill] sm:$0xff] }
 0x2a7   : > { %v1971_v3 = vpack.c.bf16 %v3630_v48, %v3626_v30  ;;  %v4750_v20 = vadd.f32 %v3630_v48, %v3628_v8  ;;  %3643 = vpow2.f32 %v1101_v21  ;;  %v1111_v45 = vmul.f32 1.442695, %v5435_v28  ;;  %v5461_v37 = vld [vmem:[#allocation58_spill] sm:$0xff]  ;;  %v5468_v26 = vld [vmem:[#allocation7_spill] sm:$0xff] }
 0x2a8   : > { %3645 = vpow2.f32 %v1103_v46  ;;  %v1113_v29 = vmul.f32 1.442695, %v5436_v27  ;;  %v1115_v0 = vmul.f32 1.442695, %v5437_v4  ;;  %v1117_v2 = vmul.f32 1.442695, %v5440_v62 }
 0x2a9   : > { %v3632_v5 = vpop.eup %3631  ;;  %2186 = vmatprep.mubr.bf16.mxu1 %v1971_v3  ;;  %3647 = vpow2.f32 %v1105_v1  ;;  %v5443_v16 = vsub.f32 %v5441_v56, %v5442_v6  ;;  %v5445_v32 = vsub.f32 %v5444_v51, %v4527_v19  ;;  %v5456_v21 = vsub.f32 %v5454_v33, %v5455_v24  ;;  %v5482_v24 = vld [vmem:[#allocation63_spill] sm:$0xff] }
 0x2aa   : > { %v3634_v59 = vpop.eup %3633  ;;  %2187 = vmatmul.mubr.bf16.gmra.mrb[16].mxu1 %v1970_v50  ;;  %3649 = vpow2.f32 %v1107_v52  ;;  %v5447_v50 = vsub.f32 %v5446_v22, %v4534_v15  ;;  %v5451_v15 = vld [vmem:[#allocation53_spill] sm:$0xff]  ;;  %v5459_v1 = vsub.f32 %v5458_v55, %v4570_v14  ;;  %v5467_v14 = vld [vmem:[#allocation6_spill] sm:$0xff] }
 0x2ab   : > { %v4752_v60 = vadd.f32 %v3634_v59, %v3632_v5  ;;  %3651 = vpow2.f32 %v1109_v12  ;;  %v1119_v30 = vmul.f32 1.442695, %v5443_v16  ;;  %v1121_v48 = vmul.f32 1.442695, %v5445_v32  ;;  %v5474_v32 = vld [vmem:[#allocation61_spill] sm:$0xff] }
 0x2ac   : > { %3653 = vpow2.f32 %v1111_v45  ;;  %v1123_v3 = vmul.f32 1.442695, %v5447_v50  ;;  %v5452_v61 = vsub.f32 %v5451_v15, %v4552_v10  ;;  %v1129_v47 = vmul.f32 1.442695, %v5456_v21  ;;  %v5464_v45 = vld [vmem:[#allocation59_spill] sm:$0xff]  ;;  %v5483_v21 = vld [vmem:[#allocation65_spill] sm:$0xff] }
 0x2ad   : > { %v3636_v23 = vpop.eup %3635  ;;  %3655 = vpow2.f32 %v1113_v29  ;;  %v1131_v49 = vmul.f32 1.442695, %v5459_v1  ;;  %v5462_v10 = vsub.f32 %v5461_v37, %v4584_v17  ;;  %v5465_v27 = vsub.f32 %v5464_v45, %v4591_v13  ;;  %v5470_v17 = vld [vmem:[#allocation60_spill] sm:$0xff] }
 0x2ae   : > { %v3638_v9 = vpop.eup %3637  ;;  %v1972_v34 = vpack.c.bf16 %v3636_v23, %v3632_v5  ;;  %3657 = vpow2.f32 %v1115_v0  ;;  %v1127_v63 = vmul.f32 1.442695, %v5452_v61  ;;  %v5471_v56 = vsub.f32 %v5470_v17, %v4602_v39  ;;  %v5478_v39 = vld [vmem:[#allocation8_spill] sm:$0xff] }
 0x2af   : > { %v1973_v42 = vpack.c.bf16 %v3638_v9, %v3634_v59  ;;  %v4754_v35 = vadd.f32 %v3638_v9, %v3636_v23  ;;  %v4803_v5 = vpop.eup %3639  ;;  %3659 = vpow2.f32 %v1117_v2  ;;  %v5448_v59 = vld [vmem:[#allocation52_spill] sm:$0xff]  ;;  %v5449_v23 = vld [vmem:[#allocation54_spill] sm:$0xff]  ;;  %v1133_v12 = vmul.f32 1.442695, %v5462_v10 }
 0x2b0   : > { %v5450_v9 = vsub.f32 %v5448_v59, %v5449_v23  ;;  %v4813_v19 = vpop.eup %3641  ;;  %3661 = vpow2.f32 %v1119_v30  ;;  %v1135_v29 = vmul.f32 1.442695, %v5465_v27  ;;  %v1137_v6 = vmul.f32 1.442695, %v5471_v56  ;;  %v5486_v10 = vld [vmem:[#allocation64_spill] sm:$0xff] }
 0x2b1   : > { %2194 = vmatprep.mubr.bf16.mxu1 %v1973_v42  ;;  %v4818_v54 = vpop.eup %3643  ;;  %3663 = vpow2.f32 %v1121_v48  ;;  %v5475_v48 = vld [vmem:[#allocation62_spill] sm:$0xff] }
 0x2b2   : > { %2195 = vmatmul.mubr.bf16.gmra.mrb[20].mxu1 %v1972_v34  ;;  %v1125_v34 = vmul.f32 1.442695, %v5450_v9  ;;  %5453 = vst [vmem:[#allocation46_spill] sm:$0xff] %v4818_v54  ;;  %v4823_v46 = vpop.eup %3645  ;;  %3665 = vpow2.f32 %v1123_v3  ;;  %v5476_v22 = vsub.f32 %v5474_v32, %v5475_v48  ;;  %v5479_v9 = vld [vmem:[#allocation9_spill] sm:$0xff]  ;;  %v5494_v32 = vld [vmem:[#allocation15_spill] sm:$0xff] }
 0x2b3   : > { %5457 = vst [vmem:[#allocation48_spill] sm:$0xff] %v4823_v46  ;;  %v4828_v52 = vpop.eup %3647 }
 0x2b4   : > { %5460 = vst [vmem:[#allocation47_spill] sm:$0xff] %v4828_v52  ;;  %3667 = vpow2.f32 %v1125_v34  ;;  %v4834_v28 = vpop.eup %3649  ;;  %v1139_v50 = vmul.f32 1.442695, %v5476_v22 }
 0x2b5   : > { %5463 = vst [vmem:[#allocation49_spill] sm:$0xff] %v4834_v28  ;;  %3669 = vpow2.f32 %v1127_v63  ;;  %v4839_v0 = vpop.eup %3651 }
 0x2b6   : > { %5466 = vst [vmem:[#allocation50_spill] sm:$0xff] %v4839_v0  ;;  %3671 = vpow2.f32 %v1129_v47  ;;  %v4843_v2 = vpop.eup %3653  ;;  %v5484_v47 = vsub.f32 %v5482_v24, %v5483_v21  ;;  %v5497_v24 = vld [vmem:[#allocation12_spill] sm:$0xff] }
 0x2b7   : > { %5469 = vst [vmem:[#allocation51_spill] sm:$0xff] %v4843_v2  ;;  %3673 = vpow2.f32 %v1131_v49  ;;  %v4848_v16 = vpop.eup %3655 }
 0x2b8   : > { %5472 = vst [vmem:[#allocation52_spill] sm:$0xff] %v4848_v16  ;;  %3675 = vpow2.f32 %v1133_v12  ;;  %v4853_v51 = vpop.eup %3657  ;;  %v1141_v55 = vmul.f32 1.442695, %v5484_v47  ;;  %v5487_v12 = vld [vmem:[#allocation66_spill] sm:$0xff]  ;;  %v5498_v47 = vld [vmem:[#allocation13_spill] sm:$0xff] }
 0x2b9   : > { %5473 = vst [vmem:[#allocation54_spill] sm:$0xff] %v4853_v51  ;;  %3677 = vpow2.f32 %v1135_v29  ;;  %v4858_v59 = vpop.eup %3659  ;;  %v5488_v45 = vsub.f32 %v5486_v10, %v5487_v12  ;;  %v5500_v10 = vld [vmem:[#allocation24_spill] sm:$0xff] }
 0x2ba   : > { %5477 = vst [vmem:[#allocation53_spill] sm:$0xff] %v4858_v59  ;;  %v4862_v61 = vpop.eup %3661  ;;  %v5509_v29 = vld [vmem:[#allocation32_spill] sm:$0xff] }
 0x2bb   : > { %5480 = vst [vmem:[#allocation55_spill] sm:$0xff] %v4862_v61  ;;  %v4867_v33 = vpop.eup %3663  ;;  %v1143_v27 = vmul.f32 1.442695, %v5488_v45  ;;  %v5501_v45 = vld [vmem:[#allocation25_spill] sm:$0xff] }
 0x2bc   : > { %5481 = vst [vmem:[#allocation57_spill] sm:$0xff] %v4867_v33  ;;  %v4873_v37 = vpop.eup %3665 }
 0x2bd   : > { %5485 = vst [vmem:[#allocation56_spill] sm:$0xff] %v4873_v37 }
 0x2c3   : > { %v1032_v8 = vpop.xlane.xlu0 %1031 }
 0x2c4   : > { %v4798_v31 = vmax.f32 %v4786_v58, %v1032_v8  ;;  %v4851_v8 = vld [vmem:[#allocation2 + $0xf0] sm:$0xff] }
 0x2c6   : > { %2378 = vst.msk [vmem:[#allocation2 + $0xf8] sm:$0xff] %vm1705_vm1, %v4798_v31  ;;  %1318 = vperm.xlu1 %3542, %v4798_v31  }
 0x2ca   : > { %1772 = vperm.xlu1 %3542, %v4803_v5  }
 0x2cb   : > { %v1224_v4 = vpop.permute.xlu0 %1223 }
 0x2cc   : > { %v1345_v25 = vsub.f32 %v5467_v14, %v1224_v4  ;;  %v1346_v62 = vsub.f32 %v5468_v26, %v1224_v4  ;;  %v4883_v14 = vpop.eup %3667 }
 0x2cd   : > { %5489 = vst [vmem:[#allocation58_spill] sm:$0xff] %v4883_v14 }
 0x2ce   : > { %v1433_v13 = vmul.f32 1.442695, %v1345_v25  ;;  %v1435_v30 = vmul.f32 1.442695, %v1346_v62  ;;  %1782 = vperm.xlu1 %3542, %v4818_v54   ;;  %v5490_v25 = vld [vmem:[#allocation10_spill] sm:$0xff]  ;;  %v5491_v62 = vld [vmem:[#allocation11_spill] sm:$0xff] }
 0x2cf   : > { %v1229_v3 = vpop.permute.xlu0 %1228 }
 0x2d0   : > { %3679 = vpow2.f32 %v1433_v13  ;;  %v1347_v23 = vsub.f32 %v5478_v39, %v1229_v3  ;;  %v1348_v34 = vsub.f32 %v5479_v9, %v1229_v3  ;;  %v1029_v15 = vpop.xlane.xlu1 %1028  ;;  %v5493_v13 = vld [vmem:[#allocation14_spill] sm:$0xff] }
 0x2d1   : > { %3681 = vpow2.f32 %v1435_v30  ;;  %v4865_v63 = vmax.f32 %v4851_v8, %v1029_v15 }
 0x2d2   : > { %3683 = vpow2.f32 %v1137_v6  ;;  %v1437_v1 = vmul.f32 1.442695, %v1347_v23  ;;  %v1439_v49 = vmul.f32 1.442695, %v1348_v34  ;;  %1787 = vperm.xlu1 %3542, %v4823_v46   ;;  %v4887_v6 = vpop.eup %3669 }
 0x2d3   : > { %3685 = vpow2.f32 %v1139_v50  ;;  %2377 = vst.msk [vmem:[#allocation2 + $0xf0] sm:$0xff] %vm1705_vm1, %v4865_v63  ;;  %1313 = vperm.xlu0 %3541, %v4865_v63   ;;  %v1234_v4 = vpop.permute.xlu0 %1233  ;;  %5492 = vst [vmem:[#allocation59_spill] sm:$0xff] %v4887_v6  ;;  %v4891_v22 = vpop.eup %3671 }
 0x2d4   : > { %3687 = vpow2.f32 %v1437_v1  ;;  %v1349_v26 = vsub.f32 %v5490_v25, %v1234_v4  ;;  %v1350_v17 = vsub.f32 %v5491_v62, %v1234_v4  ;;  %v1244_v56 = vpop.permute.xlu1 %1243  ;;  %5495 = vst [vmem:[#allocation6_spill] sm:$0xff] %v4891_v22  ;;  %v4894_v39 = vpop.eup %3673 }
 0x2d5   : > { %3689 = vpow2.f32 %v1439_v49  ;;  %v1353_v30 = vsub.f32 %v5493_v13, %v1244_v56  ;;  %v1354_v48 = vsub.f32 %v5494_v32, %v1244_v56  ;;  %5496 = vst [vmem:[#allocation7_spill] sm:$0xff] %v4894_v39  ;;  %v4897_v15 = vpop.eup %3675  ;;  %v5502_v32 = vld [vmem:[#allocation16_spill] sm:$0xff] }
 0x2d6   : > { %3691 = vpow2.f32 %v1141_v55  ;;  %v1441_v50 = vmul.f32 1.442695, %v1349_v26  ;;  %v1443_v3 = vmul.f32 1.442695, %v1350_v17  ;;  %1797 = vperm.xlu1 %3542, %v4834_v28   ;;  %v4901_v49 = vpop.eup %3677 }
 0x2d7   : > { %3693 = vpow2.f32 %v1143_v27  ;;  %v1449_v23 = vmul.f32 1.442695, %v1353_v30  ;;  %v1451_v9 = vmul.f32 1.442695, %v1354_v48  ;;  %1777 = vperm.xlu0 %3541, %v4813_v19   ;;  %v1239_v34 = vpop.permute.xlu0 %1238  ;;  %5499 = vst [vmem:[#allocation60_spill] sm:$0xff] %v4901_v49 }
 0x2d8   : > { %3695 = vpow2.f32 %v1441_v50  ;;  %v1351_v21 = vsub.f32 %v5497_v24, %v1239_v34  ;;  %v1352_v1 = vsub.f32 %v5498_v47, %v1239_v34  ;;  %v1269_v55 = vpop.permute.xlu1 %1268  ;;  %v5503_v50 = vld [vmem:[#allocation17_spill] sm:$0xff] }
 0x2d9   : > { %3697 = vpow2.f32 %v1443_v3  ;;  %v1363_v12 = vsub.f32 %v5500_v10, %v1269_v55  ;;  %v1364_v27 = vsub.f32 %v5501_v45, %v1269_v55  ;;  %v5506_v47 = vld [vmem:[#allocation29_spill] sm:$0xff] }
 0x2da   : > { %v3680_v4 = vpop.eup %3679  ;;  %3699 = vpow2.f32 %v1449_v23  ;;  %v1445_v25 = vmul.f32 1.442695, %v1351_v21  ;;  %v1447_v26 = vmul.f32 1.442695, %v1352_v1  ;;  %1807 = vperm.xlu1 %3542, %v4843_v2   ;;  %v5505_v21 = vld [vmem:[#allocation28_spill] sm:$0xff] }
 0x2db   : > { %v3682_v62 = vpop.eup %3681  ;;  %3701 = vpow2.f32 %v1451_v9  ;;  %v1469_v17 = vmul.f32 1.442695, %v1363_v12  ;;  %v1471_v56 = vmul.f32 1.442695, %v1364_v27  ;;  %1792 = vperm.xlu0 %3541, %v4828_v52   ;;  %v1249_v13 = vpop.permute.xlu0 %1248 }
 0x2dc   : > { %v4907_v30 = vpop.eup %3683  ;;  %3703 = vpow2.f32 %v1445_v25  ;;  %v1355_v48 = vsub.f32 %v5502_v32, %v1249_v13  ;;  %v1356_v3 = vsub.f32 %v5503_v50, %v1249_v13  ;;  %v1279_v34 = vpop.permute.xlu1 %1278  ;;  %v4911_v23 = vadd.f32 %v3682_v62, %v3680_v4 }
 0x2dd   : > { %v4913_v24 = vpop.eup %3685  ;;  %3705 = vpow2.f32 %v1447_v26  ;;  %v1367_v9 = vsub.f32 %v5505_v21, %v1279_v34  ;;  %v1368_v1 = vsub.f32 %v5506_v47, %v1279_v34  ;;  %v5507_v26 = vld [vmem:[#allocation18_spill] sm:$0xff]  ;;  %v5508_v34 = vld [vmem:[#allocation19_spill] sm:$0xff] }
 0x2de   : > { %5504 = vst [vmem:[#allocation61_spill] sm:$0xff] %v4913_v24  ;;  %v3688_v55 = vpop.eup %3687  ;;  %3707 = vpow2.f32 %v1469_v17  ;;  %v1453_v10 = vmul.f32 1.442695, %v1355_v48  ;;  %v1455_v12 = vmul.f32 1.442695, %v1356_v3  ;;  %1817 = vperm.xlu1 %3542, %v4853_v51  }
 0x2df   : > { %v3690_v45 = vpop.eup %3689  ;;  %3709 = vpow2.f32 %v1471_v56  ;;  %v1477_v27 = vmul.f32 1.442695, %v1367_v9  ;;  %v1479_v25 = vmul.f32 1.442695, %v1368_v1  ;;  %1802 = vperm.xlu0 %3541, %v4839_v0   ;;  %v1254_v13 = vpop.permute.xlu0 %1253  ;;  %v1974_v32 = vpack.c.bf16 %v3688_v55, %v3680_v4  ;;  %v5510_v9 = vld [vmem:[#allocation33_spill] sm:$0xff] }
 0x2e0   : > { %v4919_v50 = vpop.eup %3691  ;;  %3711 = vpow2.f32 %v1453_v10  ;;  %v1357_v21 = vsub.f32 %v5507_v26, %v1254_v13  ;;  %v1358_v47 = vsub.f32 %v5508_v34, %v1254_v13  ;;  %v1289_v17 = vpop.permute.xlu1 %1288  ;;  %v1975_v48 = vpack.c.bf16 %v3690_v45, %v3682_v62  ;;  %v5512_v26 = vld [vmem:[#allocation21_spill] sm:$0xff] }
 0x2e1   : > { %v4923_v3 = vpop.eup %3693  ;;  %3713 = vpow2.f32 %v1455_v12  ;;  %v1371_v56 = vsub.f32 %v5509_v29, %v1289_v17  ;;  %v1372_v1 = vsub.f32 %v5510_v9, %v1289_v17  ;;  %v4927_v42 = vadd.f32 %v3690_v45, %v3688_v55  ;;  %v5511_v55 = vld [vmem:[#allocation20_spill] sm:$0xff] }
 0x2e2   : > { %v3696_v51 = vpop.eup %3695  ;;  %3715 = vpow2.f32 %v1477_v27  ;;  %v1457_v4 = vmul.f32 1.442695, %v1357_v21  ;;  %v1459_v2 = vmul.f32 1.442695, %v1358_v47  ;;  %2202 = vmatprep.mubr.bf16.mxu1 %v1975_v48  ;;  %1827 = vperm.xlu1 %3542, %v4862_v61   ;;  %v5513_v17 = vld [vmem:[#allocation36_spill] sm:$0xff]  ;;  %v5514_v48 = vld [vmem:[#allocation37_spill] sm:$0xff] }
 0x2e3   : > { %v3698_v10 = vpop.eup %3697  ;;  %3717 = vpow2.f32 %v1479_v25  ;;  %v1485_v13 = vmul.f32 1.442695, %v1371_v56  ;;  %v1487_v62 = vmul.f32 1.442695, %v1372_v1  ;;  %2203 = vmatmul.mubr.bf16.gmra.mrb[24].mxu1 %v1974_v32  ;;  %1812 = vperm.xlu0 %3541, %v4848_v16   ;;  %v1259_v12 = vpop.permute.xlu0 %1258  ;;  %v5517_v16 = vld [vmem:[#allocation40_spill] sm:$0xff] }
 0x2e4   : > { %v4931_v29 = vpop.eup %3699  ;;  %3719 = vpow2.f32 %v1457_v4  ;;  %v1359_v45 = vsub.f32 %v5511_v55, %v1259_v12  ;;  %v1360_v27 = vsub.f32 %v5512_v26, %v1259_v12  ;;  %v1299_v21 = vpop.permute.xlu1 %1298  ;;  %v4935_v34 = vadd.f32 %v3698_v10, %v3696_v51 }
 0x2e5   : > { %v3702_v47 = vpop.eup %3701  ;;  %3721 = vpow2.f32 %v1459_v2  ;;  %v1375_v25 = vsub.f32 %v5513_v17, %v1299_v21  ;;  %v1376_v56 = vsub.f32 %v5514_v48, %v1299_v21  ;;  %v5515_v21 = vld [vmem:[#allocation22_spill] sm:$0xff] }
 0x2e6   : > { %v3704_v32 = vpop.eup %3703  ;;  %3723 = vpow2.f32 %v1485_v13  ;;  %v1461_v9 = vmul.f32 1.442695, %v1359_v45  ;;  %v1463_v1 = vmul.f32 1.442695, %v1360_v27  ;;  %1837 = vperm.xlu1 %3542, %v4873_v37   ;;  %v4941_v4 = vadd.f32 %v3702_v47, %v4931_v29  ;;  %v5516_v45 = vld [vmem:[#allocation23_spill] sm:$0xff] }
 0x2e7   : > { %v3706_v55 = vpop.eup %3705  ;;  %3725 = vpow2.f32 %v1487_v62  ;;  %v1493_v12 = vmul.f32 1.442695, %v1375_v25  ;;  %v1495_v26 = vmul.f32 1.442695, %v1376_v56  ;;  %1822 = vperm.xlu0 %3541, %v4858_v59   ;;  %v1264_v2 = vpop.permute.xlu0 %1263  ;;  %v1976_v61 = vpack.c.bf16 %v3704_v32, %v3696_v51  ;;  %v5518_v25 = vld [vmem:[#allocation41_spill] sm:$0xff] }
 0x2e8   : > { %v4944_v17 = vpop.eup %3707  ;;  %3727 = vpow2.f32 %v1461_v9  ;;  %v1361_v13 = vsub.f32 %v5515_v21, %v1264_v2  ;;  %v1362_v27 = vsub.f32 %v5516_v45, %v1264_v2  ;;  %v1309_v48 = vpop.permute.xlu1 %1308  ;;  %v1977_v37 = vpack.c.bf16 %v3706_v55, %v3698_v10  ;;  %v5520_v21 = vld [vmem:[#allocation27_spill] sm:$0xff] }
 0x2e9   : > { %v4948_v28 = vpop.eup %3709  ;;  %3729 = vpow2.f32 %v1463_v1  ;;  %v1379_v62 = vsub.f32 %v5517_v16, %v1309_v48  ;;  %v1380_v56 = vsub.f32 %v5518_v25, %v1309_v48  ;;  %v4952_v46 = vadd.f32 %v3706_v55, %v3704_v32  ;;  %v5521_v48 = vld [vmem:[#allocation67_spill] sm:$0xff] }
 0x2ea   : > { %v3712_v59 = vpop.eup %3711  ;;  %3731 = vpow2.f32 %v1493_v12  ;;  %v1465_v51 = vmul.f32 1.442695, %v1361_v13  ;;  %v1467_v0 = vmul.f32 1.442695, %v1362_v27  ;;  %2210 = vmatprep.mubr.bf16.mxu1 %v1977_v37  ;;  %1847 = vperm.xlu1 %3542, %v4887_v6   ;;  %v4957_v9 = vadd.f32 %v4948_v28, %v4944_v17  ;;  %v5519_v37 = vld [vmem:[#allocation26_spill] sm:$0xff] }
 0x2eb   : > { %v3714_v10 = vpop.eup %3713  ;;  %3733 = vpow2.f32 %v1495_v26  ;;  %v1501_v1 = vmul.f32 1.442695, %v1379_v62  ;;  %v1503_v2 = vmul.f32 1.442695, %v1380_v56  ;;  %2211 = vmatmul.mubr.bf16.gmra.mrb[28].mxu1 %v1976_v61  ;;  %1832 = vperm.xlu0 %3541, %v4867_v33   ;;  %v1274_v16 = vpop.permute.xlu0 %1273  ;;  %v1978_v32 = vpack.c.bf16 %v3712_v59, %v4931_v29  ;;  %v5522_v26 = vld [vmem:[#allocation69_spill] sm:$0xff] }
 0x2ec   : > { %v4961_v55 = vpop.eup %3715  ;;  %3735 = vpow2.f32 %v1465_v51  ;;  %v1365_v12 = vsub.f32 %v5519_v37, %v1274_v16  ;;  %v1366_v13 = vsub.f32 %v5520_v21, %v1274_v16  ;;  %v1979_v45 = vpack.c.bf16 %v3714_v10, %v3702_v47  ;;  %v5524_v16 = vld [vmem:[#allocation68_spill] sm:$0xff]  ;;  %v5525_v37 = vld [vmem:[#allocation70_spill] sm:$0xff] }
 0x2ed   : > { %v4965_v27 = vpop.eup %3717  ;;  %v5523_v62 = vsub.f32 %v5521_v48, %v5522_v26  ;;  %3737 = vpow2.f32 %v1467_v0  ;;  %v4970_v61 = vadd.f32 %v3714_v10, %v3712_v59  ;;  %v5526_v21 = vsub.f32 %v5524_v16, %v5525_v37  ;;  %v5527_v10 = vld [vmem:[#allocation30_spill] sm:$0xff] }
 0x2ee   : > { %v4972_v56 = vpop.eup %3719  ;;  %3739 = vpow2.f32 %v1501_v1  ;;  %v1473_v29 = vmul.f32 1.442695, %v1365_v12  ;;  %v1475_v6 = vmul.f32 1.442695, %v1366_v13  ;;  %2218 = vmatprep.mubr.bf16.mxu1 %v1979_v45  ;;  %1857 = vperm.xlu1 %3542, %v4894_v39   ;;  %v4977_v47 = vadd.f32 %v4965_v27, %v4961_v55  ;;  %v5528_v12 = vld [vmem:[#allocation31_spill] sm:$0xff] }
 0x2ef   : > { %v1145_v25 = vmul.f32 1.442695, %v5523_v62  ;;  %v3722_v51 = vpop.eup %3721  ;;  %v1147_v48 = vmul.f32 1.442695, %v5526_v21  ;;  %3741 = vpow2.f32 %v1503_v2  ;;  %1842 = vperm.xlu0 %3541, %v4883_v14   ;;  %v1284_v0 = vpop.permute.xlu0 %1283  ;;  %v5529_v21 = vld [vmem:[#allocation72_spill] sm:$0xff]  ;;  %v5533_v39 = vld [vmem:[#allocation35_spill] sm:$0xff] }
 0x2f0   : > { %v4983_v59 = vpop.eup %3723  ;;  %3743 = vpow2.f32 %v1473_v29  ;;  %v1369_v1 = vsub.f32 %v5527_v10, %v1284_v0  ;;  %v1370_v13 = vsub.f32 %v5528_v12, %v1284_v0  ;;  %v4988_v45 = vadd.f32 %v3722_v51, %v4972_v56  ;;  %v5530_v0 = vld [vmem:[#allocation73_spill] sm:$0xff] }
 0x2f1   : > { %v4990_v26 = vpop.eup %3725  ;;  %3745 = vpow2.f32 %v1475_v6  ;;  %v5531_v10 = vsub.f32 %v5529_v21, %v5530_v0 }
 0x2f2   : > { %v3728_v62 = vpop.eup %3727  ;;  %3747 = vpow2.f32 %v1145_v25  ;;  %v1481_v16 = vmul.f32 1.442695, %v1369_v1  ;;  %v1483_v2 = vmul.f32 1.442695, %v1370_v13  ;;  %1867 = vperm.xlu1 %3542, %v4901_v49   ;;  %v4995_v37 = vadd.f32 %v4990_v26, %v4983_v59  ;;  %v5532_v13 = vld [vmem:[#allocation34_spill] sm:$0xff] }
 0x2f3   : > { %v3730_v29 = vpop.eup %3729  ;;  %3749 = vpow2.f32 %v1147_v48  ;;  %v1151_v12 = vmul.f32 1.442695, %v5531_v10  ;;  %2219 = vmatmul.mubr.bf16.gmra.mrb[32].mxu1 %v1978_v32  ;;  %1852 = vperm.xlu0 %3541, %v4891_v22   ;;  %v1294_v6 = vpop.permute.xlu0 %1293  ;;  %v1980_v25 = vpack.c.bf16 %v3728_v62, %v4972_v56  ;;  %v5534_v32 = vld [vmem:[#allocation71_spill] sm:$0xff] }
 0x2f4   : > { %v5002_v1 = vpop.eup %3731  ;;  %3751 = vpow2.f32 %v1481_v16  ;;  %v1373_v49 = vsub.f32 %v5532_v13, %v1294_v6  ;;  %v1374_v14 = vsub.f32 %v5533_v39, %v1294_v6  ;;  %v1981_v33 = vpack.c.bf16 %v3730_v29, %v3722_v51  ;;  %v5536_v51 = vld [vmem:[#allocation75_spill] sm:$0xff] }
 0x2f5   : > { %v5006_v54 = vpop.eup %3733  ;;  %3753 = vpow2.f32 %v1483_v2  ;;  %v5008_v48 = vadd.f32 %v3730_v29, %v3728_v62  ;;  %v5535_v0 = vsub.f32 %v5534_v32, %v4665_v7  ;;  %v5537_v2 = vld [vmem:[#allocation76_spill] sm:$0xff]  ;;  %v5540_v13 = vld [vmem:[#allocation39_spill] sm:$0xff] }
 0x2f6   : > { %v3736_v21 = vpop.eup %3735  ;;  %v1489_v22 = vmul.f32 1.442695, %v1373_v49  ;;  %v1491_v56 = vmul.f32 1.442695, %v1374_v14  ;;  %2226 = vmatprep.mubr.bf16.mxu1 %v1981_v33  ;;  %1877 = vperm.xlu1 %3542, %v4913_v24   ;;  %v5016_v16 = vadd.f32 %v5006_v54, %v5002_v1  ;;  %3755 = vpow2.f32 %v1151_v12  ;;  %v5539_v33 = vld [vmem:[#allocation38_spill] sm:$0xff] }
 0x2f7   : > { %v1149_v10 = vmul.f32 1.442695, %v5535_v0  ;;  %v3738_v39 = vpop.eup %3737  ;;  %v5538_v62 = vsub.f32 %v5536_v51, %v5537_v2  ;;  %1862 = vperm.xlu0 %3541, %v4897_v15   ;;  %v1304_v6 = vpop.permute.xlu0 %1303  ;;  %v1982_v7 = vpack.c.bf16 %v4944_v17, %v3736_v21 }
 0x2f8   : > { %v3740_v49 = vpop.eup %3739  ;;  %3757 = vpow2.f32 %v1489_v22  ;;  %v1377_v14 = vsub.f32 %v5539_v33, %v1304_v6  ;;  %v1378_v32 = vsub.f32 %v5540_v13, %v1304_v6  ;;  %v1983_v0 = vpack.c.bf16 %v4948_v28, %v3738_v39 }
 0x2f9   : > { %v1155_v29 = vmul.f32 1.442695, %v5538_v62  ;;  %v3742_v24 = vpop.eup %3741  ;;  %3759 = vpow2.f32 %v1491_v56  ;;  %v5026_v12 = vadd.f32 %v3738_v39, %v3736_v21  ;;  %v5541_v56 = vld [vmem:[#allocation74_spill] sm:$0xff] }
 0x2fa   : > { %v3744_v52 = vpop.eup %3743  ;;  %3761 = vpow2.f32 %v1149_v10  ;;  %v1497_v51 = vmul.f32 1.442695, %v1377_v14  ;;  %v1499_v2 = vmul.f32 1.442695, %v1378_v32  ;;  %1887 = vperm.xlu1 %3542, %v4923_v3   ;;  %v5029_v62 = vadd.f32 %v3742_v24, %v3740_v49 }
 0x2fb   : > { %v3746_v17 = vpop.eup %3745  ;;  %3763 = vpow2.f32 %v1155_v29  ;;  %2227 = vmatmul.mubr.bf16.gmra.mrb[36].mxu1 %v1980_v25  ;;  %1872 = vperm.xlu0 %3541, %v4907_v30   ;;  %v1984_v22 = vpack.c.bf16 %v4961_v55, %v3744_v52  ;;  %v5542_v21 = vsub.f32 %v5541_v56, %v4687_v18 }
 0x2fc   : > { %v5033_v28 = vpop.eup %3747  ;;  %3765 = vpow2.f32 %v1497_v51  ;;  %2234 = vmatprep.mubr.bf16.mxu1 %v1983_v0  ;;  %v1985_v10 = vpack.c.bf16 %v4965_v27, %v3746_v17  ;;  %v5039_v6 = vadd.f32 %v3746_v17, %v3744_v52 }
 0x2fd   : > { %v1153_v39 = vmul.f32 1.442695, %v5542_v21  ;;  %v5041_v33 = vpop.eup %3749  ;;  %3767 = vpow2.f32 %v1499_v2 }
 0x2fe   : > { %v3752_v25 = vpop.eup %3751  ;;  %1897 = vperm.xlu1 %3542, %v5041_v33  }
 0x2ff   : > { %v3754_v29 = vpop.eup %3753  ;;  %1882 = vperm.xlu0 %3541, %v4919_v50   ;;  %v1986_v55 = vpack.c.bf16 %v4983_v59, %v3752_v25  ;;  %3769 = vpow2.f32 %v1153_v39 }
 0x300   : > { %v1987_v18 = vpack.c.bf16 %v4990_v26, %v3754_v29  ;;  %v5047_v14 = vadd.f32 %v3754_v29, %v3752_v25  ;;  %v5049_v13 = vpop.eup %3755 }
 0x302   : > { %v3758_v52 = vpop.eup %3757  ;;  %1907 = vperm.xlu1 %3542, %v5049_v13  }
 0x303   : > { %v3760_v27 = vpop.eup %3759  ;;  %2235 = vmatmul.mubr.bf16.gmra.mrb[40].mxu1 %v1982_v7  ;;  %1892 = vperm.xlu0 %3541, %v5033_v28   ;;  %v1988_v32 = vpack.c.bf16 %v5002_v1, %v3758_v52 }
 0x304   : > { %v5054_v0 = vpop.eup %3761  ;;  %2242 = vmatprep.mubr.bf16.mxu1 %v1985_v10  ;;  %v1989_v59 = vpack.c.bf16 %v5006_v54, %v3760_v27  ;;  %v1591_v51 = vadd.f32 %v3760_v27, %v3758_v52 }
 0x305   : > { %v5057_v26 = vpop.eup %3763 }
 0x306   : > { %v3766_v2 = vpop.eup %3765  ;;  %1917 = vperm.xlu1 %3542, %v5057_v26  }
 0x307   : > { %v3768_v17 = vpop.eup %3767  ;;  %1902 = vperm.xlu0 %3541, %v5054_v0   ;;  %v1990_v56 = vpack.c.bf16 %v3740_v49, %v3766_v2 }
 0x308   : > { %v1991_v7 = vpack.c.bf16 %v3742_v24, %v3768_v17  ;;  %v1597_v21 = vadd.f32 %v3768_v17, %v3766_v2  ;;  %v5547_v17 = vsub.f32 %v4786_v58, %v4798_v31 }
 0x309   : > { %v5061_v39 = vpop.eup %3769 }
 0x30b   : > { %2243 = vmatmul.mubr.bf16.gmra.mrb[44].mxu1 %v1984_v22  ;;  %1912 = vperm.xlu0 %3541, %v5061_v39  }
 0x30c   : > { %2250 = vmatprep.mubr.bf16.mxu1 %v1987_v18 }
 0x313   : > { %2251 = vmatmul.mubr.bf16.gmra.mrb[48].mxu1 %v1986_v55 }
 0x314   : > { %2258 = vmatprep.mubr.bf16.mxu1 %v1989_v59 }
 0x31b   : > { %2259 = vmatmul.mubr.bf16.gmra.mrb[52].mxu1 %v1988_v32  ;;  %v1740_v32 = vld [vmem:[#allocation4 + $0x10] sm:$0xff] }
 0x31c   : > { %2266 = vmatprep.mubr.bf16.mxu1 %v1991_v7 }
 0x323   : > { %2267 = vmatmul.mubr.bf16.gmra.mrb[56].mxu1 %v1990_v56 }
 0x32a   : > { %1514 = vadd.xlane.f32.xlu0 %v4718_v11  ;;  %1517 = vadd.xlane.f32.xlu1 %v4722_v36  ;;  %v5543_v36 = vld [vmem:[#allocation44_spill] sm:$0xff] }
 0x32e   : > { %1520 = vadd.xlane.f32.xlu0 %v4726_v40  ;;  %1526 = vadd.xlane.f32.xlu1 %v4734_v38 }
 0x332   : > { %1523 = vadd.xlane.f32.xlu0 %v4730_v44  ;;  %1532 = vadd.xlane.f32.xlu1 %v4742_v53  ;;  %v5544_v44 = vld [vmem:[#allocation45_spill] sm:$0xff] }
 0x336   : > { %1529 = vadd.xlane.f32.xlu0 %v4738_v41  ;;  %1538 = vadd.xlane.f32.xlu1 %v4748_v43  ;;  %v5545_v43 = vld [vmem:[#allocation42_spill] sm:$0xff] }
 0x33a   : > { %1535 = vadd.xlane.f32.xlu0 %v4746_v57  ;;  %1544 = vadd.xlane.f32.xlu1 %v4752_v60  ;;  %v5546_v60 = vld [vmem:[#allocation43_spill] sm:$0xff] }
 0x33e   : > { %1541 = vadd.xlane.f32.xlu0 %v4750_v20  ;;  %1550 = vadd.xlane.f32.xlu1 %v4911_v23 }
 0x342   : > { %1547 = vadd.xlane.f32.xlu0 %v4754_v35  ;;  %1556 = vadd.xlane.f32.xlu1 %v4935_v34 }
 0x345   : > { %v1319_v11 = vpop.permute.xlu1 %1318 }
 0x346   : > { %v1383_v40 = vsub.f32 %v5543_v36, %v1319_v11  ;;  %v1384_v38 = vsub.f32 %v5544_v44, %v1319_v11  ;;  %1553 = vadd.xlane.f32.xlu0 %v4927_v42  ;;  %1562 = vadd.xlane.f32.xlu1 %v4941_v4  ;;  %v1738_v4 = vld [vmem:[#allocation4] sm:$0xff] }
 0x348   : > { %v1509_v41 = vmul.f32 1.442695, %v1383_v40  ;;  %v1511_v53 = vmul.f32 1.442695, %v1384_v38 }
 0x349   : > { %v1773_v34 = vpop.permute.xlu1 %1772 }
 0x34a   : > { %3771 = vpow2.f32 %v1509_v41  ;;  %1559 = vadd.xlane.f32.xlu0 %v4952_v46  ;;  %1568 = vadd.xlane.f32.xlu1 %v4988_v45  ;;  %v1739_v45 = vld [vmem:[#allocation4 + $0x8] sm:$0xff]  ;;  %v1930_v49 = vmul.f32 %v1773_v34, %v1738_v4 }
 0x34b   : > { %3773 = vpow2.f32 %v1511_v53  ;;  %v1742_v53 = vld [vmem:[#allocation4 + $0x20] sm:$0xff] }
 0x34e   : > { %1565 = vadd.xlane.f32.xlu0 %v4970_v61  ;;  %1574 = vadd.xlane.f32.xlu1 %v5026_v12  ;;  %v1783_v12 = vpop.permute.xlu1 %1782 }
 0x34f   : > { %v1932_v56 = vmul.f32 %v1783_v12, %v1740_v32 }
 0x352   : > { %1571 = vadd.xlane.f32.xlu0 %v5008_v48  ;;  %1580 = vadd.xlane.f32.xlu1 %v5039_v6  ;;  %v1314_v57 = vpop.permute.xlu0 %1313 }
 0x353   : > { %v1381_v20 = vsub.f32 %v5545_v43, %v1314_v57  ;;  %v1382_v35 = vsub.f32 %v5546_v60, %v1314_v57  ;;  %v1743_v43 = vld [vmem:[#allocation4 + $0x28] sm:$0xff] }
 0x354   : > { %v3772_v42 = vpop.eup %3771 }
 0x355   : > { %v3774_v54 = vpop.eup %3773  ;;  %v1505_v23 = vmul.f32 1.442695, %v1381_v20  ;;  %v1507_v46 = vmul.f32 1.442695, %v1382_v35 }
 0x356   : > { %1577 = vadd.xlane.f32.xlu0 %v4957_v9  ;;  %1586 = vadd.xlane.f32.xlu1 %v5047_v14  ;;  %v1606_v24 = vadd.f32 %v3774_v54, %v3772_v42  ;;  %v1778_v1 = vpop.permute.xlu0 %1777 }
 0x357   : > { %3775 = vpow2.f32 %v1505_v23  ;;  %v1931_v25 = vmul.f32 %v1778_v1, %v1739_v45  ;;  %v1744_v45 = vld [vmem:[#allocation4 + $0x30] sm:$0xff] }
 0x358   : > { %3777 = vpow2.f32 %v1507_v46 }
 0x35a   : > { %1583 = vadd.xlane.f32.xlu0 %v4977_v47  ;;  %1592 = vadd.xlane.f32.xlu1 %v1591_v51  ;;  %v1741_v51 = vld [vmem:[#allocation4 + $0x18] sm:$0xff]  ;;  %v1793_v57 = vpop.permute.xlu0 %1792 }
 0x35b   : > { %v1934_v58 = vmul.f32 %v1793_v57, %v1742_v53 }
 0x35d   : > { %v3369_v61 = vpop.f32.mrb[0].mxu1 }
 0x35e   : > { %v3370_v48 = vpop.f32.mrb[1].mxu1  ;;  %1589 = vadd.xlane.f32.xlu0 %v4995_v37  ;;  %1598 = vadd.xlane.f32.xlu1 %v1597_v21  ;;  %v1788_v37 = vpop.permute.xlu1 %1787 }
 0x35f   : > { %v3371_v9 = vadd.f32 %v3370_v48, %v3369_v61  ;;  %v3372_v22 = vpop.f32.mrb[2].mxu1  ;;  %v1933_v36 = vmul.f32 %v1788_v37, %v1741_v51  ;;  %v1803_v4 = vpop.permute.xlu0 %1802 }
 0x360   : > { %v3373_v10 = vpop.f32.mrb[3].mxu1 }
 0x361   : > { %v3776_v6 = vpop.eup %3775  ;;  %v2283_v29 = vadd.f32 %v3371_v9, %v1930_v49  ;;  %v3374_v55 = vadd.f32 %v3373_v10, %v3372_v22  ;;  %v1745_v49 = vld [vmem:[#allocation4 + $0x38] sm:$0xff] }
 0x362   : > { %v3778_v18 = vpop.eup %3777  ;;  %1595 = vadd.xlane.f32.xlu0 %v5016_v16  ;;  %v1992_v47 = vpack.c.bf16 %v3772_v42, %v3776_v6  ;;  %v1159_v16 = vmul.f32 1.442695, %v5547_v17  ;;  %v1798_v38 = vpop.permute.xlu1 %1797  ;;  %v5548_v42 = vsub.f32 %v4851_v8, %v4865_v63  ;;  %v1936_v8 = vmul.f32 %v1803_v4, %v1744_v45 }
 0x363   : > { %2315 = vst [vmem:[#allocation4] sm:$0xff] %v2283_v29  ;;  %v2284_v14 = vadd.f32 %v3374_v55, %v1931_v25  ;;  %v1993_v52 = vpack.c.bf16 %v3774_v54, %v3778_v18  ;;  %v1603_v27 = vadd.f32 %v3778_v18, %v3776_v6  ;;  %v1935_v23 = vmul.f32 %v1798_v38, %v1743_v43  ;;  %v1813_v10 = vpop.permute.xlu0 %1812 }
 0x364   : > { %3779 = vpow2.f32 %v1159_v16  ;;  %v1157_v54 = vmul.f32 1.442695, %v5548_v42 }
 0x365   : > { %2316 = vst [vmem:[#allocation4 + $0x8] sm:$0xff] %v2284_v14  ;;  %v3375_v59 = vpop.f32.mrb[4].mxu1  ;;  %2274 = vmatprep.mubr.bf16.mxu1 %v1993_v52  ;;  %1604 = vadd.xlane.f32.xlu1 %v1603_v27  ;;  %v1747_v27 = vld [vmem:[#allocation4 + $0x48] sm:$0xff] }
 0x366   : > { %v3376_v2 = vpop.f32.mrb[5].mxu1  ;;  %2275 = vmatmul.mubr.bf16.gmra.mrb[60].mxu1 %v1992_v47  ;;  %1601 = vadd.xlane.f32.xlu0 %v5029_v62  ;;  %v1808_v46 = vpop.permute.xlu1 %1807  ;;  %3781 = vpow2.f32 %v1157_v54  ;;  %v1746_v47 = vld [vmem:[#allocation4 + $0x40] sm:$0xff] }
 0x367   : > { %v3377_v7 = vadd.f32 %v3376_v2, %v3375_v59  ;;  %v3378_v21 = vpop.f32.mrb[6].mxu1  ;;  %v1937_v25 = vmul.f32 %v1808_v46, %v1745_v49  ;;  %v1823_v32 = vpop.permute.xlu0 %1822  ;;  %v1938_v51 = vmul.f32 %v1813_v10, %v1746_v47 }
 0x368   : > { %v3379_v11 = vpop.f32.mrb[7].mxu1 }
 0x369   : > { %v2285_v40 = vadd.f32 %v3377_v7, %v1932_v56  ;;  %v3380_v44 = vadd.f32 %v3379_v11, %v3378_v21 }
 0x36a   : > { %1607 = vadd.xlane.f32.xlu0 %v1606_v24  ;;  %v1818_v9 = vpop.permute.xlu1 %1817 }
 0x36b   : > { %2317 = vst [vmem:[#allocation4 + $0x10] sm:$0xff] %v2285_v40  ;;  %v2286_v41 = vadd.f32 %v3380_v44, %v1933_v36  ;;  %v1939_v56 = vmul.f32 %v1818_v9, %v1747_v27  ;;  %v1748_v40 = vld [vmem:[#allocation4 + $0x50] sm:$0xff]  ;;  %v1833_v44 = vpop.permute.xlu0 %1832  ;;  %v1613_v27 = vld [vmem:[#allocation3 + $0x20] sm:$0xff] }
 0x36c   : > { %v1940_v57 = vmul.f32 %v1823_v32, %v1748_v40 }
 0x36d   : > { %2318 = vst [vmem:[#allocation4 + $0x18] sm:$0xff] %v2286_v41  ;;  %v3381_v62 = vpop.f32.mrb[8].mxu1  ;;  %v1749_v41 = vld [vmem:[#allocation4 + $0x58] sm:$0xff] }
 0x36e   : > { %v3382_v20 = vpop.f32.mrb[9].mxu1  ;;  %v5102_v1 = vpop.eup %3779 }
 0x36f   : > { %v3383_v31 = vadd.f32 %v3382_v20, %v3381_v62  ;;  %v3384_v60 = vpop.f32.mrb[10].mxu1  ;;  %v1828_v14 = vpop.permute.xlu1 %1827 }
 0x370   : > { %v3385_v35 = vpop.f32.mrb[11].mxu1  ;;  %v5105_v59 = vpop.eup %3781 }
 0x371   : > { %v2287_v24 = vadd.f32 %v3383_v31, %v1934_v58  ;;  %v3386_v34 = vadd.f32 %v3385_v35, %v3384_v60  ;;  %v1941_v58 = vmul.f32 %v1828_v14, %v1749_v41  ;;  %v1843_v42 = vpop.permute.xlu0 %1842 }
 0x373   : > { %2319 = vst [vmem:[#allocation4 + $0x20] sm:$0xff] %v2287_v24  ;;  %v2288_v61 = vadd.f32 %v3386_v34, %v1935_v23  ;;  %v1838_v11 = vpop.permute.xlu1 %1837 }
 0x375   : > { %2320 = vst [vmem:[#allocation4 + $0x28] sm:$0xff] %v2288_v61  ;;  %v3387_v48 = vpop.f32.mrb[12].mxu1  ;;  %v5112_v46 = vpop.permute.xlu0 %1852 }
 0x376   : > { %v3388_v12 = vpop.f32.mrb[13].mxu1  ;;  %1927 = vperm.xlu1 %3542, %v5102_v1  }
 0x377   : > { %v3389_v63 = vadd.f32 %v3388_v12, %v3387_v48  ;;  %v3390_v22 = vpop.f32.mrb[14].mxu1  ;;  %v5108_v31 = vpop.permute.xlu1 %1847 }
 0x378   : > { %v3391_v6 = vpop.f32.mrb[15].mxu1 }
 0x379   : > { %v2289_v29 = vadd.f32 %v3389_v63, %v1936_v8  ;;  %v3392_v55 = vadd.f32 %v3391_v6, %v3390_v22  ;;  %v5116_v34 = vpop.permute.xlu0 %1862  ;;  %v1610_v22 = vld [vmem:[#allocation3 + $0x8] sm:$0xff]  ;;  %v1609_v6 = vld [vmem:[#allocation3] sm:$0xff] }
 0x37b   : > { %2321 = vst [vmem:[#allocation4 + $0x30] sm:$0xff] %v2289_v29  ;;  %v2290_v18 = vadd.f32 %v3392_v55, %v1937_v25  ;;  %v5110_v23 = vpop.permute.xlu1 %1857  ;;  %v1750_v25 = vld [vmem:[#allocation4 + $0x60] sm:$0xff]  ;;  %v1642_v55 = vmul.f32 %v4813_v19, %v1610_v22  ;;  %v5549_v19 = vld [vmem:[#allocation47_spill] sm:$0xff]  ;;  %v1753_v22 = vld [vmem:[#allocation4 + $0x78] sm:$0xff] }
 0x37c   : > { %v1942_v32 = vmul.f32 %v1833_v44, %v1750_v25  ;;  %v1615_v44 = vld [vmem:[#allocation3 + $0x30] sm:$0xff] }
 0x37d   : > { %2322 = vst [vmem:[#allocation4 + $0x38] sm:$0xff] %v2290_v18  ;;  %v3393_v52 = vpop.f32.mrb[16].mxu1  ;;  %v5120_v61 = vpop.permute.xlu0 %1872  ;;  %v1751_v18 = vld [vmem:[#allocation4 + $0x68] sm:$0xff] }
 0x37e   : > { %v3394_v37 = vpop.f32.mrb[17].mxu1 }
 0x37f   : > { %v3395_v2 = vadd.f32 %v3394_v37, %v3393_v52  ;;  %v3396_v17 = vpop.f32.mrb[18].mxu1  ;;  %v5114_v24 = vpop.permute.xlu1 %1867  ;;  %v1641_v52 = vmul.f32 %v4803_v5, %v1609_v6  ;;  %v5550_v5 = vld [vmem:[#allocation46_spill] sm:$0xff] }
 0x380   : > { %v3397_v16 = vpop.f32.mrb[19].mxu1  ;;  %1922 = vperm.xlu0 %3541, %v5105_v59  }
 0x381   : > { %v2291_v7 = vadd.f32 %v3395_v2, %v1938_v51  ;;  %v3398_v21 = vadd.f32 %v3397_v16, %v3396_v17  ;;  %v5124_v48 = vpop.permute.xlu0 %1882  ;;  %v1611_v16 = vld [vmem:[#allocation3 + $0x10] sm:$0xff] }
 0x383   : > { %2323 = vst [vmem:[#allocation4 + $0x40] sm:$0xff] %v2291_v7  ;;  %v2292_v36 = vadd.f32 %v3398_v21, %v1939_v56  ;;  %v5118_v4 = vpop.permute.xlu1 %1877  ;;  %v1943_v21 = vmul.f32 %v1838_v11, %v1751_v18  ;;  %v1617_v18 = vld [vmem:[#allocation3 + $0x40] sm:$0xff] }
 0x385   : > { %2324 = vst [vmem:[#allocation4 + $0x48] sm:$0xff] %v2292_v36  ;;  %v3399_v38 = vpop.f32.mrb[20].mxu1  ;;  %v5128_v12 = vpop.permute.xlu0 %1892 }
 0x386   : > { %v3400_v53 = vpop.f32.mrb[21].mxu1 }
 0x387   : > { %v3401_v62 = vadd.f32 %v3400_v53, %v3399_v38  ;;  %v3402_v43 = vpop.f32.mrb[22].mxu1  ;;  %v5122_v45 = vpop.permute.xlu1 %1887  ;;  %v1645_v38 = vmul.f32 %v5549_v19, %v1613_v27  ;;  %v1643_v53 = vmul.f32 %v5550_v5, %v1611_v16  ;;  %v1619_v19 = vld [vmem:[#allocation3 + $0x50] sm:$0xff] }
 0x388   : > { %v3403_v20 = vpop.f32.mrb[23].mxu1 }
 0x389   : > { %v2293_v60 = vadd.f32 %v3401_v62, %v1940_v57  ;;  %v3404_v35 = vadd.f32 %v3403_v20, %v3402_v43  ;;  %v5132_v8 = vpop.permute.xlu0 %1902  ;;  %v1612_v20 = vld [vmem:[#allocation3 + $0x18] sm:$0xff] }
 0x38b   : > { %2325 = vst [vmem:[#allocation4 + $0x50] sm:$0xff] %v2293_v60  ;;  %v2294_v54 = vadd.f32 %v3404_v35, %v1941_v58  ;;  %v5126_v49 = vpop.permute.xlu1 %1897  ;;  %v1752_v58 = vld [vmem:[#allocation4 + $0x70] sm:$0xff]  ;;  %v5551_v35 = vld [vmem:[#allocation50_spill] sm:$0xff] }
 0x38d   : > { %2326 = vst [vmem:[#allocation4 + $0x58] sm:$0xff] %v2294_v54  ;;  %v5136_v10 = vpop.permute.xlu0 %1912  ;;  %v1647_v54 = vmul.f32 %v5551_v35, %v1615_v44  ;;  %v1754_v44 = vld [vmem:[#allocation4 + $0x80] sm:$0xff] }
 0x38f   : > { %v5130_v9 = vpop.permute.xlu1 %1907 }
 0x393   : > { %v5134_v63 = vpop.permute.xlu1 %1917 }
 0x3b6   : > { %v3405_v29 = vpop.f32.mrb[24].mxu1 }
 0x3b7   : > { %v3406_v47 = vpop.f32.mrb[25].mxu1  ;;  %v1518_v14 = vpop.xlane.xlu1 %1517 }
 0x3b8   : > { %v3407_v37 = vadd.f32 %v3406_v47, %v3405_v29  ;;  %v1674_v51 = vadd.f32 %v1642_v55, %v1518_v14  ;;  %v3408_v2 = vpop.f32.mrb[26].mxu1  ;;  %v1515_v17 = vpop.xlane.xlu0 %1514  ;;  %v5552_v29 = vld [vmem:[#allocation48_spill] sm:$0xff]  ;;  %v1944_v47 = vmul.f32 %v1843_v42, %v1752_v58 }
 0x3b9   : > { %v1673_v56 = vadd.f32 %v1641_v52, %v1515_v17  ;;  %v3409_v7 = vpop.f32.mrb[27].mxu1  ;;  %v1644_v55 = vmul.f32 %v5552_v29, %v1612_v20  ;;  %v1945_v17 = vmul.f32 %v5108_v31, %v1753_v22  ;;  %v1755_v20 = vld [vmem:[#allocation4 + $0x88] sm:$0xff]  ;;  %v1946_v22 = vmul.f32 %v5112_v46, %v1754_v44 }
 0x3ba   : > { %v2295_v36 = vadd.f32 %v3407_v37, %v1942_v32  ;;  %1707 = vst.msk [vmem:[#allocation3 + $0x8] sm:$0xff] %vm1705_vm1, %v1674_v51  ;;  %v3410_v40 = vadd.f32 %v3409_v7, %v3408_v2  ;;  %v1614_v37 = vld [vmem:[#allocation3 + $0x28] sm:$0xff]  ;;  %v5553_v7 = vld [vmem:[#allocation52_spill] sm:$0xff] }
 0x3bb   : > { %1706 = vst.msk [vmem:[#allocation3] sm:$0xff] %vm1705_vm1, %v1673_v56  ;;  %v1527_v41 = vpop.xlane.xlu1 %1526  ;;  %v5560_v44 = vld [vmem:[#allocation55_spill] sm:$0xff] }
 0x3bc   : > { %2327 = vst [vmem:[#allocation4 + $0x60] sm:$0xff] %v2295_v36  ;;  %v2296_v57 = vadd.f32 %v3410_v40, %v1943_v21  ;;  %v1677_v62 = vadd.f32 %v1645_v38, %v1527_v41  ;;  %v1521_v43 = vpop.xlane.xlu0 %1520  ;;  %v1649_v21 = vmul.f32 %v5553_v7, %v1617_v18  ;;  %v5554_v40 = vld [vmem:[#allocation49_spill] sm:$0xff]  ;;  %v1618_v18 = vld [vmem:[#allocation3 + $0x48] sm:$0xff] }
 0x3bd   : > { %v1675_v60 = vadd.f32 %v1643_v53, %v1521_v43  ;;  %v1646_v42 = vmul.f32 %v5554_v40, %v1614_v37  ;;  %v1616_v53 = vld [vmem:[#allocation3 + $0x38] sm:$0xff]  ;;  %v1756_v40 = vld [vmem:[#allocation4 + $0x90] sm:$0xff] }
 0x3be   : > { %2328 = vst [vmem:[#allocation4 + $0x68] sm:$0xff] %v2296_v57  ;;  %1710 = vst.msk [vmem:[#allocation3 + $0x20] sm:$0xff] %vm1705_vm1, %v1677_v62  ;;  %v3411_v11 = vpop.f32.mrb[28].mxu1  ;;  %v5555_v62 = vld [vmem:[#allocation53_spill] sm:$0xff] }
 0x3bf   : > { %1708 = vst.msk [vmem:[#allocation3 + $0x10] sm:$0xff] %vm1705_vm1, %v1675_v60  ;;  %v3412_v6 = vpop.f32.mrb[29].mxu1  ;;  %v1533_v25 = vpop.xlane.xlu1 %1532  ;;  %v1651_v43 = vmul.f32 %v5555_v62, %v1619_v19  ;;  %v5557_v37 = vld [vmem:[#allocation57_spill] sm:$0xff]  ;;  %v5559_v19 = vld [vmem:[#allocation58_spill] sm:$0xff]  ;;  %v1948_v62 = vmul.f32 %v5116_v34, %v1756_v40 }
 0x3c0   : > { %v3413_v14 = vadd.f32 %v3412_v6, %v3411_v11  ;;  %v1679_v52 = vadd.f32 %v1647_v54, %v1533_v25  ;;  %v3414_v27 = vpop.f32.mrb[30].mxu1  ;;  %v1524_v32 = vpop.xlane.xlu0 %1523  ;;  %v5556_v11 = vld [vmem:[#allocation51_spill] sm:$0xff]  ;;  %v1621_v54 = vld [vmem:[#allocation3 + $0x60] sm:$0xff] }
 0x3c1   : > { %v1676_v51 = vadd.f32 %v1644_v55, %v1524_v32  ;;  %v3415_v2 = vpop.f32.mrb[31].mxu1  ;;  %v1648_v35 = vmul.f32 %v5556_v11, %v1616_v53  ;;  %v1622_v11 = vld [vmem:[#allocation3 + $0x68] sm:$0xff] }
 0x3c2   : > { %v2297_v16 = vadd.f32 %v3413_v14, %v1944_v47  ;;  %1712 = vst.msk [vmem:[#allocation3 + $0x30] sm:$0xff] %vm1705_vm1, %v1679_v52  ;;  %v3416_v56 = vadd.f32 %v3415_v2, %v3414_v27  ;;  %v1947_v52 = vmul.f32 %v5110_v23, %v1755_v20 }
 0x3c3   : > { %1709 = vst.msk [vmem:[#allocation3 + $0x18] sm:$0xff] %vm1705_vm1, %v1676_v51  ;;  %v1539_v36 = vpop.xlane.xlu1 %1538  ;;  %v1653_v51 = vmul.f32 %v5557_v37, %v1621_v54  ;;  %v1624_v37 = vld [vmem:[#allocation3 + $0x78] sm:$0xff] }
 0x3c4   : > { %2329 = vst [vmem:[#allocation4 + $0x70] sm:$0xff] %v2297_v16  ;;  %v2298_v38 = vadd.f32 %v3416_v56, %v1945_v17  ;;  %v1681_v41 = vadd.f32 %v1649_v21, %v1539_v36  ;;  %v1530_v5 = vpop.xlane.xlu0 %1529  ;;  %v5558_v17 = vld [vmem:[#allocation54_spill] sm:$0xff]  ;;  %v1623_v16 = vld [vmem:[#allocation3 + $0x70] sm:$0xff]  ;;  %v1620_v36 = vld [vmem:[#allocation3 + $0x58] sm:$0xff] }
 0x3c5   : > { %v1678_v57 = vadd.f32 %v1646_v42, %v1530_v5  ;;  %v1650_v46 = vmul.f32 %v5558_v17, %v1618_v18 }
 0x3c6   : > { %2330 = vst [vmem:[#allocation4 + $0x78] sm:$0xff] %v2298_v38  ;;  %1714 = vst.msk [vmem:[#allocation3 + $0x40] sm:$0xff] %vm1705_vm1, %v1681_v41  ;;  %v3417_v31 = vpop.f32.mrb[32].mxu1  ;;  %v1655_v38 = vmul.f32 %v5559_v19, %v1623_v16  ;;  %v1757_v41 = vld [vmem:[#allocation4 + $0x98] sm:$0xff] }
 0x3c7   : > { %1711 = vst.msk [vmem:[#allocation3 + $0x28] sm:$0xff] %vm1705_vm1, %v1678_v57  ;;  %v3418_v58 = vpop.f32.mrb[33].mxu1  ;;  %v1545_v60 = vpop.xlane.xlu1 %1544  ;;  %v1652_v57 = vmul.f32 %v5560_v44, %v1620_v36  ;;  %v1629_v36 = vld [vmem:[#allocation3 + $0xa0] sm:$0xff] }
 0x3c8   : > { %v3419_v6 = vadd.f32 %v3418_v58, %v3417_v31  ;;  %v1683_v25 = vadd.f32 %v1651_v43, %v1545_v60  ;;  %v3420_v29 = vpop.f32.mrb[34].mxu1  ;;  %v1536_v55 = vpop.xlane.xlu0 %1535  ;;  %v1625_v31 = vld [vmem:[#allocation3 + $0x80] sm:$0xff] }
 0x3c9   : > { %v1680_v47 = vadd.f32 %v1648_v35, %v1536_v55  ;;  %v3421_v14 = vpop.f32.mrb[35].mxu1 }
 0x3ca   : > { %v2299_v27 = vadd.f32 %v3419_v6, %v1946_v22  ;;  %1716 = vst.msk [vmem:[#allocation3 + $0x50] sm:$0xff] %vm1705_vm1, %v1683_v25  ;;  %v3422_v32 = vadd.f32 %v3421_v14, %v3420_v29  ;;  %v1949_v22 = vmul.f32 %v5114_v24, %v1757_v41  ;;  %v5561_v29 = vld [vmem:[#allocation6_spill] sm:$0xff]  ;;  %v1627_v14 = vld [vmem:[#allocation3 + $0x90] sm:$0xff]  ;;  %v1626_v41 = vld [vmem:[#allocation3 + $0x88] sm:$0xff] }
 0x3cb   : > { %1713 = vst.msk [vmem:[#allocation3 + $0x38] sm:$0xff] %vm1705_vm1, %v1680_v47  ;;  %v1551_v2 = vpop.xlane.xlu1 %1550  ;;  %v1657_v55 = vmul.f32 %v5561_v29, %v1625_v31  ;;  %v5562_v47 = vld [vmem:[#allocation56_spill] sm:$0xff]  ;;  %v1659_v17 = vmul.f32 %v4897_v15, %v1627_v14  ;;  %v1661_v31 = vmul.f32 %v4907_v30, %v1629_v36  ;;  %v1761_v30 = vld [vmem:[#allocation4 + $0xb8] sm:$0xff] }
 0x3cc   : > { %2331 = vst [vmem:[#allocation4 + $0x80] sm:$0xff] %v2299_v27  ;;  %v2300_v56 = vadd.f32 %v3422_v32, %v1947_v52  ;;  %v1685_v7 = vadd.f32 %v1653_v51, %v1551_v2  ;;  %v1542_v21 = vpop.xlane.xlu0 %1541  ;;  %v1654_v34 = vmul.f32 %v5562_v47, %v1622_v11  ;;  %v1758_v51 = vld [vmem:[#allocation4 + $0xa0] sm:$0xff] }
 0x3cd   : > { %v1682_v42 = vadd.f32 %v1650_v46, %v1542_v21  ;;  %v1759_v46 = vld [vmem:[#allocation4 + $0xa8] sm:$0xff]  ;;  %v1950_v40 = vmul.f32 %v5120_v61, %v1758_v51  ;;  %v1633_v47 = vld [vmem:[#allocation3 + $0xc0] sm:$0xff] }
 0x3ce   : > { %2332 = vst [vmem:[#allocation4 + $0x88] sm:$0xff] %v2300_v56  ;;  %1718 = vst.msk [vmem:[#allocation3 + $0x60] sm:$0xff] %vm1705_vm1, %v1685_v7  ;;  %v3423_v23 = vpop.f32.mrb[36].mxu1  ;;  %v5563_v7 = vld [vmem:[#allocation59_spill] sm:$0xff]  ;;  %v1951_v44 = vmul.f32 %v5118_v4, %v1759_v46  ;;  %v1665_v46 = vmul.f32 %v5033_v28, %v1633_v47 }
 0x3cf   : > { %1715 = vst.msk [vmem:[#allocation3 + $0x48] sm:$0xff] %vm1705_vm1, %v1682_v42  ;;  %v3424_v5 = vpop.f32.mrb[37].mxu1  ;;  %v1557_v53 = vpop.xlane.xlu1 %1556  ;;  %v1656_v21 = vmul.f32 %v5563_v7, %v1624_v37  ;;  %v1630_v37 = vld [vmem:[#allocation3 + $0xa8] sm:$0xff]  ;;  %v1635_v7 = vld [vmem:[#allocation3 + $0xd0] sm:$0xff] }
 0x3d0   : > { %v3425_v43 = vadd.f32 %v3424_v5, %v3423_v23  ;;  %v1687_v20 = vadd.f32 %v1655_v38, %v1557_v53  ;;  %v3426_v58 = vpop.f32.mrb[38].mxu1  ;;  %v1548_v60 = vpop.xlane.xlu0 %1547  ;;  %v1763_v28 = vld [vmem:[#allocation4 + $0xc8] sm:$0xff] }
 0x3d1   : > { %v1684_v35 = vadd.f32 %v1652_v57, %v1548_v60  ;;  %v3427_v54 = vpop.f32.mrb[39].mxu1 }
 0x3d2   : > { %v2301_v6 = vadd.f32 %v3425_v43, %v1948_v62  ;;  %1720 = vst.msk [vmem:[#allocation3 + $0x70] sm:$0xff] %vm1705_vm1, %v1687_v20  ;;  %v3428_v25 = vadd.f32 %v3427_v54, %v3426_v58  ;;  %v5564_v43 = vld [vmem:[#allocation7_spill] sm:$0xff]  ;;  %v1631_v20 = vld [vmem:[#allocation3 + $0xb0] sm:$0xff] }
 0x3d3   : > { %1717 = vst.msk [vmem:[#allocation3 + $0x58] sm:$0xff] %vm1705_vm1, %v1684_v35  ;;  %v1563_v18 = vpop.xlane.xlu1 %1562  ;;  %v1658_v61 = vmul.f32 %v5564_v43, %v1626_v41  ;;  %v1628_v35 = vld [vmem:[#allocation3 + $0x98] sm:$0xff]  ;;  %v1760_v54 = vld [vmem:[#allocation4 + $0xb0] sm:$0xff] }
 0x3d4   : > { %2333 = vst [vmem:[#allocation4 + $0x90] sm:$0xff] %v2301_v6  ;;  %v2302_v52 = vadd.f32 %v3428_v25, %v1949_v22  ;;  %v1689_v27 = vadd.f32 %v1657_v55, %v1563_v18  ;;  %v1554_v32 = vpop.xlane.xlu0 %1553  ;;  %v1663_v6 = vmul.f32 %v4919_v50, %v1631_v20  ;;  %v5565_v55 = vld [vmem:[#allocation60_spill] sm:$0xff] }
 0x3d5   : > { %v1686_v2 = vadd.f32 %v1654_v34, %v1554_v32  ;;  %v1660_v18 = vmul.f32 %v5565_v55, %v1628_v35  ;;  %v1952_v34 = vmul.f32 %v5124_v48, %v1760_v54  ;;  %v1765_v55 = vld [vmem:[#allocation4 + $0xd8] sm:$0xff] }
 0x3d6   : > { %2334 = vst [vmem:[#allocation4 + $0x98] sm:$0xff] %v2302_v52  ;;  %1722 = vst.msk [vmem:[#allocation3 + $0x80] sm:$0xff] %vm1705_vm1, %v1689_v27  ;;  %v3429_v24 = vpop.f32.mrb[40].mxu1 }
 0x3d7   : > { %1719 = vst.msk [vmem:[#allocation3 + $0x68] sm:$0xff] %vm1705_vm1, %v1686_v2  ;;  %v3430_v16 = vpop.f32.mrb[41].mxu1  ;;  %v1569_v56 = vpop.xlane.xlu1 %1568 }
 0x3d8   : > { %v3431_v42 = vadd.f32 %v3430_v16, %v3429_v24  ;;  %v1691_v23 = vadd.f32 %v1659_v17, %v1569_v56  ;;  %v3432_v19 = vpop.f32.mrb[42].mxu1  ;;  %v1560_v38 = vpop.xlane.xlu0 %1559  ;;  %v1953_v24 = vmul.f32 %v5122_v45, %v1761_v30  ;;  %v5566_v56 = vld [vmem:[#allocation61_spill] sm:$0xff]  ;;  %v1764_v30 = vld [vmem:[#allocation4 + $0xd0] sm:$0xff] }
 0x3d9   : > { %v1688_v5 = vadd.f32 %v1656_v21, %v1560_v38  ;;  %v3433_v53 = vpop.f32.mrb[43].mxu1  ;;  %v1662_v48 = vmul.f32 %v5566_v56, %v1630_v37  ;;  %v1667_v38 = vmul.f32 %v5054_v0, %v1635_v7  ;;  %v1766_v56 = vld [vmem:[#allocation4 + $0xe0] sm:$0xff]  ;;  %v1767_v7 = vld [vmem:[#allocation4 + $0xe8] sm:$0xff] }
 0x3da   : > { %v2303_v15 = vadd.f32 %v3431_v42, %v1950_v40  ;;  %1724 = vst.msk [vmem:[#allocation3 + $0x90] sm:$0xff] %vm1705_vm1, %v1691_v23  ;;  %v3434_v57 = vadd.f32 %v3433_v53, %v3432_v19  ;;  %v1632_v42 = vld [vmem:[#allocation3 + $0xb8] sm:$0xff]  ;;  %v1762_v23 = vld [vmem:[#allocation4 + $0xc0] sm:$0xff] }
 0x3db   : > { %1721 = vst.msk [vmem:[#allocation3 + $0x78] sm:$0xff] %vm1705_vm1, %v1688_v5  ;;  %v1575_v62 = vpop.xlane.xlu1 %1574  ;;  %v1664_v53 = vmul.f32 %v4923_v3, %v1632_v42 }
 0x3dc   : > { %2335 = vst [vmem:[#allocation4 + $0xa0] sm:$0xff] %v2303_v15  ;;  %v2304_v58 = vadd.f32 %v3434_v57, %v1951_v44  ;;  %v1693_v60 = vadd.f32 %v1661_v31, %v1575_v62  ;;  %v1566_v11 = vpop.xlane.xlu0 %1565  ;;  %v1637_v44 = vld [vmem:[#allocation3 + $0xe0] sm:$0xff]  ;;  %v1954_v15 = vmul.f32 %v5128_v12, %v1762_v23 }
 0x3dd   : > { %v1690_v22 = vadd.f32 %v1658_v61, %v1566_v11  ;;  %v1634_v61 = vld [vmem:[#allocation3 + $0xc8] sm:$0xff]  ;;  %v1669_v35 = vmul.f32 %v5061_v39, %v1637_v44 }
 0x3de   : > { %2336 = vst [vmem:[#allocation4 + $0xa8] sm:$0xff] %v2304_v58  ;;  %1726 = vst.msk [vmem:[#allocation3 + $0xa0] sm:$0xff] %vm1705_vm1, %v1693_v60  ;;  %v3435_v4 = vpop.f32.mrb[44].mxu1  ;;  %v1955_v60 = vmul.f32 %v5126_v49, %v1763_v28  ;;  %v1666_v12 = vmul.f32 %v5041_v33, %v1634_v61  ;;  %v1956_v33 = vmul.f32 %v5132_v8, %v1764_v30 }
 0x3df   : > { %1723 = vst.msk [vmem:[#allocation3 + $0x88] sm:$0xff] %vm1705_vm1, %v1690_v22  ;;  %v3436_v25 = vpop.f32.mrb[45].mxu1  ;;  %v1581_v29 = vpop.xlane.xlu1 %1580 }
 0x3e0   : > { %v3437_v14 = vadd.f32 %v3436_v25, %v3435_v4  ;;  %v3438_v52 = vpop.f32.mrb[46].mxu1  ;;  %v1695_v27 = vadd.f32 %v1663_v6, %v1581_v29  ;;  %v1572_v32 = vpop.xlane.xlu0 %1571  ;;  %v1636_v6 = vld [vmem:[#allocation3 + $0xd8] sm:$0xff]  ;;  %v1639_v29 = vld [vmem:[#allocation3 + $0xf0] sm:$0xff] }
 0x3e1   : > { %v1692_v51 = vadd.f32 %v1660_v18, %v1572_v32  ;;  %v3439_v2 = vpop.f32.mrb[47].mxu1  ;;  %v1668_v18 = vmul.f32 %v5049_v13, %v1636_v6  ;;  %v1671_v37 = vmul.f32 %v5105_v59, %v1639_v29  ;;  %v2391_v29 = vld [vmem:[#allocation3 + $0x40] sm:$0xff] (!%p3143_p12) }
 0x3e2   : > { %v2305_v50 = vadd.f32 %v3437_v14, %v1952_v34  ;;  %1728 = vst.msk [vmem:[#allocation3 + $0xb0] sm:$0xff] %vm1705_vm1, %v1695_v27  ;;  %v3440_v17 = vadd.f32 %v3439_v2, %v3438_v52  ;;  %v1638_v52 = vld [vmem:[#allocation3 + $0xe8] sm:$0xff] }
 0x3e3   : > { %1725 = vst.msk [vmem:[#allocation3 + $0x98] sm:$0xff] %vm1705_vm1, %v1692_v51  ;;  %v1587_v16 = vpop.xlane.xlu1 %1586  ;;  %v1957_v51 = vmul.f32 %v5130_v9, %v1765_v55  ;;  %v1670_v13 = vmul.f32 %v5057_v26, %v1638_v52  ;;  %v2395_v52 = vld [vmem:[#allocation3 + $0x60] sm:$0xff] (!%p3143_p12) }
 0x3e4   : > { %2337 = vst [vmem:[#allocation4 + $0xb0] sm:$0xff] %v2305_v50  ;;  %v2306_v21 = vadd.f32 %v3440_v17, %v1953_v24  ;;  %v1697_v36 = vadd.f32 %v1665_v46, %v1587_v16  ;;  %v1578_v40 = vpop.xlane.xlu0 %1577  ;;  %v1640_v16 = vld [vmem:[#allocation3 + $0xf8] sm:$0xff] }
 0x3e5   : > { %v1694_v19 = vadd.f32 %v1662_v48, %v1578_v40 }
 0x3e6   : > { %2338 = vst [vmem:[#allocation4 + $0xb8] sm:$0xff] %v2306_v21  ;;  %1730 = vst.msk [vmem:[#allocation3 + $0xc0] sm:$0xff] %vm1705_vm1, %v1697_v36  ;;  %v3441_v45 = vpop.f32.mrb[48].mxu1  ;;  %v1672_v21 = vmul.f32 %v5102_v1, %v1640_v16  ;;  %v1958_v36 = vmul.f32 %v5136_v10, %v1766_v56  ;;  %v1769_v1 = vld [vmem:[#allocation4 + $0xf8] sm:$0xff]  ;;  %v2401_v16 = vld [vmem:[#allocation3 + $0x90] sm:$0xff] (!%p3143_p12) }
 0x3e7   : > { %1727 = vst.msk [vmem:[#allocation3 + $0xa8] sm:$0xff] %vm1705_vm1, %v1694_v19  ;;  %v3442_v41 = vpop.f32.mrb[49].mxu1  ;;  %v1593_v5 = vpop.xlane.xlu1 %1592 }
 0x3e8   : > { %v3443_v57 = vadd.f32 %v3442_v41, %v3441_v45  ;;  %v3444_v31 = vpop.f32.mrb[50].mxu1  ;;  %v1699_v62 = vadd.f32 %v1667_v38, %v1593_v5  ;;  %v1584_v43 = vpop.xlane.xlu0 %1583  ;;  %v1959_v45 = vmul.f32 %v5134_v63, %v1767_v7  ;;  %v1768_v5 = vld [vmem:[#allocation4 + $0xf0] sm:$0xff]  ;;  %v2403_v7 = vld [vmem:[#allocation3 + $0xa0] sm:$0xff] (!%p3143_p12) }
 0x3e9   : > { %v1696_v20 = vadd.f32 %v1664_v53, %v1584_v43  ;;  %v3445_v58 = vpop.f32.mrb[51].mxu1 }
 0x3ea   : > { %v2307_v0 = vadd.f32 %v3443_v57, %v1954_v15  ;;  %1732 = vst.msk [vmem:[#allocation3 + $0xd0] sm:$0xff] %vm1705_vm1, %v1699_v62  ;;  %v3446_v11 = vadd.f32 %v3445_v58, %v3444_v31 }
 0x3eb   : > { %1729 = vst.msk [vmem:[#allocation3 + $0xb8] sm:$0xff] %vm1705_vm1, %v1696_v20  ;;  %v1599_v3 = vpop.xlane.xlu1 %1598 }
 0x3ec   : > { %2339 = vst [vmem:[#allocation4 + $0xc0] sm:$0xff] %v2307_v0  ;;  %v2308_v54 = vadd.f32 %v3446_v11, %v1955_v60  ;;  %v1701_v22 = vadd.f32 %v1669_v35, %v1599_v3  ;;  %v1590_v4 = vpop.xlane.xlu0 %1589  ;;  %v2385_v60 = vld [vmem:[#allocation3 + $0x10] sm:$0xff] (!%p3143_p12)  ;;  %v2383_v0 = vld [vmem:[#allocation3] sm:$0xff] (!%p3143_p12)  ;;  %v2386_v11 = vld [vmem:[#allocation3 + $0x18] sm:$0xff] (!%p3143_p12)  ;;  %v3924_v35 = vmov (!%p3143_p12), 0  }
 0x3ed   : > { %v1698_v25 = vadd.f32 %v1666_v12, %v1590_v4  ;;  %3784 = vset.pattern.permute.xlu1 (!%p3143_p12), %v3924_v35  ;;  %3783 = vset.pattern.permute.xlu0 (!%p3143_p12), %v3924_v35  ;;  %3785 = vrcp.f32 (!%p3143_p12), %v2385_v60  ;;  %v2384_v3 = vld [vmem:[#allocation3 + $0x8] sm:$0xff] (!%p3143_p12)  ;;  %v2389_v4 = vld [vmem:[#allocation3 + $0x30] sm:$0xff] (!%p3143_p12) }
 0x3ee   : > { %2340 = vst [vmem:[#allocation4 + $0xc8] sm:$0xff] %v2308_v54  ;;  %1734 = vst.msk [vmem:[#allocation3 + $0xe0] sm:$0xff] %vm1705_vm1, %v1701_v22  ;;  %v3447_v49 = vpop.f32.mrb[52].mxu1  ;;  %3787 = vrcp.f32 (!%p3143_p12), %v2383_v0  ;;  %v2388_v12 = vld [vmem:[#allocation3 + $0x28] sm:$0xff] (!%p3143_p12)  ;;  %v2387_v54 = vld [vmem:[#allocation3 + $0x20] sm:$0xff] (!%p3143_p12) }
 0x3ef   : > { %1731 = vst.msk [vmem:[#allocation3 + $0xc8] sm:$0xff] %vm1705_vm1, %v1698_v25  ;;  %v3448_v39 = vpop.f32.mrb[53].mxu1  ;;  %3789 = vrcp.f32 (!%p3143_p12), %v2386_v11  ;;  %v2390_v22 = vld [vmem:[#allocation3 + $0x38] sm:$0xff] (!%p3143_p12)  ;;  %v2392_v25 = vld [vmem:[#allocation3 + $0x48] sm:$0xff] (!%p3143_p12)  ;;  %v2449_v35 = vld [vmem:[#allocation4 + $0x10] sm:$0xff] (!%p3143_p12) }
 0x3f0   : > { %v3449_v47 = vadd.f32 %v3448_v39, %v3447_v49  ;;  %v3450_v34 = vpop.f32.mrb[54].mxu1  ;;  %v1596_v14 = vpop.xlane.xlu0 %1595  ;;  %3791 = vrcp.f32 (!%p3143_p12), %v2384_v3  ;;  %v2394_v39 = vld [vmem:[#allocation3 + $0x58] sm:$0xff] (!%p3143_p12) }
 0x3f1   : > { %v1700_v27 = vadd.f32 %v1668_v18, %v1596_v14  ;;  %v3451_v32 = vpop.f32.mrb[55].mxu1  ;;  %3793 = vrcp.f32 (!%p3143_p12), %v2388_v12  ;;  %v2450_v3 = vld [vmem:[#allocation4 + $0x18] sm:$0xff] (!%p3143_p12)  ;;  %v2447_v12 = vld [vmem:[#allocation4] sm:$0xff] (!%p3143_p12) }
 0x3f2   : > { %v2309_v2 = vadd.f32 %v3449_v47, %v1956_v33  ;;  %v3452_v24 = vadd.f32 %v3451_v32, %v3450_v34  ;;  %v1605_v50 = vpop.xlane.xlu1 %1604  ;;  %3795 = vrcp.f32 (!%p3143_p12), %v2387_v54  ;;  %v2393_v33 = vld [vmem:[#allocation3 + $0x50] sm:$0xff] (!%p3143_p12)  ;;  %v2396_v34 = vld [vmem:[#allocation3 + $0x68] sm:$0xff] (!%p3143_p12)  ;;  %v2398_v32 = vld [vmem:[#allocation3 + $0x78] sm:$0xff] (!%p3143_p12) }
 0x3f3   : > { %1733 = vst.msk [vmem:[#allocation3 + $0xd8] sm:$0xff] %vm1705_vm1, %v1700_v27  ;;  %v1703_v17 = vadd.f32 %v1671_v37, %v1605_v50  ;;  %3797 = vrcp.f32 (!%p3143_p12), %v2390_v22  ;;  %v2448_v54 = vld [vmem:[#allocation4 + $0x8] sm:$0xff] (!%p3143_p12) }
 0x3f4   : > { %2341 = vst [vmem:[#allocation4 + $0xd0] sm:$0xff] %v2309_v2  ;;  %v2310_v8 = vadd.f32 %v3452_v24, %v1957_v51  ;;  %v1602_v46 = vpop.xlane.xlu0 %1601  ;;  %3799 = vrcp.f32 (!%p3143_p12), %v2389_v4  ;;  %v2397_v51 = vld [vmem:[#allocation3 + $0x70] sm:$0xff] (!%p3143_p12)  ;;  %v2400_v24 = vld [vmem:[#allocation3 + $0x88] sm:$0xff] (!%p3143_p12) }
 0x3f5   : > { %1736 = vst.msk [vmem:[#allocation3 + $0xf0] sm:$0xff] %vm1705_vm1, %v1703_v17  ;;  %v1702_v48 = vadd.f32 %v1670_v13, %v1602_v46  ;;  %3801 = vrcp.f32 (!%p3143_p12), %v2392_v25  ;;  %v2399_v17 = vld [vmem:[#allocation3 + $0x80] sm:$0xff] (!%p3143_p12) }
 0x3f6   : > { %2342 = vst [vmem:[#allocation4 + $0xd8] sm:$0xff] %v2310_v8  ;;  %v3453_v59 = vpop.f32.mrb[56].mxu1  ;;  %v1928_v15 = vpop.permute.xlu1 %1927  ;;  %3803 = vrcp.f32 (!%p3143_p12), %v2391_v29  ;;  %v2402_v8 = vld [vmem:[#allocation3 + $0x98] sm:$0xff] (!%p3143_p12)  ;;  %v2452_v29 = vld [vmem:[#allocation4 + $0x28] sm:$0xff] (!%p3143_p12) }
 0x3f7   : > { %1735 = vst.msk [vmem:[#allocation3 + $0xe8] sm:$0xff] %vm1705_vm1, %v1702_v48  ;;  %v3454_v9 = vpop.f32.mrb[57].mxu1  ;;  %v1961_v61 = vmul.f32 %v1928_v15, %v1769_v1  ;;  %v3786_v6 = vpop.eup (!%p3143_p12), %3785  ;;  %3805 = vrcp.f32 (!%p3143_p12), %v2394_v39  ;;  %v2404_v48 = vld [vmem:[#allocation3 + $0xa8] sm:$0xff] (!%p3143_p12)  ;;  %v2411_v1 = vld [vmem:[#allocation3 + $0xe0] sm:$0xff] (!%p3143_p12) }
 0x3f8   : > { %v3455_v40 = vadd.f32 %v3454_v9, %v3453_v59  ;;  %v3456_v26 = vpop.f32.mrb[58].mxu1  ;;  %v1608_v42 = vpop.xlane.xlu0 %1607  ;;  %2491 = vperm.xlu1 (!%p3143_p12), %3784, %v3786_v6   ;;  %3807 = vrcp.f32 (!%p3143_p12), %v2393_v33  ;;  %v2451_v39 = vld [vmem:[#allocation4 + $0x20] sm:$0xff] (!%p3143_p12) }
 0x3f9   : > { %v1704_v23 = vadd.f32 %v1672_v21, %v1608_v42  ;;  %v3457_v19 = vpop.f32.mrb[59].mxu1  ;;  %v3788_v30 = vpop.eup (!%p3143_p12), %3787  ;;  %3809 = vrcp.f32 (!%p3143_p12), %v2396_v34  ;;  %v2406_v21 = vld [vmem:[#allocation3 + $0xb8] sm:$0xff] (!%p3143_p12)  ;;  %v2408_v42 = vld [vmem:[#allocation3 + $0xc8] sm:$0xff] (!%p3143_p12) }
 0x3fa   : > { %v2311_v38 = vadd.f32 %v3455_v40, %v1958_v36  ;;  %v3458_v28 = vadd.f32 %v3457_v19, %v3456_v26  ;;  %v3790_v49 = vpop.eup (!%p3143_p12), %3789  ;;  %2481 = vperm.xlu0 (!%p3143_p12), %3783, %v3788_v30   ;;  %3811 = vrcp.f32 (!%p3143_p12), %v2395_v52  ;;  %v2405_v40 = vld [vmem:[#allocation3 + $0xb0] sm:$0xff] (!%p3143_p12)  ;;  %v2407_v19 = vld [vmem:[#allocation3 + $0xc0] sm:$0xff] (!%p3143_p12)  ;;  %v2454_v52 = vld [vmem:[#allocation4 + $0x38] sm:$0xff] (!%p3143_p12) }
 0x3fb   : > { %1737 = vst.msk [vmem:[#allocation3 + $0xf8] sm:$0xff] %vm1705_vm1, %v1704_v23  ;;  %v3792_v55 = vpop.eup (!%p3143_p12), %3791  ;;  %3813 = vrcp.f32 (!%p3143_p12), %v2398_v32 }
 0x3fc   : > { %2343 = vst [vmem:[#allocation4 + $0xe0] sm:$0xff] %v2311_v38  ;;  %v2312_v41 = vadd.f32 %v3458_v28, %v1959_v45  ;;  %2496 = vperm.xlu1 (!%p3143_p12), %3784, %v3790_v49   ;;  %v3794_v18 = vpop.eup (!%p3143_p12), %3793  ;;  %3815 = vrcp.f32 (!%p3143_p12), %v2397_v51  ;;  %v2410_v38 = vld [vmem:[#allocation3 + $0xd8] sm:$0xff] (!%p3143_p12) }
 0x3fd   : > { %v3796_v47 = vpop.eup (!%p3143_p12), %3795  ;;  %3817 = vrcp.f32 (!%p3143_p12), %v2400_v24 }
 0x3fe   : > { %2344 = vst [vmem:[#allocation4 + $0xe8] sm:$0xff] %v2312_v41  ;;  %2486 = vperm.xlu0 (!%p3143_p12), %3783, %v3792_v55   ;;  %v3798_v14 = vpop.eup (!%p3143_p12), %3797  ;;  %3819 = vrcp.f32 (!%p3143_p12), %v2399_v17  ;;  %v2409_v41 = vld [vmem:[#allocation3 + $0xd0] sm:$0xff] (!%p3143_p12)  ;;  %v2455_v17 = vld [vmem:[#allocation4 + $0x40] sm:$0xff] (!%p3143_p12) }
 0x3ff   : > { %v1923_v53 = vpop.permute.xlu0 %1922  ;;  %v3800_v27 = vpop.eup (!%p3143_p12), %3799  ;;  %3821 = vrcp.f32 (!%p3143_p12), %v2402_v8 }
 0x400   : > { %v1960_v57 = vmul.f32 %v1923_v53, %v1768_v5  ;;  %2506 = vperm.xlu1 (!%p3143_p12), %3784, %v3794_v18   ;;  %v3802_v37 = vpop.eup (!%p3143_p12), %3801  ;;  %3823 = vrcp.f32 (!%p3143_p12), %v2401_v16  ;;  %v2412_v53 = vld [vmem:[#allocation3 + $0xe8] sm:$0xff] (!%p3143_p12) }
 0x401   : > { %v3804_v2 = vpop.eup (!%p3143_p12), %3803  ;;  %3825 = vrcp.f32 (!%p3143_p12), %v2404_v48  ;;  %v2458_v48 = vld [vmem:[#allocation4 + $0x58] sm:$0xff] (!%p3143_p12) }
 0x402   : > { %2501 = vperm.xlu0 (!%p3143_p12), %3783, %v3796_v47   ;;  %v3806_v50 = vpop.eup (!%p3143_p12), %3805  ;;  %3827 = vrcp.f32 (!%p3143_p12), %v2403_v7 }
 0x403   : > { %v3808_v13 = vpop.eup (!%p3143_p12), %3807  ;;  %3829 = vrcp.f32 (!%p3143_p12), %v2406_v21 }
 0x404   : > { %2516 = vperm.xlu1 (!%p3143_p12), %3784, %v3798_v14   ;;  %v3810_v46 = vpop.eup (!%p3143_p12), %3809  ;;  %3831 = vrcp.f32 (!%p3143_p12), %v2405_v40 }
 0x405   : > { %v3812_v56 = vpop.eup (!%p3143_p12), %3811  ;;  %3833 = vrcp.f32 (!%p3143_p12), %v2408_v42  ;;  %v2459_v42 = vld [vmem:[#allocation4 + $0x60] sm:$0xff] (!%p3143_p12) }
 0x406   : > { %2511 = vperm.xlu0 (!%p3143_p12), %3783, %v3800_v27   ;;  %v3814_v59 = vpop.eup (!%p3143_p12), %3813  ;;  %3835 = vrcp.f32 (!%p3143_p12), %v2407_v19  ;;  %v2453_v27 = vld [vmem:[#allocation4 + $0x30] sm:$0xff] (!%p3143_p12) }
 0x407   : > { %v3816_v9 = vpop.eup (!%p3143_p12), %3815  ;;  %3837 = vrcp.f32 (!%p3143_p12), %v2410_v38 }
 0x408   : > { %2526 = vperm.xlu1 (!%p3143_p12), %3784, %v3802_v37   ;;  %v3818_v36 = vpop.eup (!%p3143_p12), %3817  ;;  %3839 = vrcp.f32 (!%p3143_p12), %v2409_v41  ;;  %v2462_v41 = vld [vmem:[#allocation4 + $0x78] sm:$0xff] (!%p3143_p12) }
 0x409   : > { %v3820_v26 = vpop.eup (!%p3143_p12), %3819  ;;  %3841 = vrcp.f32 (!%p3143_p12), %v2412_v53 }
 0x40a   : > { %2521 = vperm.xlu0 (!%p3143_p12), %3783, %v3804_v2   ;;  %v3822_v23 = vpop.eup (!%p3143_p12), %3821  ;;  %3843 = vrcp.f32 (!%p3143_p12), %v2411_v1 }
 0x40b   : > { %v3824_v45 = vpop.eup (!%p3143_p12), %3823 }
 0x40c   : > { %2536 = vperm.xlu1 (!%p3143_p12), %3784, %v3806_v50   ;;  %v3826_v28 = vpop.eup (!%p3143_p12), %3825  ;;  %v2456_v50 = vld [vmem:[#allocation4 + $0x48] sm:$0xff] (!%p3143_p12) }
 0x40d   : > { %v3828_v5 = vpop.eup (!%p3143_p12), %3827 }
 0x40e   : > { %2531 = vperm.xlu0 (!%p3143_p12), %3783, %v3808_v13  }
 0x410   : > { %2546 = vperm.xlu1 (!%p3143_p12), %3784, %v3810_v46  }
 0x412   : > { %2541 = vperm.xlu0 (!%p3143_p12), %3783, %v3812_v56  }
 0x414   : > { %2556 = vperm.xlu1 (!%p3143_p12), %3784, %v3814_v59   ;;  %v2457_v59 = vld [vmem:[#allocation4 + $0x50] sm:$0xff] (!%p3143_p12) }
 0x416   : > { %2551 = vperm.xlu0 (!%p3143_p12), %3783, %v3816_v9  }
 0x418   : > { %2566 = vperm.xlu1 (!%p3143_p12), %3784, %v3818_v36  }
 0x41a   : > { %2561 = vperm.xlu0 (!%p3143_p12), %3783, %v3820_v26   ;;  %v2460_v26 = vld [vmem:[#allocation4 + $0x68] sm:$0xff] (!%p3143_p12) }
 0x41c   : > { %2576 = vperm.xlu1 (!%p3143_p12), %3784, %v3822_v23  }
 0x41e   : > { %2571 = vperm.xlu0 (!%p3143_p12), %3783, %v3824_v45  }
 0x420   : > { %2586 = vperm.xlu1 (!%p3143_p12), %3784, %v3826_v28  }
 0x422   : > { %2581 = vperm.xlu0 (!%p3143_p12), %3783, %v3828_v5   ;;  %v2461_v5 = vld [vmem:[#allocation4 + $0x70] sm:$0xff] (!%p3143_p12) }
 0x439   : > { %v3459_v44 = vpop.f32.mrb[60].mxu1 }
 0x43a   : > { %v3460_v10 = vpop.f32.mrb[61].mxu1 }
 0x43b   : > { %v3461_v31 = vadd.f32 %v3460_v10, %v3459_v44  ;;  %v3462_v62 = vpop.f32.mrb[62].mxu1  ;;  %2382 = sbr.rel (%p3143_p12) target bundleno = 1234 (0x4d2), region = 40  ;;  %v3830_v44 = vpop.eup (!%p3143_p12), %3829  ;;  %v2414_v10 = vld [vmem:[#allocation3 + $0xf8] sm:$0xff] (!%p3143_p12) }
 0x43c   : > { %v3463_v43 = vpop.f32.mrb[63].mxu1  ;;  %v3832_v15 = vpop.eup (!%p3143_p12), %3831  ;;  %2596 = vperm.xlu1 (!%p3143_p12), %3784, %v3830_v44   ;;  %3845 = vrcp.f32 (!%p3143_p12), %v2414_v10 }
 0x43d   : > { %v2313_v20 = vadd.f32 %v3461_v31, %v1960_v57  ;;  %v3464_v63 = vadd.f32 %v3463_v43, %v3462_v62  ;;  %v3834_v57 = vpop.eup (!%p3143_p12), %3833  ;;  %2591 = vperm.xlu0 (!%p3143_p12), %3783, %v3832_v15   ;;  %v2413_v31 = vld [vmem:[#allocation3 + $0xf0] sm:$0xff] (!%p3143_p12) }
 0x43e   : > { %v3836_v62 = vpop.eup (!%p3143_p12), %3835  ;;  %3847 = vrcp.f32 (!%p3143_p12), %v2413_v31  ;;  %v2463_v31 = vld [vmem:[#allocation4 + $0x80] sm:$0xff] (!%p3143_p12) }
 0x43f   : > { %2345 = vst [vmem:[#allocation4 + $0xf0] sm:$0xff] %v2313_v20  ;;  %v2314_v58 = vadd.f32 %v3464_v63, %v1961_v61  ;;  %v3838_v43 = vpop.eup (!%p3143_p12), %3837 }
 0x440   : > { %2606 = vperm.xlu1 (!%p3143_p12), %3784, %v3834_v57   ;;  %v3840_v61 = vpop.eup (!%p3143_p12), %3839  ;;  %v2464_v57 = vld [vmem:[#allocation4 + $0x88] sm:$0xff] (!%p3143_p12) }
 0x441   : > { %2346 = vst [vmem:[#allocation4 + $0xf8] sm:$0xff] %v2314_v58  ;;  %2601 = vperm.xlu0 (!%p3143_p12), %3783, %v3836_v62   ;;  %v3842_v20 = vpop.eup (!%p3143_p12), %3841 }
 0x442   : > { %v3844_v63 = vpop.eup %3843 }
 0x444   : > { %2616 = vperm.xlu1 %3784, %v3838_v43  }
 0x445   : > { %2611 = vperm.xlu0 %3783, %v3840_v61  }
 0x446   : > { %v3846_v58 = vpop.eup %3845 }
 0x448   : > { %2626 = vperm.xlu1 %3784, %v3842_v20   ;;  %v3848_v60 = vpop.eup %3847 }
 0x449   : > { %2621 = vperm.xlu0 %3783, %v3844_v63  }
 0x44c   : > { %2636 = vperm.xlu1 %3784, %v3846_v58   ;;  %v2466_v58 = vld [vmem:[#allocation4 + $0x98] sm:$0xff] }
 0x44d   : > { %2631 = vperm.xlu0 %3783, %v3848_v60   ;;  %v2465_v60 = vld [vmem:[#allocation4 + $0x90] sm:$0xff] }
 0x477   : > { %v2492_v0 = vpop.permute.xlu1 %2491 }
 0x478   : > { %v2641_v4 = vmul.f32 %v2492_v0, %v2449_v35 }
 0x479   : > { %v2482_v11 = vpop.permute.xlu0 %2481 }
 0x47a   : > { %v2639_v25 = vmul.f32 %v2482_v11, %v2447_v12 }
 0x47b   : > { %v2497_v22 = vpop.permute.xlu1 %2496 }
 0x47c   : > { %v2642_v6 = vmul.f32 %v2497_v22, %v2450_v3  ;;  %v2467_v22 = vld [vmem:[#allocation4 + $0xa0] sm:$0xff] }
 0x47d   : > { %v2487_v30 = vpop.permute.xlu0 %2486 }
 0x47e   : > { %v2640_v49 = vmul.f32 %v2487_v30, %v2448_v54  ;;  %v3218_v55 = vpack.c.bf16 %v2642_v6, %v2641_v4  ;;  %v2468_v54 = vld [vmem:[#allocation4 + $0xa8] sm:$0xff] }
 0x47f   : > { %v2507_v33 = vpop.permute.xlu1 %2506 }
 0x480   : > { %v3213_v18 = vpack.c.bf16 %v2640_v49, %v2639_v25  ;;  %3290 = vst [vmem:[%s4021_s10 + $0x8] sm:$0xff] %v3218_v55   ;;  %v2644_v47 = vmul.f32 %v2507_v33, %v2452_v29  ;;  %v2470_v29 = vld [vmem:[#allocation4 + $0xb8] sm:$0xff]  ;;  %v2469_v55 = vld [vmem:[#allocation4 + $0xb0] sm:$0xff] }
 0x481   : > { %v2502_v34 = vpop.permute.xlu0 %2501 }
 0x482   : > { %3214 = vst [vmem:[%s4021_s10] sm:$0xff] %v3213_v18   ;;  %v2643_v14 = vmul.f32 %v2502_v34, %v2451_v39 }
 0x483   : > { %v2517_v37 = vpop.permute.xlu1 %2516 }
 0x484   : > { %v3223_v32 = vpack.c.bf16 %v2644_v47, %v2643_v14  ;;  %v2646_v51 = vmul.f32 %v2517_v37, %v2454_v52  ;;  %v2472_v14 = vld [vmem:[#allocation4 + $0xc8] sm:$0xff]  ;;  %v2471_v52 = vld [vmem:[#allocation4 + $0xc0] sm:$0xff] }
 0x485   : > { %v2512_v2 = vpop.permute.xlu0 %2511 }
 0x486   : > { %3291 = vst [vmem:[%s4021_s10 + $0x10] sm:$0xff] %v3223_v32   ;;  %v2645_v24 = vmul.f32 %v2512_v2, %v2453_v27 }
 0x487   : > { %v2527_v8 = vpop.permute.xlu1 %2526 }
 0x488   : > { %v3228_v13 = vpack.c.bf16 %v2646_v51, %v2645_v24  ;;  %v2648_v46 = vmul.f32 %v2527_v8, %v2456_v50  ;;  %v2474_v24 = vld [vmem:[#allocation4 + $0xd8] sm:$0xff]  ;;  %v2473_v50 = vld [vmem:[#allocation4 + $0xd0] sm:$0xff] }
 0x489   : > { %v2522_v16 = vpop.permute.xlu0 %2521 }
 0x48a   : > { %3292 = vst [vmem:[%s4021_s10 + $0x18] sm:$0xff] %v3228_v13   ;;  %v2647_v56 = vmul.f32 %v2522_v16, %v2455_v17 }
 0x48b   : > { %v2537_v9 = vpop.permute.xlu1 %2536 }
 0x48c   : > { %v3233_v7 = vpack.c.bf16 %v2648_v46, %v2647_v56  ;;  %v2650_v21 = vmul.f32 %v2537_v9, %v2458_v48  ;;  %v2476_v56 = vld [vmem:[#allocation4 + $0xe8] sm:$0xff]  ;;  %v2475_v48 = vld [vmem:[#allocation4 + $0xe0] sm:$0xff] }
 0x48d   : > { %v2532_v36 = vpop.permute.xlu0 %2531 }
 0x48e   : > { %3293 = vst [vmem:[%s4021_s10 + $0x20] sm:$0xff] %v3233_v7   ;;  %v2649_v40 = vmul.f32 %v2532_v36, %v2457_v59 }
 0x48f   : > { %v2547_v19 = vpop.permute.xlu1 %2546 }
 0x490   : > { %v3238_v23 = vpack.c.bf16 %v2650_v21, %v2649_v40  ;;  %v2652_v45 = vmul.f32 %v2547_v19, %v2460_v26  ;;  %v2478_v40 = vld [vmem:[#allocation4 + $0xf8] sm:$0xff]  ;;  %v2477_v26 = vld [vmem:[#allocation4 + $0xf0] sm:$0xff] }
 0x491   : > { %v2542_v38 = vpop.permute.xlu0 %2541 }
 0x492   : > { %3294 = vst [vmem:[%s4021_s10 + $0x28] sm:$0xff] %v3238_v23   ;;  %v2651_v28 = vmul.f32 %v2542_v38, %v2459_v42 }
 0x493   : > { %v2557_v44 = vpop.permute.xlu1 %2556 }
 0x494   : > { %v3243_v53 = vpack.c.bf16 %v2652_v45, %v2651_v28  ;;  %v2654_v1 = vmul.f32 %v2557_v44, %v2462_v41 }
 0x495   : > { %v2552_v15 = vpop.permute.xlu0 %2551 }
 0x496   : > { %3295 = vst [vmem:[%s4021_s10 + $0x30] sm:$0xff] %v3243_v53   ;;  %v2653_v10 = vmul.f32 %v2552_v15, %v2461_v5 }
 0x497   : > { %v2567_v43 = vpop.permute.xlu1 %2566 }
 0x498   : > { %v3248_v62 = vpack.c.bf16 %v2654_v1, %v2653_v10  ;;  %v2656_v61 = vmul.f32 %v2567_v43, %v2464_v57 }
 0x499   : > { %v2562_v20 = vpop.permute.xlu0 %2561 }
 0x49a   : > { %3296 = vst [vmem:[%s4021_s10 + $0x38] sm:$0xff] %v3248_v62   ;;  %v2655_v63 = vmul.f32 %v2562_v20, %v2463_v31 }
 0x49b   : > { %v2577_v11 = vpop.permute.xlu1 %2576 }
 0x49c   : > { %v3253_v0 = vpack.c.bf16 %v2656_v61, %v2655_v63  ;;  %v2658_v35 = vmul.f32 %v2577_v11, %v2466_v58 }
 0x49d   : > { %v2572_v3 = vpop.permute.xlu0 %2571 }
 0x49e   : > { %3297 = vst [vmem:[%s4021_s10 + $0x40] sm:$0xff] %v3253_v0   ;;  %v2657_v12 = vmul.f32 %v2572_v3, %v2465_v60 }
 0x49f   : > { %v2587_v6 = vpop.permute.xlu1 %2586 }
 0x4a0   : > { %v3258_v4 = vpack.c.bf16 %v2658_v35, %v2657_v12  ;;  %v2660_v30 = vmul.f32 %v2587_v6, %v2468_v54 }
 0x4a1   : > { %v2582_v25 = vpop.permute.xlu0 %2581 }
 0x4a2   : > { %3298 = vst [vmem:[%s4021_s10 + $0x48] sm:$0xff] %v3258_v4   ;;  %v2659_v49 = vmul.f32 %v2582_v25, %v2467_v22 }
 0x4a4   : > { %v3263_v39 = vpack.c.bf16 %v2660_v30, %v2659_v49 }
 0x4a6   : > { %3299 = vst [vmem:[%s4021_s10 + $0x50] sm:$0xff] %v3263_v39  }
 0x4bb   : > { %v2597_v18 = vpop.permute.xlu1 %2596 }
 0x4bc   : > { %v2662_v33 = vmul.f32 %v2597_v18, %v2470_v29  ;;  %v2592_v47 = vpop.permute.xlu0 %2591 }
 0x4bd   : > { %v2661_v34 = vmul.f32 %v2592_v47, %v2469_v55 }
 0x4bf   : > { %v3268_v27 = vpack.c.bf16 %v2662_v33, %v2661_v34  ;;  %v2607_v32 = vpop.permute.xlu1 %2606 }
 0x4c0   : > { %v2664_v37 = vmul.f32 %v2607_v32, %v2472_v14  ;;  %v2602_v51 = vpop.permute.xlu0 %2601 }
 0x4c1   : > { %3300 = vst [vmem:[%s4021_s10 + $0x58] sm:$0xff] %v3268_v27   ;;  %v2663_v2 = vmul.f32 %v2602_v51, %v2471_v52 }
 0x4c3   : > { %v3273_v17 = vpack.c.bf16 %v2664_v37, %v2663_v2  ;;  %v2617_v13 = vpop.permute.xlu1 %2616 }
 0x4c4   : > { %v2666_v8 = vmul.f32 %v2617_v13, %v2474_v24  ;;  %v2612_v46 = vpop.permute.xlu0 %2611 }
 0x4c5   : > { %3301 = vst [vmem:[%s4021_s10 + $0x60] sm:$0xff] %v3273_v17   ;;  %v2665_v16 = vmul.f32 %v2612_v46, %v2473_v50 }
 0x4c7   : > { %v3278_v59 = vpack.c.bf16 %v2666_v8, %v2665_v16  ;;  %v2627_v7 = vpop.permute.xlu1 %2626 }
 0x4c8   : > { %v2668_v9 = vmul.f32 %v2627_v7, %v2476_v56  ;;  %v2622_v21 = vpop.permute.xlu0 %2621 }
 0x4c9   : > { %3302 = vst [vmem:[%s4021_s10 + $0x68] sm:$0xff] %v3278_v59   ;;  %v2667_v36 = vmul.f32 %v2622_v21, %v2475_v48 }
 0x4cb   : > { %v3283_v42 = vpack.c.bf16 %v2668_v9, %v2667_v36  ;;  %v2637_v23 = vpop.permute.xlu1 %2636 }
 0x4cc   : > { %v2670_v19 = vmul.f32 %v2637_v23, %v2478_v40  ;;  %v2632_v45 = vpop.permute.xlu0 %2631 }
 0x4cd   : > { %3303 = vst [vmem:[%s4021_s10 + $0x70] sm:$0xff] %v3283_v42   ;;  %v2669_v38 = vmul.f32 %v2632_v45, %v2477_v26 }
 0x4cf   : > { %v3288_v28 = vpack.c.bf16 %v2670_v19, %v2669_v38 }
 0x4d1   : > { %3304 = vst [vmem:[%s4021_s10 + $0x78] sm:$0xff] %v3288_v28  }
 0x4d2 PF: > { %s13_s20 = sadd.s32 1, %s3919_s20   ;;  %s5567_s24 = sld [smem:[#allocation5_spill]] }
 0x4d3   : > { %p10_p13 = scmp.ge.s32.totalorder %s13_s20, 34   ;;  %s5568_s12 = smov %s3903_s16 }
 0x4d4   : > { %s5569_s13 = smov %s3907_s17  ;;  %s5570_s14 = smov %s3911_s18 }
 0x4d5   : > { %s5571_s15 = smov %s3915_s19  ;;  %s5572_s16 = smov %s5577_s21 }
 0x4d6   : > { %s5573_s17 = smov %s5581_s22  ;;  %s5574_s18 = smov %s5585_s23 }
 0x4d7   :  { %12 = sbr.rel (!%p10_p13) target bundleno = 5 (0x5), region = 76 }
 0x4d8   : > { %s5575_s19 = smov %s5567_s24 }

// kernel: multi_headed_attention.5
= control target key start
LH: loop header
LB: loop body
LE: loop exit
PB: predicated region body
PF: predicated region fallthrough
CT: control target
= control target key end

     0   :  { %8 = vsyncpa [#allocation5], 0  ;;  %s4851_s0 = inlined_call_operand.vmem [shape: bf16[4,1024,128], index: 0, kind: input, shape index: {}]   ;;  %s4852_s1 = inlined_call_operand.vmem [shape: bf16[4,128,512], index: 1, kind: input, shape index: {}]   ;;  %s4853_s2 = inlined_call_operand.vmem [shape: f32[1,512], index: 2, kind: input, shape index: {}]   ;;  %s4854_s3 = inlined_call_operand.hbm [shape: f32[1024,512], index: 3, kind: output, shape index: {}]  }
   0x1   :  { %10 = vsyncpa [#allocation5 + $0x1], 0  ;;  %s4041_s12 = smov 0   ;;  %s4043_s13 = smov 0  }
   0x2   :  { %s4045_s14 = smov 0   ;;  %s4047_s15 = smov 0  }
   0x3   :  { %s4049_s16 = smov 0   ;;  %s4051_s17 = smov 0  }
   0x4   :  { %s4053_s18 = smov 0   ;;  %s4055_s19 = smov 0  }
   0x5   :  { %s4057_s20 = smov 0   ;;  %s4059_s21 = smov 0  }
   0x6   :  { %s4061_s22 = smov 0   ;;  %s4063_s23 = smov 0  }
   0x7 LB: > { %s3132_s24 = sadd.s32 4294967295, %s4014_s23   ;;  %s3133_s25 = sadd.s32 4294967294, %s4014_s23   ;;  %s4014_s23 = sphi %s4063_s23, %s16_s23   ;;  %s4010_s22 = sphi %s4061_s22, %s4872_s22   ;;  %s4006_s21 = sphi %s4059_s21, %s4871_s21   ;;  %s4002_s20 = sphi %s4057_s20, %s4870_s20   ;;  %s3998_s19 = sphi %s4055_s19, %s4869_s19   ;;  %s3994_s18 = sphi %s4053_s18, %s4868_s18   ;;  %s3990_s17 = sphi %s4051_s17, %s4867_s17   ;;  %s3986_s16 = sphi %s4049_s16, %s4866_s16   ;;  %s3982_s15 = sphi %s4047_s15, %s4865_s15   ;;  %s3978_s14 = sphi %s4045_s14, %s4864_s14   ;;  %s3974_s13 = sphi %s4043_s13, %s4863_s13   ;;  %s3970_s12 = sphi %s4041_s12, %s4862_s12  }
   0x8   : > { %s25_s26 = sadd.s32 1, %s4006_s21  ;;  %s28_s27 = sadd.s32 1, %s4010_s22 }
   0x9   : > { %p26_p0 = scmp.ge.s32.totalorder %s25_s26, 2  ;;  %s35_s28 = sadd.s32 1, %s3994_s18 }
   0xa   : > { %p42_p1 = scmp.ne.s32.totalorder %s3994_s18, %s3990_s17  ;;  %p43_p2 = scmp.eq.s32.totalorder %s4014_s23, 0 }
   0xb   : > { %s4874_s26 = smov (%p26_p0, %s25_s26), 0  ;;  %s4876_s27 = smov (!%p26_p0, %s28_s27), %s4010_s22 }
   0xc   : > { %p4112_p3 = por %p43_p2, %p42_p1  ;;  %s58_s30 = ssub.s32 %s4006_s21, %s4874_s26 }
   0xd   : > { %p30_p4 = scmp.ge.s32.totalorder %s4876_s27, 4  ;;  %p59_p5 = scmp.eq.s32.totalorder %s58_s30, 0 }
   0xe   : > { %s61_s4 = sadd.s32 1, %s3986_s16  ;;  %p68_p6 = scmp.ne.s32.totalorder %s3986_s16, %s3982_s15 }
   0xf   : > { %s4878_s27 = smov (%p30_p4, %s4876_s27), 0  ;;  %s115_s9 = sadd.s32 1, %s3978_s14 }
  0x10   : > { %4857 = sst [smem:[#allocation7_spill]] %s4878_s27  ;;  %s32_s6 = ssub.s32 %s4010_s22, %s4878_s27 }
  0x11   : > { %s4124_s5 = scalar_select %p59_p5, %s3986_s16, %s61_s4  }
  0x12   : > { %p4128_p7 = por %p68_p6, %p43_p2  ;;  %p33_p8 = scmp.eq.s32.totalorder %s32_s6, 0 }
  0x13   : > { %s112_s8 = sor.u32 %s58_s30, %s32_s6  ;;  %p125_p10 = scmp.ne.s32.totalorder %s3978_s14, %s3974_s13 }
  0x14   : > { %p113_p9 = scmp.eq.s32.totalorder %s112_s8, 0  ;;  %p126_p11 = scmp.eq.s32.totalorder %s3132_s24, 7 }
  0x15   : > { %s4134_s10 = scalar_select %p33_p8, %s3994_s18, %s35_s28  }
  0x16   : > { %s4137_s11 = scalar_select %p113_p9, %s3978_s14, %s115_s9  }
  0x17   : > { %p131_p12 = scmp.ne.s32.totalorder %s3974_s13, %s3970_s12  ;;  %p132_p13 = scmp.eq.s32.totalorder %s3133_s25, 7 }
  0x18   : > { %p4143_p0 = por %p126_p11, %p125_p10  ;;  %p3135_p2 = scmp.ge.s32.totalorder %s4014_s23, 8 }
  0x19   : > { %p4147_p1 = por %p132_p13, %p131_p12 }
  0x1a   : > { %148 = sbr.rel (%p3135_p2) target bundleno = 105 (0x69), region = 16 }
  0x21   : > { %151 = sbr.rel (!%p4112_p3) target bundleno = 69 (0x45), region = 20  ;;  %s153_s28 = sand.u32 (%p4112_p3), 1, %s3994_s18  }
  0x22   : > { %s3426_s24 = sshll.u32 (%p4112_p3), %s4010_s22, 7  ;;  %s3136_s30 = sshll.u32 (%p4112_p3), %s153_s28, 9 }
  0x23   : > { %s4159_s8 = scalar_lea.vmem (%p4112_p3), %s4851_s0, %s3426_s24  ;;  %s4164_s29 = scalar_lea.vmem (%p4112_p3), [#allocation2], %s3136_s30 }
  0x24   : > { %v174_v0 = vld [vmem:[%s4159_s8] sm:$0xff] (%p4112_p3)   ;;  %v178_v1 = vld [vmem:[%s4159_s8 + $0x8] sm:$0xff] (%p4112_p3)   ;;  %v182_v2 = vld [vmem:[%s4159_s8 + $0x10] sm:$0xff] (%p4112_p3)  }
  0x25   : > { %175 = vst [vmem:[%s4164_s29] sm:$0xff] (%p4112_p3), %v174_v0   ;;  %179 = vst [vmem:[%s4164_s29 + $0x8] sm:$0xff] (%p4112_p3), %v178_v1   ;;  %v186_v3 = vld [vmem:[%s4159_s8 + $0x18] sm:$0xff] (%p4112_p3)   ;;  %v190_v4 = vld [vmem:[%s4159_s8 + $0x20] sm:$0xff] (%p4112_p3)  }
  0x26   : > { %183 = vst [vmem:[%s4164_s29 + $0x10] sm:$0xff] (%p4112_p3), %v182_v2   ;;  %v194_v5 = vld [vmem:[%s4159_s8 + $0x28] sm:$0xff] (%p4112_p3)   ;;  %187 = vst [vmem:[%s4164_s29 + $0x18] sm:$0xff] (%p4112_p3), %v186_v3   ;;  %v198_v6 = vld [vmem:[%s4159_s8 + $0x30] sm:$0xff] (%p4112_p3)  }
  0x27   : > { %191 = vst [vmem:[%s4164_s29 + $0x20] sm:$0xff] (%p4112_p3), %v190_v4   ;;  %195 = vst [vmem:[%s4164_s29 + $0x28] sm:$0xff] (%p4112_p3), %v194_v5   ;;  %v202_v7 = vld [vmem:[%s4159_s8 + $0x38] sm:$0xff] (%p4112_p3)   ;;  %v206_v8 = vld [vmem:[%s4159_s8 + $0x40] sm:$0xff] (%p4112_p3)  }
  0x28   : > { %199 = vst [vmem:[%s4164_s29 + $0x30] sm:$0xff] %v198_v6   ;;  %203 = vst [vmem:[%s4164_s29 + $0x38] sm:$0xff] %v202_v7   ;;  %v210_v9 = vld [vmem:[%s4159_s8 + $0x48] sm:$0xff]   ;;  %v214_v10 = vld [vmem:[%s4159_s8 + $0x50] sm:$0xff]  }
  0x29   : > { %207 = vst [vmem:[%s4164_s29 + $0x40] sm:$0xff] %v206_v8   ;;  %v218_v11 = vld [vmem:[%s4159_s8 + $0x58] sm:$0xff]   ;;  %211 = vst [vmem:[%s4164_s29 + $0x48] sm:$0xff] %v210_v9   ;;  %v222_v12 = vld [vmem:[%s4159_s8 + $0x60] sm:$0xff]  }
  0x2a   : > { %215 = vst [vmem:[%s4164_s29 + $0x50] sm:$0xff] %v214_v10   ;;  %219 = vst [vmem:[%s4164_s29 + $0x58] sm:$0xff] %v218_v11   ;;  %v226_v13 = vld [vmem:[%s4159_s8 + $0x68] sm:$0xff]   ;;  %v230_v14 = vld [vmem:[%s4159_s8 + $0x70] sm:$0xff]  }
  0x2b   : > { %223 = vst [vmem:[%s4164_s29 + $0x60] sm:$0xff] %v222_v12   ;;  %227 = vst [vmem:[%s4164_s29 + $0x68] sm:$0xff] %v226_v13   ;;  %v234_v15 = vld [vmem:[%s4159_s8 + $0x78] sm:$0xff]   ;;  %v238_v16 = vld [vmem:[%s4159_s8 + $0x200] sm:$0xff]  }
  0x2c   : > { %231 = vst [vmem:[%s4164_s29 + $0x70] sm:$0xff] %v230_v14   ;;  %v242_v17 = vld [vmem:[%s4159_s8 + $0x208] sm:$0xff]   ;;  %235 = vst [vmem:[%s4164_s29 + $0x78] sm:$0xff] %v234_v15   ;;  %v246_v18 = vld [vmem:[%s4159_s8 + $0x210] sm:$0xff]  }
  0x2d   : > { %239 = vst [vmem:[%s4164_s29 + $0x80] sm:$0xff] %v238_v16   ;;  %243 = vst [vmem:[%s4164_s29 + $0x88] sm:$0xff] %v242_v17   ;;  %v250_v19 = vld [vmem:[%s4159_s8 + $0x218] sm:$0xff]   ;;  %v254_v20 = vld [vmem:[%s4159_s8 + $0x220] sm:$0xff]  }
  0x2e   : > { %247 = vst [vmem:[%s4164_s29 + $0x90] sm:$0xff] %v246_v18   ;;  %251 = vst [vmem:[%s4164_s29 + $0x98] sm:$0xff] %v250_v19   ;;  %v258_v21 = vld [vmem:[%s4159_s8 + $0x228] sm:$0xff]   ;;  %v262_v22 = vld [vmem:[%s4159_s8 + $0x230] sm:$0xff]  }
  0x2f   : > { %255 = vst [vmem:[%s4164_s29 + $0xa0] sm:$0xff] %v254_v20   ;;  %v266_v23 = vld [vmem:[%s4159_s8 + $0x238] sm:$0xff]   ;;  %259 = vst [vmem:[%s4164_s29 + $0xa8] sm:$0xff] %v258_v21   ;;  %v270_v24 = vld [vmem:[%s4159_s8 + $0x240] sm:$0xff]  }
  0x30   : > { %263 = vst [vmem:[%s4164_s29 + $0xb0] sm:$0xff] %v262_v22   ;;  %267 = vst [vmem:[%s4164_s29 + $0xb8] sm:$0xff] %v266_v23   ;;  %v274_v25 = vld [vmem:[%s4159_s8 + $0x248] sm:$0xff]   ;;  %v278_v26 = vld [vmem:[%s4159_s8 + $0x250] sm:$0xff]  }
  0x31   : > { %271 = vst [vmem:[%s4164_s29 + $0xc0] sm:$0xff] %v270_v24   ;;  %275 = vst [vmem:[%s4164_s29 + $0xc8] sm:$0xff] %v274_v25   ;;  %v282_v27 = vld [vmem:[%s4159_s8 + $0x258] sm:$0xff]   ;;  %v286_v28 = vld [vmem:[%s4159_s8 + $0x260] sm:$0xff]  }
  0x32   : > { %279 = vst [vmem:[%s4164_s29 + $0xd0] sm:$0xff] %v278_v26   ;;  %v290_v29 = vld [vmem:[%s4159_s8 + $0x268] sm:$0xff]   ;;  %283 = vst [vmem:[%s4164_s29 + $0xd8] sm:$0xff] %v282_v27   ;;  %v294_v30 = vld [vmem:[%s4159_s8 + $0x270] sm:$0xff]  }
  0x33   : > { %287 = vst [vmem:[%s4164_s29 + $0xe0] sm:$0xff] %v286_v28   ;;  %291 = vst [vmem:[%s4164_s29 + $0xe8] sm:$0xff] %v290_v29   ;;  %v298_v31 = vld [vmem:[%s4159_s8 + $0x278] sm:$0xff]   ;;  %v302_v32 = vld [vmem:[%s4159_s8 + $0x400] sm:$0xff]  }
  0x34   : > { %295 = vst [vmem:[%s4164_s29 + $0xf0] sm:$0xff] %v294_v30   ;;  %299 = vst [vmem:[%s4164_s29 + $0xf8] sm:$0xff] %v298_v31   ;;  %v306_v33 = vld [vmem:[%s4159_s8 + $0x408] sm:$0xff]   ;;  %v310_v34 = vld [vmem:[%s4159_s8 + $0x410] sm:$0xff]  }
  0x35   : > { %303 = vst [vmem:[%s4164_s29 + $0x100] sm:$0xff] %v302_v32   ;;  %v314_v35 = vld [vmem:[%s4159_s8 + $0x418] sm:$0xff]   ;;  %307 = vst [vmem:[%s4164_s29 + $0x108] sm:$0xff] %v306_v33   ;;  %v318_v36 = vld [vmem:[%s4159_s8 + $0x420] sm:$0xff]  }
  0x36   : > { %311 = vst [vmem:[%s4164_s29 + $0x110] sm:$0xff] %v310_v34   ;;  %315 = vst [vmem:[%s4164_s29 + $0x118] sm:$0xff] %v314_v35   ;;  %v322_v37 = vld [vmem:[%s4159_s8 + $0x428] sm:$0xff]   ;;  %v326_v38 = vld [vmem:[%s4159_s8 + $0x430] sm:$0xff]  }
  0x37   : > { %319 = vst [vmem:[%s4164_s29 + $0x120] sm:$0xff] %v318_v36   ;;  %323 = vst [vmem:[%s4164_s29 + $0x128] sm:$0xff] %v322_v37   ;;  %v330_v39 = vld [vmem:[%s4159_s8 + $0x438] sm:$0xff]   ;;  %v334_v40 = vld [vmem:[%s4159_s8 + $0x440] sm:$0xff]  }
  0x38   : > { %327 = vst [vmem:[%s4164_s29 + $0x130] sm:$0xff] %v326_v38   ;;  %v338_v41 = vld [vmem:[%s4159_s8 + $0x448] sm:$0xff]   ;;  %331 = vst [vmem:[%s4164_s29 + $0x138] sm:$0xff] %v330_v39   ;;  %v342_v42 = vld [vmem:[%s4159_s8 + $0x450] sm:$0xff]  }
  0x39   : > { %335 = vst [vmem:[%s4164_s29 + $0x140] sm:$0xff] %v334_v40   ;;  %339 = vst [vmem:[%s4164_s29 + $0x148] sm:$0xff] %v338_v41   ;;  %v346_v43 = vld [vmem:[%s4159_s8 + $0x458] sm:$0xff]   ;;  %v350_v44 = vld [vmem:[%s4159_s8 + $0x460] sm:$0xff]  }
  0x3a   : > { %343 = vst [vmem:[%s4164_s29 + $0x150] sm:$0xff] %v342_v42   ;;  %347 = vst [vmem:[%s4164_s29 + $0x158] sm:$0xff] %v346_v43   ;;  %v354_v45 = vld [vmem:[%s4159_s8 + $0x468] sm:$0xff]   ;;  %v358_v46 = vld [vmem:[%s4159_s8 + $0x470] sm:$0xff]  }
  0x3b   : > { %351 = vst [vmem:[%s4164_s29 + $0x160] sm:$0xff] %v350_v44   ;;  %v362_v47 = vld [vmem:[%s4159_s8 + $0x478] sm:$0xff]   ;;  %355 = vst [vmem:[%s4164_s29 + $0x168] sm:$0xff] %v354_v45   ;;  %v366_v48 = vld [vmem:[%s4159_s8 + $0x600] sm:$0xff]  }
  0x3c   : > { %359 = vst [vmem:[%s4164_s29 + $0x170] sm:$0xff] %v358_v46   ;;  %363 = vst [vmem:[%s4164_s29 + $0x178] sm:$0xff] %v362_v47   ;;  %v370_v49 = vld [vmem:[%s4159_s8 + $0x608] sm:$0xff]   ;;  %v374_v50 = vld [vmem:[%s4159_s8 + $0x610] sm:$0xff]  }
  0x3d   : > { %367 = vst [vmem:[%s4164_s29 + $0x180] sm:$0xff] %v366_v48   ;;  %371 = vst [vmem:[%s4164_s29 + $0x188] sm:$0xff] %v370_v49   ;;  %v378_v51 = vld [vmem:[%s4159_s8 + $0x618] sm:$0xff]   ;;  %v382_v52 = vld [vmem:[%s4159_s8 + $0x620] sm:$0xff]  }
  0x3e   : > { %375 = vst [vmem:[%s4164_s29 + $0x190] sm:$0xff] %v374_v50   ;;  %v386_v53 = vld [vmem:[%s4159_s8 + $0x628] sm:$0xff]   ;;  %379 = vst [vmem:[%s4164_s29 + $0x198] sm:$0xff] %v378_v51   ;;  %v390_v54 = vld [vmem:[%s4159_s8 + $0x630] sm:$0xff]  }
  0x3f   : > { %383 = vst [vmem:[%s4164_s29 + $0x1a0] sm:$0xff] %v382_v52   ;;  %387 = vst [vmem:[%s4164_s29 + $0x1a8] sm:$0xff] %v386_v53   ;;  %v394_v55 = vld [vmem:[%s4159_s8 + $0x638] sm:$0xff]   ;;  %v398_v56 = vld [vmem:[%s4159_s8 + $0x640] sm:$0xff]  }
  0x40   : > { %391 = vst [vmem:[%s4164_s29 + $0x1b0] sm:$0xff] %v390_v54   ;;  %395 = vst [vmem:[%s4164_s29 + $0x1b8] sm:$0xff] %v394_v55   ;;  %v402_v57 = vld [vmem:[%s4159_s8 + $0x648] sm:$0xff]   ;;  %v406_v58 = vld [vmem:[%s4159_s8 + $0x650] sm:$0xff]  }
  0x41   : > { %399 = vst [vmem:[%s4164_s29 + $0x1c0] sm:$0xff] %v398_v56   ;;  %v410_v59 = vld [vmem:[%s4159_s8 + $0x658] sm:$0xff]   ;;  %403 = vst [vmem:[%s4164_s29 + $0x1c8] sm:$0xff] %v402_v57   ;;  %v414_v60 = vld [vmem:[%s4159_s8 + $0x660] sm:$0xff]  }
  0x42   : > { %407 = vst [vmem:[%s4164_s29 + $0x1d0] sm:$0xff] %v406_v58   ;;  %411 = vst [vmem:[%s4164_s29 + $0x1d8] sm:$0xff] %v410_v59   ;;  %v418_v61 = vld [vmem:[%s4159_s8 + $0x668] sm:$0xff]   ;;  %v422_v62 = vld [vmem:[%s4159_s8 + $0x670] sm:$0xff]  }
  0x43   : > { %415 = vst [vmem:[%s4164_s29 + $0x1e0] sm:$0xff] %v414_v60   ;;  %419 = vst [vmem:[%s4164_s29 + $0x1e8] sm:$0xff] %v418_v61   ;;  %v426_v63 = vld [vmem:[%s4159_s8 + $0x678] sm:$0xff]  }
  0x44   : > { %423 = vst [vmem:[%s4164_s29 + $0x1f0] sm:$0xff] %v422_v62   ;;  %427 = vst [vmem:[%s4164_s29 + $0x1f8] sm:$0xff] %v426_v63  }
  0x45 PF: > { %708 = sbr.rel (!%p4128_p7) target bundleno = 105 (0x69), region = 61  ;;  %s710_s9 = sand.u32 (%p4128_p7), 1, %s3986_s16  }
  0x46   : > { %s3427_s28 = sshll.u32 (%p4128_p7), %s4006_s21, 3  ;;  %s3139_s24 = sshll.u32 (%p4128_p7), %s710_s9, 9 }
  0x47   : > { %s4298_s6 = scalar_lea.vmem (%p4128_p7), %s4852_s1, %s3427_s28  ;;  %s4303_s7 = scalar_lea.vmem (%p4128_p7), [#allocation3], %s3139_s24 }
  0x48   : > { %v869_v0 = vld [vmem:[%s4298_s6] sm:$0xff] (%p4128_p7)  ;;  %v871_v1 = vld [vmem:[%s4298_s6 + $0x10] sm:$0xff] (%p4128_p7) }
  0x49   : > { %v873_v2 = vld [vmem:[%s4298_s6 + $0x20] sm:$0xff] (%p4128_p7)  ;;  %870 = vst [vmem:[%s4303_s7] sm:$0xff] (%p4128_p7), %v869_v0  ;;  %872 = vst [vmem:[%s4303_s7 + $0x8] sm:$0xff] (%p4128_p7), %v871_v1  ;;  %v875_v3 = vld [vmem:[%s4298_s6 + $0x30] sm:$0xff] (%p4128_p7) }
  0x4a   : > { %874 = vst [vmem:[%s4303_s7 + $0x10] sm:$0xff] (%p4128_p7), %v873_v2  ;;  %v877_v4 = vld [vmem:[%s4298_s6 + $0x40] sm:$0xff] (%p4128_p7)  ;;  %v879_v5 = vld [vmem:[%s4298_s6 + $0x50] sm:$0xff] (%p4128_p7)  ;;  %876 = vst [vmem:[%s4303_s7 + $0x18] sm:$0xff] (%p4128_p7), %v875_v3 }
  0x4b   : > { %878 = vst [vmem:[%s4303_s7 + $0x20] sm:$0xff] (%p4128_p7), %v877_v4  ;;  %880 = vst [vmem:[%s4303_s7 + $0x28] sm:$0xff] (%p4128_p7), %v879_v5  ;;  %v881_v6 = vld [vmem:[%s4298_s6 + $0x60] sm:$0xff] (%p4128_p7)  ;;  %v883_v7 = vld [vmem:[%s4298_s6 + $0x70] sm:$0xff] (%p4128_p7) }
  0x4c   : > { %v885_v8 = vld [vmem:[%s4298_s6 + $0x80] sm:$0xff]  ;;  %882 = vst [vmem:[%s4303_s7 + $0x30] sm:$0xff] %v881_v6  ;;  %884 = vst [vmem:[%s4303_s7 + $0x38] sm:$0xff] %v883_v7  ;;  %v887_v9 = vld [vmem:[%s4298_s6 + $0x90] sm:$0xff] }
  0x4d   : > { %886 = vst [vmem:[%s4303_s7 + $0x40] sm:$0xff] %v885_v8  ;;  %v889_v10 = vld [vmem:[%s4298_s6 + $0xa0] sm:$0xff]  ;;  %v891_v11 = vld [vmem:[%s4298_s6 + $0xb0] sm:$0xff]  ;;  %888 = vst [vmem:[%s4303_s7 + $0x48] sm:$0xff] %v887_v9 }
  0x4e   : > { %890 = vst [vmem:[%s4303_s7 + $0x50] sm:$0xff] %v889_v10  ;;  %892 = vst [vmem:[%s4303_s7 + $0x58] sm:$0xff] %v891_v11  ;;  %v893_v12 = vld [vmem:[%s4298_s6 + $0xc0] sm:$0xff]  ;;  %v895_v13 = vld [vmem:[%s4298_s6 + $0xd0] sm:$0xff] }
  0x4f   : > { %v897_v14 = vld [vmem:[%s4298_s6 + $0xe0] sm:$0xff]  ;;  %894 = vst [vmem:[%s4303_s7 + $0x60] sm:$0xff] %v893_v12  ;;  %896 = vst [vmem:[%s4303_s7 + $0x68] sm:$0xff] %v895_v13  ;;  %v899_v15 = vld [vmem:[%s4298_s6 + $0xf0] sm:$0xff] }
  0x50   : > { %898 = vst [vmem:[%s4303_s7 + $0x70] sm:$0xff] %v897_v14  ;;  %v901_v16 = vld [vmem:[%s4298_s6 + $0x100] sm:$0xff]  ;;  %v903_v17 = vld [vmem:[%s4298_s6 + $0x110] sm:$0xff]  ;;  %900 = vst [vmem:[%s4303_s7 + $0x78] sm:$0xff] %v899_v15 }
  0x51   : > { %902 = vst [vmem:[%s4303_s7 + $0x80] sm:$0xff] %v901_v16  ;;  %904 = vst [vmem:[%s4303_s7 + $0x88] sm:$0xff] %v903_v17  ;;  %v905_v18 = vld [vmem:[%s4298_s6 + $0x120] sm:$0xff]  ;;  %v907_v19 = vld [vmem:[%s4298_s6 + $0x130] sm:$0xff] }
  0x52   : > { %v909_v20 = vld [vmem:[%s4298_s6 + $0x140] sm:$0xff]  ;;  %906 = vst [vmem:[%s4303_s7 + $0x90] sm:$0xff] %v905_v18  ;;  %908 = vst [vmem:[%s4303_s7 + $0x98] sm:$0xff] %v907_v19  ;;  %v911_v21 = vld [vmem:[%s4298_s6 + $0x150] sm:$0xff] }
  0x53   : > { %910 = vst [vmem:[%s4303_s7 + $0xa0] sm:$0xff] %v909_v20  ;;  %v913_v22 = vld [vmem:[%s4298_s6 + $0x160] sm:$0xff]  ;;  %v915_v23 = vld [vmem:[%s4298_s6 + $0x170] sm:$0xff]  ;;  %912 = vst [vmem:[%s4303_s7 + $0xa8] sm:$0xff] %v911_v21 }
  0x54   : > { %914 = vst [vmem:[%s4303_s7 + $0xb0] sm:$0xff] %v913_v22  ;;  %916 = vst [vmem:[%s4303_s7 + $0xb8] sm:$0xff] %v915_v23  ;;  %v917_v24 = vld [vmem:[%s4298_s6 + $0x180] sm:$0xff]  ;;  %v919_v25 = vld [vmem:[%s4298_s6 + $0x190] sm:$0xff] }
  0x55   : > { %v921_v26 = vld [vmem:[%s4298_s6 + $0x1a0] sm:$0xff]  ;;  %918 = vst [vmem:[%s4303_s7 + $0xc0] sm:$0xff] %v917_v24  ;;  %920 = vst [vmem:[%s4303_s7 + $0xc8] sm:$0xff] %v919_v25  ;;  %v923_v27 = vld [vmem:[%s4298_s6 + $0x1b0] sm:$0xff] }
  0x56   : > { %922 = vst [vmem:[%s4303_s7 + $0xd0] sm:$0xff] %v921_v26  ;;  %v925_v28 = vld [vmem:[%s4298_s6 + $0x1c0] sm:$0xff]  ;;  %v927_v29 = vld [vmem:[%s4298_s6 + $0x1d0] sm:$0xff]  ;;  %924 = vst [vmem:[%s4303_s7 + $0xd8] sm:$0xff] %v923_v27 }
  0x57   : > { %926 = vst [vmem:[%s4303_s7 + $0xe0] sm:$0xff] %v925_v28  ;;  %928 = vst [vmem:[%s4303_s7 + $0xe8] sm:$0xff] %v927_v29  ;;  %v929_v30 = vld [vmem:[%s4298_s6 + $0x1e0] sm:$0xff]  ;;  %v931_v31 = vld [vmem:[%s4298_s6 + $0x1f0] sm:$0xff] }
  0x58   : > { %v933_v32 = vld [vmem:[%s4298_s6 + $0x200] sm:$0xff]  ;;  %930 = vst [vmem:[%s4303_s7 + $0xf0] sm:$0xff] %v929_v30  ;;  %932 = vst [vmem:[%s4303_s7 + $0xf8] sm:$0xff] %v931_v31  ;;  %v935_v33 = vld [vmem:[%s4298_s6 + $0x210] sm:$0xff] }
  0x59   : > { %934 = vst [vmem:[%s4303_s7 + $0x100] sm:$0xff] %v933_v32  ;;  %v937_v34 = vld [vmem:[%s4298_s6 + $0x220] sm:$0xff]  ;;  %v939_v35 = vld [vmem:[%s4298_s6 + $0x230] sm:$0xff]  ;;  %936 = vst [vmem:[%s4303_s7 + $0x108] sm:$0xff] %v935_v33 }
  0x5a   : > { %938 = vst [vmem:[%s4303_s7 + $0x110] sm:$0xff] %v937_v34  ;;  %940 = vst [vmem:[%s4303_s7 + $0x118] sm:$0xff] %v939_v35  ;;  %v941_v36 = vld [vmem:[%s4298_s6 + $0x240] sm:$0xff]  ;;  %v943_v37 = vld [vmem:[%s4298_s6 + $0x250] sm:$0xff] }
  0x5b   : > { %v945_v38 = vld [vmem:[%s4298_s6 + $0x260] sm:$0xff]  ;;  %942 = vst [vmem:[%s4303_s7 + $0x120] sm:$0xff] %v941_v36  ;;  %944 = vst [vmem:[%s4303_s7 + $0x128] sm:$0xff] %v943_v37  ;;  %v947_v39 = vld [vmem:[%s4298_s6 + $0x270] sm:$0xff] }
  0x5c   : > { %946 = vst [vmem:[%s4303_s7 + $0x130] sm:$0xff] %v945_v38  ;;  %v949_v40 = vld [vmem:[%s4298_s6 + $0x280] sm:$0xff]  ;;  %v951_v41 = vld [vmem:[%s4298_s6 + $0x290] sm:$0xff]  ;;  %948 = vst [vmem:[%s4303_s7 + $0x138] sm:$0xff] %v947_v39 }
  0x5d   : > { %950 = vst [vmem:[%s4303_s7 + $0x140] sm:$0xff] %v949_v40  ;;  %952 = vst [vmem:[%s4303_s7 + $0x148] sm:$0xff] %v951_v41  ;;  %v953_v42 = vld [vmem:[%s4298_s6 + $0x2a0] sm:$0xff]  ;;  %v955_v43 = vld [vmem:[%s4298_s6 + $0x2b0] sm:$0xff] }
  0x5e   : > { %v957_v44 = vld [vmem:[%s4298_s6 + $0x2c0] sm:$0xff]  ;;  %954 = vst [vmem:[%s4303_s7 + $0x150] sm:$0xff] %v953_v42  ;;  %956 = vst [vmem:[%s4303_s7 + $0x158] sm:$0xff] %v955_v43  ;;  %v959_v45 = vld [vmem:[%s4298_s6 + $0x2d0] sm:$0xff] }
  0x5f   : > { %958 = vst [vmem:[%s4303_s7 + $0x160] sm:$0xff] %v957_v44  ;;  %v961_v46 = vld [vmem:[%s4298_s6 + $0x2e0] sm:$0xff]  ;;  %v963_v47 = vld [vmem:[%s4298_s6 + $0x2f0] sm:$0xff]  ;;  %960 = vst [vmem:[%s4303_s7 + $0x168] sm:$0xff] %v959_v45 }
  0x60   : > { %962 = vst [vmem:[%s4303_s7 + $0x170] sm:$0xff] %v961_v46  ;;  %964 = vst [vmem:[%s4303_s7 + $0x178] sm:$0xff] %v963_v47  ;;  %v965_v48 = vld [vmem:[%s4298_s6 + $0x300] sm:$0xff]  ;;  %v967_v49 = vld [vmem:[%s4298_s6 + $0x310] sm:$0xff] }
  0x61   : > { %v969_v50 = vld [vmem:[%s4298_s6 + $0x320] sm:$0xff]  ;;  %966 = vst [vmem:[%s4303_s7 + $0x180] sm:$0xff] %v965_v48  ;;  %968 = vst [vmem:[%s4303_s7 + $0x188] sm:$0xff] %v967_v49  ;;  %v971_v51 = vld [vmem:[%s4298_s6 + $0x330] sm:$0xff] }
  0x62   : > { %970 = vst [vmem:[%s4303_s7 + $0x190] sm:$0xff] %v969_v50  ;;  %v973_v52 = vld [vmem:[%s4298_s6 + $0x340] sm:$0xff]  ;;  %v975_v53 = vld [vmem:[%s4298_s6 + $0x350] sm:$0xff]  ;;  %972 = vst [vmem:[%s4303_s7 + $0x198] sm:$0xff] %v971_v51 }
  0x63   : > { %974 = vst [vmem:[%s4303_s7 + $0x1a0] sm:$0xff] %v973_v52  ;;  %976 = vst [vmem:[%s4303_s7 + $0x1a8] sm:$0xff] %v975_v53  ;;  %v977_v54 = vld [vmem:[%s4298_s6 + $0x360] sm:$0xff]  ;;  %v979_v55 = vld [vmem:[%s4298_s6 + $0x370] sm:$0xff] }
  0x64   : > { %v981_v56 = vld [vmem:[%s4298_s6 + $0x380] sm:$0xff]  ;;  %978 = vst [vmem:[%s4303_s7 + $0x1b0] sm:$0xff] %v977_v54  ;;  %980 = vst [vmem:[%s4303_s7 + $0x1b8] sm:$0xff] %v979_v55  ;;  %v983_v57 = vld [vmem:[%s4298_s6 + $0x390] sm:$0xff] }
  0x65   : > { %982 = vst [vmem:[%s4303_s7 + $0x1c0] sm:$0xff] %v981_v56  ;;  %v985_v58 = vld [vmem:[%s4298_s6 + $0x3a0] sm:$0xff]  ;;  %v987_v59 = vld [vmem:[%s4298_s6 + $0x3b0] sm:$0xff]  ;;  %984 = vst [vmem:[%s4303_s7 + $0x1c8] sm:$0xff] %v983_v57 }
  0x66   : > { %986 = vst [vmem:[%s4303_s7 + $0x1d0] sm:$0xff] %v985_v58  ;;  %988 = vst [vmem:[%s4303_s7 + $0x1d8] sm:$0xff] %v987_v59  ;;  %v989_v60 = vld [vmem:[%s4298_s6 + $0x3c0] sm:$0xff]  ;;  %v991_v61 = vld [vmem:[%s4298_s6 + $0x3d0] sm:$0xff] }
  0x67   : > { %v993_v62 = vld [vmem:[%s4298_s6 + $0x3e0] sm:$0xff]  ;;  %990 = vst [vmem:[%s4303_s7 + $0x1e0] sm:$0xff] %v989_v60  ;;  %992 = vst [vmem:[%s4303_s7 + $0x1e8] sm:$0xff] %v991_v61  ;;  %v995_v63 = vld [vmem:[%s4298_s6 + $0x3f0] sm:$0xff] }
  0x68   : > { %994 = vst [vmem:[%s4303_s7 + $0x1f0] sm:$0xff] %v993_v62  ;;  %996 = vst [vmem:[%s4303_s7 + $0x1f8] sm:$0xff] %v995_v63 }
  0x69 PF: > { %p3142_p3 = scmp.ge.s32.totalorder %s4014_s23, 1  ;;  %p1009_p4 = scmp.lt.s32.totalorder %s4014_s23, 9 }
  0x6b   : > { %p1010_p5 = pnand %p3142_p3, %p1009_p4 }
  0x6c   : > { %s1023_s8 = sand.u32 (!%p1010_p5), 1, %s3982_s15   ;;  %v4016_v0 = vmov (!%p1010_p5), 0   ;;  %s1016_s15 = sand.u32 (!%p1010_p5), 1, %s3990_s17  }
  0x6d   : > { %1013 = sbr.rel (%p1010_p5) target bundleno = 628 (0x274), region = 103  ;;  %s3144_s29 = sshll.u32 (!%p1010_p5), %s1023_s8, 9  ;;  %1370 = vmatprep.mubr.bf16.mxu1 (!%p1010_p5), %v4016_v0  ;;  %2158 = vmatprep.mubr.bf16.mxu0 (!%p1010_p5), %v4016_v0 }
  0x6e   : > { %s4435_s9 = scalar_lea.vmem (!%p1010_p5), [#allocation3], %s3144_s29  ;;  %s3143_s28 = sshll.u32 (!%p1010_p5), %s1016_s15, 9 }
  0x6f   : > { %v3728_v1 = vld [vmem:[%s4435_s9 + $0x84] ss:$8 sps:$4 sm:$0xff] (!%p1010_p5)   ;;  %v3732_v3 = vld [vmem:[%s4435_s9 + $0x80] ss:$8 sps:$4 sm:$0xff] (!%p1010_p5)   ;;  %v3734_v5 = vld [vmem:[%s4435_s9 + $0x94] ss:$8 sps:$4 sm:$0xff] (!%p1010_p5)  }
  0x70   : > { %v3730_v2 = vld [vmem:[%s4435_s9 + $0x104] ss:$8 sps:$4 sm:$0xff] (!%p1010_p5)   ;;  %1338 = vmatprep.subr.bf16.mxu1 (!%p1010_p5), %v3728_v1  ;;  %v3733_v4 = vld [vmem:[%s4435_s9 + $0x100] ss:$8 sps:$4 sm:$0xff] (!%p1010_p5)   ;;  %v3736_v6 = vld [vmem:[%s4435_s9 + $0x114] ss:$8 sps:$4 sm:$0xff] (!%p1010_p5)  }
  0x71   : > { %2126 = vmatprep.subr.bf16.mxu0 (!%p1010_p5), %v3730_v2  ;;  %1339 = vmatpush1.bf16.msra.mxu1 (!%p1010_p5), %v3732_v3  ;;  %v3738_v7 = vld [vmem:[%s4435_s9 + $0x90] ss:$8 sps:$4 sm:$0xff] (!%p1010_p5)   ;;  %v3740_v9 = vld [vmem:[%s4435_s9 + $0xa4] ss:$8 sps:$4 sm:$0xff] (!%p1010_p5)   ;;  %v3744_v11 = vld [vmem:[%s4435_s9 + $0xa0] ss:$8 sps:$4 sm:$0xff] (!%p1010_p5)  }
  0x72   : > { %2127 = vmatpush1.bf16.msra.mxu0 (!%p1010_p5), %v3733_v4  ;;  %1340 = vmatprep.subr.bf16.mxu1 (!%p1010_p5), %v3734_v5  ;;  %v3739_v8 = vld [vmem:[%s4435_s9 + $0x110] ss:$8 sps:$4 sm:$0xff] (!%p1010_p5)   ;;  %v3742_v10 = vld [vmem:[%s4435_s9 + $0x124] ss:$8 sps:$4 sm:$0xff] (!%p1010_p5)   ;;  %v3745_v12 = vld [vmem:[%s4435_s9 + $0x120] ss:$8 sps:$4 sm:$0xff] (!%p1010_p5)  }
  0x73   : > { %2128 = vmatprep.subr.bf16.mxu0 (!%p1010_p5), %v3736_v6  ;;  %v3746_v13 = vld [vmem:[%s4435_s9 + $0xb4] ss:$8 sps:$4 sm:$0xff] (!%p1010_p5)   ;;  %v3750_v15 = vld [vmem:[%s4435_s9 + $0xb0] ss:$8 sps:$4 sm:$0xff] (!%p1010_p5)   ;;  %v3752_v17 = vld [vmem:[%s4435_s9 + $0xc4] ss:$8 sps:$4 sm:$0xff] (!%p1010_p5)  }
  0x74   : > { %v3748_v14 = vld [vmem:[%s4435_s9 + $0x134] ss:$8 sps:$4 sm:$0xff]   ;;  %v3751_v16 = vld [vmem:[%s4435_s9 + $0x130] ss:$8 sps:$4 sm:$0xff]   ;;  %v3754_v18 = vld [vmem:[%s4435_s9 + $0x144] ss:$8 sps:$4 sm:$0xff]  }
  0x75   : > { %1341 = vmatpush1.bf16.msra.mxu1 %v3738_v7  ;;  %v3756_v19 = vld [vmem:[%s4435_s9 + $0xc0] ss:$8 sps:$4 sm:$0xff]   ;;  %v3758_v21 = vld [vmem:[%s4435_s9 + $0xd4] ss:$8 sps:$4 sm:$0xff]   ;;  %v3762_v23 = vld [vmem:[%s4435_s9 + $0xd0] ss:$8 sps:$4 sm:$0xff]  }
  0x76   : > { %2129 = vmatpush1.bf16.msra.mxu0 %v3739_v8  ;;  %1342 = vmatprep.subr.bf16.mxu1 %v3740_v9  ;;  %v3757_v20 = vld [vmem:[%s4435_s9 + $0x140] ss:$8 sps:$4 sm:$0xff]   ;;  %v3760_v22 = vld [vmem:[%s4435_s9 + $0x154] ss:$8 sps:$4 sm:$0xff]   ;;  %v3763_v24 = vld [vmem:[%s4435_s9 + $0x150] ss:$8 sps:$4 sm:$0xff]  }
  0x77   : > { %2130 = vmatprep.subr.bf16.mxu0 %v3742_v10  ;;  %v3764_v25 = vld [vmem:[%s4435_s9 + $0xe4] ss:$8 sps:$4 sm:$0xff]   ;;  %s4464_s17 = scalar_lea.vmem [#allocation2], %s3143_s28  ;;  %v3768_v27 = vld [vmem:[%s4435_s9 + $0xe0] ss:$8 sps:$4 sm:$0xff]   ;;  %s4631_s24 = sshll.u32 %s3998_s19, 1 }
  0x78   : > { %v3766_v26 = vld [vmem:[%s4435_s9 + $0x164] ss:$8 sps:$4 sm:$0xff]   ;;  %v3769_v28 = vld [vmem:[%s4435_s9 + $0x160] ss:$8 sps:$4 sm:$0xff]   ;;  %v3770_v29 = vld [vmem:[%s4435_s9 + $0xf4] ss:$8 sps:$4 sm:$0xff]  }
  0x79   : > { %1343 = vmatpush1.bf16.msra.mxu1 %v3744_v11  ;;  %v3772_v30 = vld [vmem:[%s4435_s9 + $0x174] ss:$8 sps:$4 sm:$0xff]   ;;  %v3774_v31 = vld [vmem:[%s4435_s9 + $0xf0] ss:$8 sps:$4 sm:$0xff]   ;;  %v3779_v33 = vld [vmem:[%s4435_s9 + $0x4] ss:$8 sps:$4 sm:$0xff]  }
  0x7a   : > { %2131 = vmatpush1.bf16.msra.mxu0 %v3745_v12  ;;  %1344 = vmatprep.subr.bf16.mxu1 %v3746_v13  ;;  %v3775_v32 = vld [vmem:[%s4435_s9 + $0x170] ss:$8 sps:$4 sm:$0xff]   ;;  %v3783_v34 = vld [vmem:[%s4435_s9 + $0x184] ss:$8 sps:$4 sm:$0xff]   ;;  %v3777_v37 = vld [vmem:[%s4435_s9] ss:$8 sps:$4 sm:$0xff]  }
  0x7b   : > { %2132 = vmatprep.subr.bf16.mxu0 %v3748_v14  ;;  %v3776_v35 = vld [vmem:[%s4464_s17 + $0x80] sm:$0xff]   ;;  %v3789_v39 = vld [vmem:[%s4435_s9 + $0x14] ss:$8 sps:$4 sm:$0xff]   ;;  %v3787_v41 = vld [vmem:[%s4435_s9 + $0x10] ss:$8 sps:$4 sm:$0xff]   ;;  %p1057_p6 = scmp.lt.s32.totalorder %s4631_s24, 3 }
  0x7c   : > { %v3780_v36 = vld [vmem:[%s4464_s17 + $0x100] sm:$0xff]   ;;  %v3793_v40 = vld [vmem:[%s4435_s9 + $0x194] ss:$8 sps:$4 sm:$0xff]   ;;  %v3791_v42 = vld [vmem:[%s4435_s9 + $0x190] ss:$8 sps:$4 sm:$0xff]   ;;  %s1051_s8 = sand.u32 1, %s3974_s13  }
  0x7d   : > { %1345 = vmatpush1.bf16.msra.mxu1 %v3750_v15  ;;  %v3781_v38 = vld [vmem:[%s4435_s9 + $0x180] ss:$8 sps:$4 sm:$0xff]   ;;  %v3799_v44 = vld [vmem:[%s4435_s9 + $0x24] ss:$8 sps:$4 sm:$0xff]   ;;  %v3809_v49 = vld [vmem:[%s4435_s9 + $0x34] ss:$8 sps:$4 sm:$0xff]  }
  0x7e   : > { %2133 = vmatpush1.bf16.msra.mxu0 %v3751_v16  ;;  %1346 = vmatprep.subr.bf16.mxu1 %v3752_v17  ;;  %v3784_v43 = vld [vmem:[%s4464_s17 + $0x88] sm:$0xff]   ;;  %v3807_v50 = vld [vmem:[%s4435_s9 + $0x30] ss:$8 sps:$4 sm:$0xff]   ;;  %v3813_v52 = vld [vmem:[%s4435_s9 + $0x1b4] ss:$8 sps:$4 sm:$0xff]   ;;  %s1058_s30 = scalar_select %p1057_p6, %s4631_s24, 3 }
  0x7f   : > { %2134 = vmatprep.subr.bf16.mxu0 %v3754_v18  ;;  %v3785_v45 = vld [vmem:[%s4464_s17 + $0x108] sm:$0xff]   ;;  %v3811_v51 = vld [vmem:[%s4435_s9 + $0x1b0] ss:$8 sps:$4 sm:$0xff]   ;;  %v3829_v61 = vld [vmem:[%s4435_s9 + $0x54] ss:$8 sps:$4 sm:$0xff]   ;;  %s3145_s29 = sshll.u32 %s1051_s8, 9 }
  0x80   : > { %v3803_v46 = vld [vmem:[%s4435_s9 + $0x1a4] ss:$8 sps:$4 sm:$0xff]   ;;  %v3797_v47 = vld [vmem:[%s4435_s9 + $0x20] ss:$8 sps:$4 sm:$0xff]   ;;  %v3786_v53 = vld [vmem:[%s4464_s17 + $0x90] sm:$0xff]   ;;  %s1059_s7 = scalar_lea.vmem %s4853_s2, %s1058_s30  ;;  %s4647_s19 = scalar_lea.vmem [#allocation4], %s3145_s29 }
  0x81   : > { %1347 = vmatpush1.bf16.msra.mxu1 %v3756_v19  ;;  %v3801_v48 = vld [vmem:[%s4435_s9 + $0x1a0] ss:$8 sps:$4 sm:$0xff]   ;;  %v3790_v54 = vld [vmem:[%s4464_s17 + $0x110] sm:$0xff]   ;;  %v3819_v56 = vld [vmem:[%s4435_s9 + $0x44] ss:$8 sps:$4 sm:$0xff]   ;;  %s3023_s28 = sshll.u32 %s4647_s19, 4  ;;  %s4779_s28 = int_to_ptr.vmem [resolvable:$true] %s3023_s28 }
  0x82   : > { %2135 = vmatpush1.bf16.msra.mxu0 %v3757_v20  ;;  %1348 = vmatprep.subr.bf16.mxu1 %v3758_v21  ;;  %v3817_v55 = vld [vmem:[%s4435_s9 + $0x40] ss:$8 sps:$4 sm:$0xff]   ;;  %v3823_v58 = vld [vmem:[%s4435_s9 + $0x1c4] ss:$8 sps:$4 sm:$0xff]   ;;  %v3794_v59 = vld [vmem:[%s4464_s17 + $0x98] sm:$0xff]   ;;  %s4787_s25 = scalar_lea.sflag [#allocation5], %s1051_s8 }
  0x83   : > { %2136 = vmatprep.subr.bf16.mxu0 %v3760_v22  ;;  %v3821_v57 = vld [vmem:[%s4435_s9 + $0x1c0] ss:$8 sps:$4 sm:$0xff]   ;;  %v3795_v60 = vld [vmem:[%s4464_s17 + $0x118] sm:$0xff]   ;;  %v3839_v5 = vld [vmem:[%s4435_s9 + $0x64] ss:$8 sps:$4 sm:$0xff]   ;;  %s3888_s6 = scalar_lea.vmem %s4779_s28, 8192 }
  0x84   : > { %v3827_v62 = vld [vmem:[%s4435_s9 + $0x50] ss:$8 sps:$4 sm:$0xff]   ;;  %v3833_v1 = vld [vmem:[%s4435_s9 + $0x1d4] ss:$8 sps:$4 sm:$0xff]   ;;  %v3796_v2 = vld [vmem:[%s4464_s17 + $0xa0] sm:$0xff]   ;;  %p3889_p7 = scmp.ne.s32.totalorder %s4779_s28, %s3888_s6 }
  0x85   : > { %1349 = vmatpush1.bf16.msra.mxu1 %v3762_v23  ;;  %v3831_v63 = vld [vmem:[%s4435_s9 + $0x1d0] ss:$8 sps:$4 sm:$0xff]   ;;  %v3800_v3 = vld [vmem:[%s4464_s17 + $0x120] sm:$0xff]   ;;  %v3804_v8 = vld [vmem:[%s4464_s17 + $0xa8] sm:$0xff]  }
  0x86   : > { %2137 = vmatpush1.bf16.msra.mxu0 %v3763_v24  ;;  %1350 = vmatprep.subr.bf16.mxu1 %v3764_v25  ;;  %v3837_v4 = vld [vmem:[%s4435_s9 + $0x60] ss:$8 sps:$4 sm:$0xff]   ;;  %v3843_v6 = vld [vmem:[%s4435_s9 + $0x1e4] ss:$8 sps:$4 sm:$0xff]   ;;  %v3847_v9 = vld [vmem:[%s4435_s9 + $0x70] ss:$8 sps:$4 sm:$0xff]   ;;  %p3890_p8 = pnand %p3889_p7, %p4143_p0 }
  0x87   : > { %2138 = vmatprep.subr.bf16.mxu0 %v3766_v26  ;;  %v3841_v7 = vld [vmem:[%s4435_s9 + $0x1e0] ss:$8 sps:$4 sm:$0xff]   ;;  %v3849_v10 = vld [vmem:[%s4435_s9 + $0x74] ss:$8 sps:$4 sm:$0xff]   ;;  %v3851_v13 = vld [vmem:[%s4435_s9 + $0x1f0] ss:$8 sps:$4 sm:$0xff]  }
  0x88   : > { %v3805_v11 = vld [vmem:[%s4464_s17 + $0x128] sm:$0xff]   ;;  %v3853_v12 = vld [vmem:[%s4435_s9 + $0x1f4] ss:$8 sps:$4 sm:$0xff]   ;;  %v3816_v18 = vld [vmem:[%s4464_s17 + $0xc0] sm:$0xff]   ;;  %s3428_s9 = sshll.u32 %s4002_s20, 7  ;;  %p3891_p9 = pneg %p3890_p8 }
  0x89   : > { %1351 = vmatpush1.bf16.msra.mxu1 %v3768_v27  ;;  %v3806_v14 = vld [vmem:[%s4464_s17 + $0xb0] sm:$0xff]   ;;  %v3814_v16 = vld [vmem:[%s4464_s17 + $0xb8] sm:$0xff]   ;;  %v3820_v19 = vld [vmem:[%s4464_s17 + $0x140] sm:$0xff]   ;;  %s3020_s15 = sadd.s32 %s3428_s9, %s4631_s24 }
  0x8a   : > { %2139 = vmatpush1.bf16.msra.mxu0 %v3769_v28  ;;  %1352 = vmatprep.subr.bf16.mxu1 %v3770_v29  ;;  %v3810_v15 = vld [vmem:[%s4464_s17 + $0x130] sm:$0xff]   ;;  %v3815_v17 = vld [vmem:[%s4464_s17 + $0x138] sm:$0xff]   ;;  %v3824_v20 = vld [vmem:[%s4464_s17 + $0xc8] sm:$0xff]   ;;  %s3423_s20 = sshll.u32 %s3020_s15, 7 }
  0x8b   : > { %2140 = vmatprep.subr.bf16.mxu0 %v3772_v30  ;;  %v3825_v21 = vld [vmem:[%s4464_s17 + $0x148] sm:$0xff]   ;;  %v3826_v22 = vld [vmem:[%s4464_s17 + $0xd0] sm:$0xff]   ;;  %v3834_v24 = vld [vmem:[%s4464_s17 + $0xd8] sm:$0xff]   ;;  %s4775_s30 = scalar_lea.hbm %s4854_s3, %s3423_s20 }
  0x8c   : > { %v3830_v23 = vld [vmem:[%s4464_s17 + $0x150] sm:$0xff]   ;;  %v3835_v25 = vld [vmem:[%s4464_s17 + $0x158] sm:$0xff]   ;;  %v3836_v26 = vld [vmem:[%s4464_s17 + $0xe0] sm:$0xff]  }
  0x8d   : > { %1353 = vmatpush1.bf16.msra.mxu1 %v3774_v31  ;;  %v3840_v27 = vld [vmem:[%s4464_s17 + $0x160] sm:$0xff]   ;;  %v3844_v28 = vld [vmem:[%s4464_s17 + $0xe8] sm:$0xff]   ;;  %v3846_v30 = vld [vmem:[%s4464_s17 + $0xf0] sm:$0xff]  }
  0x8e   : > { %2141 = vmatpush1.bf16.msra.mxu0 %v3775_v32  ;;  %1707 = vmatprep.subr.bf16.mxu1 %v3779_v33  ;;  %v3845_v29 = vld [vmem:[%s4464_s17 + $0x168] sm:$0xff]   ;;  %v3850_v31 = vld [vmem:[%s4464_s17 + $0x170] sm:$0xff]   ;;  %v3854_v32 = vld [vmem:[%s4464_s17 + $0xf8] sm:$0xff]  }
  0x8f   : > { %2609 = vmatprep.subr.bf16.mxu0 %v3783_v34  ;;  %v3855_v33 = vld [vmem:[%s4464_s17 + $0x178] sm:$0xff]   ;;  %v3856_v34 = vld [vmem:[%s4464_s17] sm:$0xff]  }
  0x90   : > { %1371 = vmatmul.mubr.bf16.vlgmr.msra.gmra.mrb[0].mxu1 %v3776_v35  ;;  %v3857_v35 = vld [vmem:[%s4464_s17 + $0x180] sm:$0xff]  }
  0x91   : > { %2159 = vmatmul.mubr.bf16.vlgmr.msra.gmra.mrb[0].mxu0 %v3780_v36  ;;  %1708 = vmatpush1.bf16.msra.mxu1 %v3777_v37  ;;  %v3858_v36 = vld [vmem:[%s4464_s17 + $0x8] sm:$0xff]  }
  0x92   : > { %2610 = vmatpush1.bf16.msra.mxu0 %v3781_v38  ;;  %1380 = vmatprep.mubr.bf16.mxu1 %v4016_v0  ;;  %v3859_v37 = vld [vmem:[%s4464_s17 + $0x188] sm:$0xff]   ;;  %v3860_v38 = vld [vmem:[%s4464_s17 + $0x10] sm:$0xff]  }
  0x93   : > { %2168 = vmatprep.mubr.bf16.mxu0 %v4016_v0  ;;  %1709 = vmatprep.subr.bf16.mxu1 %v3789_v39  ;;  %v3861_v39 = vld [vmem:[%s4464_s17 + $0x190] sm:$0xff]  }
  0x94   : > { %2611 = vmatprep.subr.bf16.mxu0 %v3793_v40  ;;  %v3862_v40 = vld [vmem:[%s4464_s17 + $0x18] sm:$0xff]  }
  0x95   : > { %1710 = vmatpush1.bf16.msra.mxu1 %v3787_v41  ;;  %v3863_v41 = vld [vmem:[%s4464_s17 + $0x198] sm:$0xff]  }
  0x96   : > { %2612 = vmatpush1.bf16.msra.mxu0 %v3791_v42  ;;  %1711 = vmatprep.subr.bf16.mxu1 %v3799_v44  ;;  %v3864_v42 = vld [vmem:[%s4464_s17 + $0x20] sm:$0xff]   ;;  %v3866_v44 = vld [vmem:[%s4464_s17 + $0x28] sm:$0xff]  }
  0x97   : > { %2613 = vmatprep.subr.bf16.mxu0 %v3803_v46  ;;  %v3868_v46 = vld [vmem:[%s4464_s17 + $0x30] sm:$0xff]  }
  0x98   : > { %1381 = vmatmul.mubr.bf16.gmra.mrb[4].mxu1 %v3784_v43  ;;  %v3865_v43 = vld [vmem:[%s4464_s17 + $0x1a0] sm:$0xff]  }
  0x99   : > { %2169 = vmatmul.mubr.bf16.gmra.mrb[4].mxu0 %v3785_v45  ;;  %1390 = vmatprep.mubr.bf16.mxu1 %v4016_v0  ;;  %v3867_v45 = vld [vmem:[%s4464_s17 + $0x1a8] sm:$0xff]  }
  0x9a   : > { %2178 = vmatprep.mubr.bf16.mxu0 %v4016_v0  ;;  %1712 = vmatpush1.bf16.msra.mxu1 %v3797_v47  ;;  %v3869_v47 = vld [vmem:[%s4464_s17 + $0x1b0] sm:$0xff]  }
  0x9b   : > { %2614 = vmatpush1.bf16.msra.mxu0 %v3801_v48  ;;  %1713 = vmatprep.subr.bf16.mxu1 %v3809_v49  ;;  %v3870_v48 = vld [vmem:[%s4464_s17 + $0x38] sm:$0xff]  }
  0x9c   : > { %2615 = vmatprep.subr.bf16.mxu0 %v3813_v52  ;;  %v3871_v49 = vld [vmem:[%s4464_s17 + $0x1b8] sm:$0xff]   ;;  %v3874_v52 = vld [vmem:[%s4464_s17 + $0x48] sm:$0xff]  }
  0x9e   : > { %1714 = vmatpush1.bf16.msra.mxu1 %v3807_v50  ;;  %v3872_v50 = vld [vmem:[%s4464_s17 + $0x40] sm:$0xff]  }
  0x9f   : > { %2616 = vmatpush1.bf16.msra.mxu0 %v3811_v51  ;;  %1715 = vmatprep.subr.bf16.mxu1 %v3819_v56  ;;  %v3873_v51 = vld [vmem:[%s4464_s17 + $0x1c0] sm:$0xff]   ;;  %v3878_v56 = vld [vmem:[%s4464_s17 + $0x58] sm:$0xff]  }
  0xa0   : > { %1391 = vmatmul.mubr.bf16.gmra.mrb[8].mxu1 %v3786_v53  ;;  %2617 = vmatprep.subr.bf16.mxu0 %v3823_v58  ;;  %v3875_v53 = vld [vmem:[%s4464_s17 + $0x1c8] sm:$0xff]   ;;  %v3880_v58 = vld [vmem:[%s4464_s17 + $0x60] sm:$0xff]  }
  0xa1   : > { %2179 = vmatmul.mubr.bf16.gmra.mrb[8].mxu0 %v3790_v54  ;;  %1400 = vmatprep.mubr.bf16.mxu1 %v4016_v0  ;;  %v3876_v54 = vld [vmem:[%s4464_s17 + $0x50] sm:$0xff]  }
  0xa2   : > { %2188 = vmatprep.mubr.bf16.mxu0 %v4016_v0  ;;  %1716 = vmatpush1.bf16.msra.mxu1 %v3817_v55  ;;  %v3877_v55 = vld [vmem:[%s4464_s17 + $0x1d0] sm:$0xff]  }
  0xa3   : > { %2618 = vmatpush1.bf16.msra.mxu0 %v3821_v57  ;;  %1717 = vmatprep.subr.bf16.mxu1 %v3829_v61  ;;  %v3879_v57 = vld [vmem:[%s4464_s17 + $0x1d8] sm:$0xff]   ;;  %v3883_v61 = vld [vmem:[%s4464_s17 + $0x1e8] sm:$0xff]  }
  0xa4   : > { %2619 = vmatprep.subr.bf16.mxu0 %v3833_v1  ;;  %v3886_v1 = vld [vmem:[%s4464_s17 + $0x78] sm:$0xff]  }
  0xa6   : > { %1718 = vmatpush1.bf16.msra.mxu1 %v3827_v62  ;;  %v3884_v62 = vld [vmem:[%s4464_s17 + $0x70] sm:$0xff]  }
  0xa7   : > { %2620 = vmatpush1.bf16.msra.mxu0 %v3831_v63  ;;  %1719 = vmatprep.subr.bf16.mxu1 %v3839_v5  ;;  %v3885_v63 = vld [vmem:[%s4464_s17 + $0x1f0] sm:$0xff]  }
  0xa8   : > { %1401 = vmatmul.mubr.bf16.gmra.mrb[12].mxu1 %v3794_v59  ;;  %2621 = vmatprep.subr.bf16.mxu0 %v3843_v6  ;;  %v3881_v59 = vld [vmem:[%s4464_s17 + $0x1e0] sm:$0xff]  }
  0xa9   : > { %2189 = vmatmul.mubr.bf16.gmra.mrb[12].mxu0 %v3795_v60  ;;  %1410 = vmatprep.mubr.bf16.mxu1 %v4016_v0  ;;  %v3882_v60 = vld [vmem:[%s4464_s17 + $0x68] sm:$0xff]   ;;  %v2866_v6 = vld [vmem:[%s1059_s7] sm:$0x3]  ;;  %s4017_s7 = smov [#allocation4]  }
  0xaa   : > { %2198 = vmatprep.mubr.bf16.mxu0 %v4016_v0  ;;  %1720 = vmatpush1.bf16.msra.mxu1 %v3837_v4  ;;  %s3892_s29 = sshll.u32 %s4017_s7, 4  ;;  %s3893_s29 = int_to_ptr.vmem [resolvable:$false] %s3892_s29 }
  0xab   : > { %2622 = vmatpush1.bf16.msra.mxu0 %v3841_v7  ;;  %1721 = vmatprep.subr.bf16.mxu1 %v3849_v10  ;;  %s3894_s9 = scalar_lea.vmem %s3893_s29, 16384  ;;  %p3895_p10 = scmp.lt.s32.totalorder %s4779_s28, %s3893_s29 }
  0xac   : > { %2623 = vmatprep.subr.bf16.mxu0 %v3853_v12  ;;  %p3896_p11 = scmp.lt.s32.totalorder %s3894_s9, %s3888_s6 }
  0xae   : > { %1722 = vmatpush1.bf16.msra.mxu1 %v3847_v9  ;;  %p3897_p12 = por %p3896_p11, %p3895_p10 }
  0xaf   : > { %2624 = vmatpush1.bf16.msra.mxu0 %v3851_v13 }
  0xb0   : > { %1411 = vmatmul.mubr.bf16.gmra.mrb[16].mxu1 %v3796_v2  ;;  %v3887_v2 = vld [vmem:[%s4464_s17 + $0x1f8] sm:$0xff]   ;;  %p3898_p13 = pnand %p3897_p12, %p3891_p9 }
  0xb1   : > { %2199 = vmatmul.mubr.bf16.gmra.mrb[16].mxu0 %v3800_v3  ;;  %1420 = vmatprep.mubr.bf16.mxu1 %v4016_v0  ;;  %v2868_v3 = vlaneseq }
  0xb2   : > { %2208 = vmatprep.mubr.bf16.mxu0 %v4016_v0 }
  0xb3   : > { %v2869_v4 = vshrl.u32 %v2868_v3, 7 }
  0xb5   : > { %v2870_v5 = vsub.s32 0, %v2869_v4 }
  0xb7   : > { %v4641_v7 = vrot.slane %v2866_v6, %v2870_v5 }
  0xb8   : > { %1421 = vmatmul.mubr.bf16.gmra.mrb[20].mxu1 %v3804_v8 }
  0xb9   : > { %2209 = vmatmul.mubr.bf16.gmra.mrb[20].mxu0 %v3805_v11  ;;  %1430 = vmatprep.mubr.bf16.mxu1 %v4016_v0 }
  0xba   : > { %2218 = vmatprep.mubr.bf16.mxu0 %v4016_v0 }
  0xc0   : > { %1431 = vmatmul.mubr.bf16.gmra.mrb[24].mxu1 %v3806_v14 }
  0xc1   : > { %2219 = vmatmul.mubr.bf16.gmra.mrb[24].mxu0 %v3810_v15  ;;  %1440 = vmatprep.mubr.bf16.mxu1 %v4016_v0 }
  0xc2   : > { %2228 = vmatprep.mubr.bf16.mxu0 %v4016_v0 }
  0xc8   : > { %1441 = vmatmul.mubr.bf16.gmra.mrb[28].mxu1 %v3814_v16 }
  0xc9   : > { %2229 = vmatmul.mubr.bf16.gmra.mrb[28].mxu0 %v3815_v17  ;;  %1450 = vmatprep.mubr.bf16.mxu1 %v4016_v0 }
  0xca   : > { %2238 = vmatprep.mubr.bf16.mxu0 %v4016_v0 }
  0xd0   : > { %1451 = vmatmul.mubr.bf16.gmra.mrb[32].mxu1 %v3816_v18 }
  0xd1   : > { %2239 = vmatmul.mubr.bf16.gmra.mrb[32].mxu0 %v3820_v19  ;;  %1460 = vmatprep.mubr.bf16.mxu1 %v4016_v0 }
  0xd2   : > { %2248 = vmatprep.mubr.bf16.mxu0 %v4016_v0 }
  0xd8   : > { %1461 = vmatmul.mubr.bf16.gmra.mrb[36].mxu1 %v3824_v20 }
  0xd9   : > { %2249 = vmatmul.mubr.bf16.gmra.mrb[36].mxu0 %v3825_v21  ;;  %1470 = vmatprep.mubr.bf16.mxu1 %v4016_v0 }
  0xda   : > { %2258 = vmatprep.mubr.bf16.mxu0 %v4016_v0 }
  0xe0   : > { %1471 = vmatmul.mubr.bf16.gmra.mrb[40].mxu1 %v3826_v22 }
  0xe1   : > { %2259 = vmatmul.mubr.bf16.gmra.mrb[40].mxu0 %v3830_v23  ;;  %1480 = vmatprep.mubr.bf16.mxu1 %v4016_v0 }
  0xe2   : > { %2268 = vmatprep.mubr.bf16.mxu0 %v4016_v0 }
  0xe8   : > { %1481 = vmatmul.mubr.bf16.gmra.mrb[44].mxu1 %v3834_v24 }
  0xe9   : > { %2269 = vmatmul.mubr.bf16.gmra.mrb[44].mxu0 %v3835_v25  ;;  %1490 = vmatprep.mubr.bf16.mxu1 %v4016_v0 }
  0xea   : > { %2278 = vmatprep.mubr.bf16.mxu0 %v4016_v0 }
  0xf0   : > { %1491 = vmatmul.mubr.bf16.gmra.mrb[48].mxu1 %v3836_v26 }
  0xf1   : > { %2279 = vmatmul.mubr.bf16.gmra.mrb[48].mxu0 %v3840_v27  ;;  %1500 = vmatprep.mubr.bf16.mxu1 %v4016_v0 }
  0xf2   : > { %2288 = vmatprep.mubr.bf16.mxu0 %v4016_v0 }
  0xf8   : > { %1501 = vmatmul.mubr.bf16.gmra.mrb[52].mxu1 %v3844_v28 }
  0xf9   : > { %2289 = vmatmul.mubr.bf16.gmra.mrb[52].mxu0 %v3845_v29  ;;  %1510 = vmatprep.mubr.bf16.mxu1 %v4016_v0 }
  0xfa   : > { %2298 = vmatprep.mubr.bf16.mxu0 %v4016_v0 }
 0x100   : > { %1511 = vmatmul.mubr.bf16.gmra.mrb[56].mxu1 %v3846_v30 }
 0x101   : > { %2299 = vmatmul.mubr.bf16.gmra.mrb[56].mxu0 %v3850_v31  ;;  %1520 = vmatprep.mubr.bf16.mxu1 %v4016_v0 }
 0x102   : > { %2308 = vmatprep.mubr.bf16.mxu0 %v4016_v0 }
 0x108   : > { %1521 = vmatmul.mubr.bf16.gmra.mrb[60].mxu1 %v3854_v32 }
 0x109   : > { %2309 = vmatmul.mubr.bf16.gmra.mrb[60].mxu0 %v3855_v33  ;;  %1739 = vmatprep.mubr.bf16.mxu1 %v4016_v0 }
 0x10a   : > { %2641 = vmatprep.mubr.bf16.mxu0 %v4016_v0 }
 0x110   : > { %1740 = vmatmul.mubr.bf16.vlgmr.msra.gmra.mrb[0].mxu1 %v3856_v34 }
 0x111   : > { %2642 = vmatmul.mubr.bf16.vlgmr.msra.gmra.mrb[0].mxu0 %v3857_v35  ;;  %1749 = vmatprep.mubr.bf16.mxu1 %v4016_v0 }
 0x112   : > { %2651 = vmatprep.mubr.bf16.mxu0 %v4016_v0 }
 0x118   : > { %1750 = vmatmul.mubr.bf16.gmra.mrb[4].mxu1 %v3858_v36 }
 0x119   : > { %2652 = vmatmul.mubr.bf16.gmra.mrb[4].mxu0 %v3859_v37  ;;  %1759 = vmatprep.mubr.bf16.mxu1 %v4016_v0 }
 0x11a   : > { %2661 = vmatprep.mubr.bf16.mxu0 %v4016_v0 }
 0x120   : > { %1760 = vmatmul.mubr.bf16.gmra.mrb[8].mxu1 %v3860_v38 }
 0x121   : > { %2662 = vmatmul.mubr.bf16.gmra.mrb[8].mxu0 %v3861_v39  ;;  %1769 = vmatprep.mubr.bf16.mxu1 %v4016_v0 }
 0x122   : > { %2671 = vmatprep.mubr.bf16.mxu0 %v4016_v0 }
 0x128   : > { %1770 = vmatmul.mubr.bf16.gmra.mrb[12].mxu1 %v3862_v40 }
 0x129   : > { %2672 = vmatmul.mubr.bf16.gmra.mrb[12].mxu0 %v3863_v41  ;;  %1779 = vmatprep.mubr.bf16.mxu1 %v4016_v0 }
 0x12a   : > { %2681 = vmatprep.mubr.bf16.mxu0 %v4016_v0 }
 0x130   : > { %1780 = vmatmul.mubr.bf16.gmra.mrb[16].mxu1 %v3864_v42 }
 0x131   : > { %2682 = vmatmul.mubr.bf16.gmra.mrb[16].mxu0 %v3865_v43  ;;  %1789 = vmatprep.mubr.bf16.mxu1 %v4016_v0 }
 0x132   : > { %2691 = vmatprep.mubr.bf16.mxu0 %v4016_v0 }
 0x138   : > { %1790 = vmatmul.mubr.bf16.gmra.mrb[20].mxu1 %v3866_v44 }
 0x139   : > { %2692 = vmatmul.mubr.bf16.gmra.mrb[20].mxu0 %v3867_v45  ;;  %1799 = vmatprep.mubr.bf16.mxu1 %v4016_v0 }
 0x13a   : > { %2701 = vmatprep.mubr.bf16.mxu0 %v4016_v0 }
 0x140   : > { %1800 = vmatmul.mubr.bf16.gmra.mrb[24].mxu1 %v3868_v46 }
 0x141   : > { %2702 = vmatmul.mubr.bf16.gmra.mrb[24].mxu0 %v3869_v47  ;;  %1809 = vmatprep.mubr.bf16.mxu1 %v4016_v0 }
 0x142   : > { %2711 = vmatprep.mubr.bf16.mxu0 %v4016_v0 }
 0x148   : > { %1810 = vmatmul.mubr.bf16.gmra.mrb[28].mxu1 %v3870_v48 }
 0x149   : > { %2712 = vmatmul.mubr.bf16.gmra.mrb[28].mxu0 %v3871_v49  ;;  %1819 = vmatprep.mubr.bf16.mxu1 %v4016_v0 }
 0x14a   : > { %2721 = vmatprep.mubr.bf16.mxu0 %v4016_v0 }
 0x150   : > { %1820 = vmatmul.mubr.bf16.gmra.mrb[32].mxu1 %v3872_v50 }
 0x151   : > { %2722 = vmatmul.mubr.bf16.gmra.mrb[32].mxu0 %v3873_v51  ;;  %1829 = vmatprep.mubr.bf16.mxu1 %v4016_v0 }
 0x152   : > { %2731 = vmatprep.mubr.bf16.mxu0 %v4016_v0 }
 0x158   : > { %1830 = vmatmul.mubr.bf16.gmra.mrb[36].mxu1 %v3874_v52 }
 0x159   : > { %2732 = vmatmul.mubr.bf16.gmra.mrb[36].mxu0 %v3875_v53  ;;  %1839 = vmatprep.mubr.bf16.mxu1 %v4016_v0 }
 0x15a   : > { %2741 = vmatprep.mubr.bf16.mxu0 %v4016_v0 }
 0x160   : > { %1840 = vmatmul.mubr.bf16.gmra.mrb[40].mxu1 %v3876_v54 }
 0x161   : > { %2742 = vmatmul.mubr.bf16.gmra.mrb[40].mxu0 %v3877_v55  ;;  %1849 = vmatprep.mubr.bf16.mxu1 %v4016_v0 }
 0x162   : > { %2751 = vmatprep.mubr.bf16.mxu0 %v4016_v0 }
 0x168   : > { %1850 = vmatmul.mubr.bf16.gmra.mrb[44].mxu1 %v3878_v56 }
 0x169   : > { %2752 = vmatmul.mubr.bf16.gmra.mrb[44].mxu0 %v3879_v57  ;;  %1859 = vmatprep.mubr.bf16.mxu1 %v4016_v0 }
 0x16a   : > { %2761 = vmatprep.mubr.bf16.mxu0 %v4016_v0 }
 0x170   : > { %1860 = vmatmul.mubr.bf16.gmra.mrb[48].mxu1 %v3880_v58 }
 0x171   : > { %2762 = vmatmul.mubr.bf16.gmra.mrb[48].mxu0 %v3881_v59  ;;  %1869 = vmatprep.mubr.bf16.mxu1 %v4016_v0 }
 0x172   : > { %2771 = vmatprep.mubr.bf16.mxu0 %v4016_v0 }
 0x178   : > { %1870 = vmatmul.mubr.bf16.gmra.mrb[52].mxu1 %v3882_v60 }
 0x179   : > { %2772 = vmatmul.mubr.bf16.gmra.mrb[52].mxu0 %v3883_v61  ;;  %1879 = vmatprep.mubr.bf16.mxu1 %v4016_v0 }
 0x17a   : > { %2781 = vmatprep.mubr.bf16.mxu0 %v4016_v0 }
 0x180   : > { %1880 = vmatmul.mubr.bf16.gmra.mrb[56].mxu1 %v3884_v62 }
 0x181   : > { %2782 = vmatmul.mubr.bf16.gmra.mrb[56].mxu0 %v3885_v63  ;;  %1889 = vmatprep.mubr.bf16.mxu1 %v4016_v0 }
 0x182   : > { %2791 = vmatprep.mubr.bf16.mxu0 %v4016_v0  ;;  %v2874_v0 = vsub.s32 1, %v2869_v4 }
 0x184   : > { %v4643_v10 = vrot.slane %v2866_v6, %v2874_v0 }
 0x188   : > { %1890 = vmatmul.mubr.bf16.gmra.mrb[60].mxu1 %v3886_v1 }
 0x189   : > { %2792 = vmatmul.mubr.bf16.gmra.mrb[60].mxu0 %v3887_v2 }
 0x1e3   : > { %v1741_v8 = vpop.f32.mrb[0].mxu1 }
 0x1e4   : > { %v2643_v9 = vpop.f32.mrb[0].mxu0  ;;  %v1743_v12 = vpop.f32.mrb[1].mxu1 }
 0x1e5   : > { %v3429_v11 = vadd.f32 %v2643_v9, %v1741_v8  ;;  %v2645_v13 = vpop.f32.mrb[1].mxu0  ;;  %v1745_v15 = vpop.f32.mrb[2].mxu1 }
 0x1e6   : > { %v3430_v14 = vadd.f32 %v2645_v13, %v1743_v12  ;;  %v2647_v16 = vpop.f32.mrb[2].mxu0  ;;  %v1747_v19 = vpop.f32.mrb[3].mxu1 }
 0x1e7   : > { %v2878_v17 = vadd.f32 %v3429_v11, %v4641_v7  ;;  %v3431_v18 = vadd.f32 %v2647_v16, %v1745_v15  ;;  %v2649_v20 = vpop.f32.mrb[3].mxu0 }
 0x1e8   : > { %v2879_v21 = vadd.f32 %v3430_v14, %v4643_v10  ;;  %v3432_v22 = vadd.f32 %v2649_v20, %v1747_v19 }
 0x1e9   : > { %2942 = vst [vmem:[%s4647_s19] sm:$0xff] %v2878_v17  ;;  %v2880_v23 = vadd.f32 %v3431_v18, %v4641_v7 }
 0x1ea   : > { %2943 = vst [vmem:[%s4647_s19 + $0x8] sm:$0xff] %v2879_v21  ;;  %v2881_v24 = vadd.f32 %v3432_v22, %v4643_v10 }
 0x1eb   : > { %2944 = vst [vmem:[%s4647_s19 + $0x10] sm:$0xff] %v2880_v23  ;;  %v1751_v25 = vpop.f32.mrb[4].mxu1 }
 0x1ec   : > { %2945 = vst [vmem:[%s4647_s19 + $0x18] sm:$0xff] %v2881_v24  ;;  %v2653_v26 = vpop.f32.mrb[4].mxu0  ;;  %v1753_v28 = vpop.f32.mrb[5].mxu1 }
 0x1ed   : > { %v3433_v27 = vadd.f32 %v2653_v26, %v1751_v25  ;;  %v2655_v29 = vpop.f32.mrb[5].mxu0  ;;  %v1755_v31 = vpop.f32.mrb[6].mxu1 }
 0x1ee   : > { %v3434_v30 = vadd.f32 %v2655_v29, %v1753_v28  ;;  %v2657_v32 = vpop.f32.mrb[6].mxu0  ;;  %v1757_v35 = vpop.f32.mrb[7].mxu1 }
 0x1ef   : > { %v2882_v33 = vadd.f32 %v3433_v27, %v4641_v7  ;;  %v3435_v34 = vadd.f32 %v2657_v32, %v1755_v31  ;;  %v2659_v36 = vpop.f32.mrb[7].mxu0 }
 0x1f0   : > { %v2883_v37 = vadd.f32 %v3434_v30, %v4643_v10  ;;  %v3436_v38 = vadd.f32 %v2659_v36, %v1757_v35 }
 0x1f1   : > { %2946 = vst [vmem:[%s4647_s19 + $0x20] sm:$0xff] %v2882_v33  ;;  %v2884_v39 = vadd.f32 %v3435_v34, %v4641_v7 }
 0x1f2   : > { %2947 = vst [vmem:[%s4647_s19 + $0x28] sm:$0xff] %v2883_v37  ;;  %v2885_v40 = vadd.f32 %v3436_v38, %v4643_v10 }
 0x1f3   : > { %2948 = vst [vmem:[%s4647_s19 + $0x30] sm:$0xff] %v2884_v39  ;;  %v1761_v41 = vpop.f32.mrb[8].mxu1 }
 0x1f4   : > { %2949 = vst [vmem:[%s4647_s19 + $0x38] sm:$0xff] %v2885_v40  ;;  %v2663_v42 = vpop.f32.mrb[8].mxu0  ;;  %v1763_v44 = vpop.f32.mrb[9].mxu1 }
 0x1f5   : > { %v3437_v43 = vadd.f32 %v2663_v42, %v1761_v41  ;;  %v2665_v45 = vpop.f32.mrb[9].mxu0  ;;  %v1765_v47 = vpop.f32.mrb[10].mxu1 }
 0x1f6   : > { %v3438_v46 = vadd.f32 %v2665_v45, %v1763_v44  ;;  %v2667_v48 = vpop.f32.mrb[10].mxu0  ;;  %v1767_v51 = vpop.f32.mrb[11].mxu1 }
 0x1f7   : > { %v2886_v49 = vadd.f32 %v3437_v43, %v4641_v7  ;;  %v3439_v50 = vadd.f32 %v2667_v48, %v1765_v47  ;;  %v2669_v52 = vpop.f32.mrb[11].mxu0 }
 0x1f8   : > { %v2887_v53 = vadd.f32 %v3438_v46, %v4643_v10  ;;  %v3440_v54 = vadd.f32 %v2669_v52, %v1767_v51 }
 0x1f9   : > { %2950 = vst [vmem:[%s4647_s19 + $0x40] sm:$0xff] %v2886_v49  ;;  %v2888_v55 = vadd.f32 %v3439_v50, %v4641_v7 }
 0x1fa   : > { %2951 = vst [vmem:[%s4647_s19 + $0x48] sm:$0xff] %v2887_v53  ;;  %v2889_v56 = vadd.f32 %v3440_v54, %v4643_v10 }
 0x1fb   : > { %2952 = vst [vmem:[%s4647_s19 + $0x50] sm:$0xff] %v2888_v55  ;;  %v1771_v57 = vpop.f32.mrb[12].mxu1 }
 0x1fc   : > { %2953 = vst [vmem:[%s4647_s19 + $0x58] sm:$0xff] %v2889_v56  ;;  %v2673_v58 = vpop.f32.mrb[12].mxu0  ;;  %v1773_v60 = vpop.f32.mrb[13].mxu1 }
 0x1fd   : > { %v3441_v59 = vadd.f32 %v2673_v58, %v1771_v57  ;;  %v2675_v61 = vpop.f32.mrb[13].mxu0  ;;  %v1775_v63 = vpop.f32.mrb[14].mxu1 }
 0x1fe   : > { %v3442_v62 = vadd.f32 %v2675_v61, %v1773_v60  ;;  %v2677_v1 = vpop.f32.mrb[14].mxu0  ;;  %v1777_v4 = vpop.f32.mrb[15].mxu1 }
 0x1ff   : > { %v2890_v2 = vadd.f32 %v3441_v59, %v4641_v7  ;;  %v3443_v3 = vadd.f32 %v2677_v1, %v1775_v63  ;;  %v2679_v5 = vpop.f32.mrb[15].mxu0 }
 0x200   : > { %v2891_v6 = vadd.f32 %v3442_v62, %v4643_v10  ;;  %v3444_v0 = vadd.f32 %v2679_v5, %v1777_v4 }
 0x201   : > { %2954 = vst [vmem:[%s4647_s19 + $0x60] sm:$0xff] %v2890_v2  ;;  %v2892_v8 = vadd.f32 %v3443_v3, %v4641_v7 }
 0x202   : > { %2955 = vst [vmem:[%s4647_s19 + $0x68] sm:$0xff] %v2891_v6  ;;  %v2893_v9 = vadd.f32 %v3444_v0, %v4643_v10 }
 0x203   : > { %2956 = vst [vmem:[%s4647_s19 + $0x70] sm:$0xff] %v2892_v8  ;;  %v1781_v11 = vpop.f32.mrb[16].mxu1 }
 0x204   : > { %2957 = vst [vmem:[%s4647_s19 + $0x78] sm:$0xff] %v2893_v9  ;;  %v2683_v12 = vpop.f32.mrb[16].mxu0  ;;  %v1783_v14 = vpop.f32.mrb[17].mxu1 }
 0x205   : > { %v3445_v13 = vadd.f32 %v2683_v12, %v1781_v11  ;;  %v2685_v15 = vpop.f32.mrb[17].mxu0  ;;  %v1785_v17 = vpop.f32.mrb[18].mxu1 }
 0x206   : > { %v3446_v16 = vadd.f32 %v2685_v15, %v1783_v14  ;;  %v2687_v18 = vpop.f32.mrb[18].mxu0  ;;  %v1787_v21 = vpop.f32.mrb[19].mxu1 }
 0x207   : > { %v2894_v19 = vadd.f32 %v3445_v13, %v4641_v7  ;;  %v3447_v20 = vadd.f32 %v2687_v18, %v1785_v17  ;;  %v2689_v22 = vpop.f32.mrb[19].mxu0 }
 0x208   : > { %v2895_v23 = vadd.f32 %v3446_v16, %v4643_v10  ;;  %v3448_v24 = vadd.f32 %v2689_v22, %v1787_v21 }
 0x209   : > { %2958 = vst [vmem:[%s4647_s19 + $0x80] sm:$0xff] %v2894_v19  ;;  %v2896_v25 = vadd.f32 %v3447_v20, %v4641_v7 }
 0x20a   : > { %2959 = vst [vmem:[%s4647_s19 + $0x88] sm:$0xff] %v2895_v23  ;;  %v2897_v26 = vadd.f32 %v3448_v24, %v4643_v10 }
 0x20b   : > { %2960 = vst [vmem:[%s4647_s19 + $0x90] sm:$0xff] %v2896_v25  ;;  %v1791_v27 = vpop.f32.mrb[20].mxu1 }
 0x20c   : > { %2961 = vst [vmem:[%s4647_s19 + $0x98] sm:$0xff] %v2897_v26  ;;  %v2693_v28 = vpop.f32.mrb[20].mxu0  ;;  %v1793_v30 = vpop.f32.mrb[21].mxu1 }
 0x20d   : > { %v3449_v29 = vadd.f32 %v2693_v28, %v1791_v27  ;;  %v2695_v31 = vpop.f32.mrb[21].mxu0  ;;  %v1795_v33 = vpop.f32.mrb[22].mxu1 }
 0x20e   : > { %v3450_v32 = vadd.f32 %v2695_v31, %v1793_v30  ;;  %v2697_v34 = vpop.f32.mrb[22].mxu0  ;;  %v1797_v37 = vpop.f32.mrb[23].mxu1 }
 0x20f   : > { %v2898_v35 = vadd.f32 %v3449_v29, %v4641_v7  ;;  %v3451_v36 = vadd.f32 %v2697_v34, %v1795_v33  ;;  %v2699_v38 = vpop.f32.mrb[23].mxu0 }
 0x210   : > { %v2899_v39 = vadd.f32 %v3450_v32, %v4643_v10  ;;  %v3452_v40 = vadd.f32 %v2699_v38, %v1797_v37 }
 0x211   : > { %2962 = vst [vmem:[%s4647_s19 + $0xa0] sm:$0xff] %v2898_v35  ;;  %v2900_v41 = vadd.f32 %v3451_v36, %v4641_v7 }
 0x212   : > { %2963 = vst [vmem:[%s4647_s19 + $0xa8] sm:$0xff] %v2899_v39  ;;  %v2901_v42 = vadd.f32 %v3452_v40, %v4643_v10 }
 0x213   : > { %2964 = vst [vmem:[%s4647_s19 + $0xb0] sm:$0xff] %v2900_v41  ;;  %v1801_v43 = vpop.f32.mrb[24].mxu1 }
 0x214   : > { %2965 = vst [vmem:[%s4647_s19 + $0xb8] sm:$0xff] %v2901_v42  ;;  %v2703_v44 = vpop.f32.mrb[24].mxu0  ;;  %v1803_v46 = vpop.f32.mrb[25].mxu1 }
 0x215   : > { %v3453_v45 = vadd.f32 %v2703_v44, %v1801_v43  ;;  %v2705_v47 = vpop.f32.mrb[25].mxu0  ;;  %v1805_v49 = vpop.f32.mrb[26].mxu1 }
 0x216   : > { %v3454_v48 = vadd.f32 %v2705_v47, %v1803_v46  ;;  %v2707_v50 = vpop.f32.mrb[26].mxu0  ;;  %v1807_v53 = vpop.f32.mrb[27].mxu1 }
 0x217   : > { %v2902_v51 = vadd.f32 %v3453_v45, %v4641_v7  ;;  %v3455_v52 = vadd.f32 %v2707_v50, %v1805_v49  ;;  %v2709_v54 = vpop.f32.mrb[27].mxu0 }
 0x218   : > { %v2903_v55 = vadd.f32 %v3454_v48, %v4643_v10  ;;  %v3456_v56 = vadd.f32 %v2709_v54, %v1807_v53 }
 0x219   : > { %2966 = vst [vmem:[%s4647_s19 + $0xc0] sm:$0xff] %v2902_v51  ;;  %v2904_v57 = vadd.f32 %v3455_v52, %v4641_v7 }
 0x21a   : > { %2967 = vst [vmem:[%s4647_s19 + $0xc8] sm:$0xff] %v2903_v55  ;;  %v2905_v58 = vadd.f32 %v3456_v56, %v4643_v10 }
 0x21b   : > { %2968 = vst [vmem:[%s4647_s19 + $0xd0] sm:$0xff] %v2904_v57  ;;  %v1811_v59 = vpop.f32.mrb[28].mxu1 }
 0x21c   : > { %2969 = vst [vmem:[%s4647_s19 + $0xd8] sm:$0xff] %v2905_v58  ;;  %v2713_v60 = vpop.f32.mrb[28].mxu0  ;;  %v1813_v62 = vpop.f32.mrb[29].mxu1 }
 0x21d   : > { %v3457_v61 = vadd.f32 %v2713_v60, %v1811_v59  ;;  %v2715_v63 = vpop.f32.mrb[29].mxu0  ;;  %v1815_v2 = vpop.f32.mrb[30].mxu1 }
 0x21e   : > { %v3458_v1 = vadd.f32 %v2715_v63, %v1813_v62  ;;  %v2717_v3 = vpop.f32.mrb[30].mxu0  ;;  %v1817_v6 = vpop.f32.mrb[31].mxu1 }
 0x21f   : > { %v2906_v4 = vadd.f32 %v3457_v61, %v4641_v7  ;;  %v3459_v5 = vadd.f32 %v2717_v3, %v1815_v2  ;;  %v2719_v0 = vpop.f32.mrb[31].mxu0 }
 0x220   : > { %v2907_v8 = vadd.f32 %v3458_v1, %v4643_v10  ;;  %v3460_v9 = vadd.f32 %v2719_v0, %v1817_v6 }
 0x221   : > { %2970 = vst [vmem:[%s4647_s19 + $0xe0] sm:$0xff] %v2906_v4  ;;  %v2908_v11 = vadd.f32 %v3459_v5, %v4641_v7 }
 0x222   : > { %2971 = vst [vmem:[%s4647_s19 + $0xe8] sm:$0xff] %v2907_v8  ;;  %v2909_v12 = vadd.f32 %v3460_v9, %v4643_v10 }
 0x223   : > { %2972 = vst [vmem:[%s4647_s19 + $0xf0] sm:$0xff] %v2908_v11  ;;  %v1821_v13 = vpop.f32.mrb[32].mxu1 }
 0x224   : > { %2973 = vst [vmem:[%s4647_s19 + $0xf8] sm:$0xff] %v2909_v12  ;;  %v2723_v14 = vpop.f32.mrb[32].mxu0  ;;  %v1823_v16 = vpop.f32.mrb[33].mxu1 }
 0x225   : > { %v3461_v15 = vadd.f32 %v2723_v14, %v1821_v13  ;;  %v2725_v17 = vpop.f32.mrb[33].mxu0  ;;  %v1825_v19 = vpop.f32.mrb[34].mxu1 }
 0x226   : > { %v3462_v18 = vadd.f32 %v2725_v17, %v1823_v16  ;;  %v2727_v20 = vpop.f32.mrb[34].mxu0  ;;  %v1827_v23 = vpop.f32.mrb[35].mxu1 }
 0x227   : > { %v2910_v21 = vadd.f32 %v3461_v15, %v4641_v7  ;;  %v3463_v22 = vadd.f32 %v2727_v20, %v1825_v19  ;;  %v2729_v24 = vpop.f32.mrb[35].mxu0 }
 0x228   : > { %v2911_v25 = vadd.f32 %v3462_v18, %v4643_v10  ;;  %v3464_v26 = vadd.f32 %v2729_v24, %v1827_v23 }
 0x229   : > { %2974 = vst [vmem:[%s4647_s19 + $0x100] sm:$0xff] %v2910_v21  ;;  %v2912_v27 = vadd.f32 %v3463_v22, %v4641_v7 }
 0x22a   : > { %2975 = vst [vmem:[%s4647_s19 + $0x108] sm:$0xff] %v2911_v25  ;;  %v2913_v28 = vadd.f32 %v3464_v26, %v4643_v10 }
 0x22b   : > { %2976 = vst [vmem:[%s4647_s19 + $0x110] sm:$0xff] %v2912_v27  ;;  %v1831_v29 = vpop.f32.mrb[36].mxu1 }
 0x22c   : > { %2977 = vst [vmem:[%s4647_s19 + $0x118] sm:$0xff] %v2913_v28  ;;  %v2733_v30 = vpop.f32.mrb[36].mxu0  ;;  %v1833_v32 = vpop.f32.mrb[37].mxu1 }
 0x22d   : > { %v3465_v31 = vadd.f32 %v2733_v30, %v1831_v29  ;;  %v2735_v33 = vpop.f32.mrb[37].mxu0  ;;  %v1835_v35 = vpop.f32.mrb[38].mxu1 }
 0x22e   : > { %v3466_v34 = vadd.f32 %v2735_v33, %v1833_v32  ;;  %v2737_v36 = vpop.f32.mrb[38].mxu0  ;;  %v1837_v39 = vpop.f32.mrb[39].mxu1 }
 0x22f   : > { %v2914_v37 = vadd.f32 %v3465_v31, %v4641_v7  ;;  %v3467_v38 = vadd.f32 %v2737_v36, %v1835_v35  ;;  %v2739_v40 = vpop.f32.mrb[39].mxu0 }
 0x230   : > { %v2915_v41 = vadd.f32 %v3466_v34, %v4643_v10  ;;  %v3468_v42 = vadd.f32 %v2739_v40, %v1837_v39 }
 0x231   : > { %2978 = vst [vmem:[%s4647_s19 + $0x120] sm:$0xff] %v2914_v37  ;;  %v2916_v43 = vadd.f32 %v3467_v38, %v4641_v7 }
 0x232   : > { %2979 = vst [vmem:[%s4647_s19 + $0x128] sm:$0xff] %v2915_v41  ;;  %v2917_v44 = vadd.f32 %v3468_v42, %v4643_v10 }
 0x233   : > { %2980 = vst [vmem:[%s4647_s19 + $0x130] sm:$0xff] %v2916_v43  ;;  %v1841_v45 = vpop.f32.mrb[40].mxu1 }
 0x234   : > { %2981 = vst [vmem:[%s4647_s19 + $0x138] sm:$0xff] %v2917_v44  ;;  %v2743_v46 = vpop.f32.mrb[40].mxu0  ;;  %v1843_v48 = vpop.f32.mrb[41].mxu1 }
 0x235   : > { %v3469_v47 = vadd.f32 %v2743_v46, %v1841_v45  ;;  %v2745_v49 = vpop.f32.mrb[41].mxu0  ;;  %v1845_v51 = vpop.f32.mrb[42].mxu1 }
 0x236   : > { %v3470_v50 = vadd.f32 %v2745_v49, %v1843_v48  ;;  %v2747_v52 = vpop.f32.mrb[42].mxu0  ;;  %v1847_v55 = vpop.f32.mrb[43].mxu1 }
 0x237   : > { %v2918_v53 = vadd.f32 %v3469_v47, %v4641_v7  ;;  %v3471_v54 = vadd.f32 %v2747_v52, %v1845_v51  ;;  %v2749_v56 = vpop.f32.mrb[43].mxu0 }
 0x238   : > { %v2919_v57 = vadd.f32 %v3470_v50, %v4643_v10  ;;  %v3472_v58 = vadd.f32 %v2749_v56, %v1847_v55 }
 0x239   : > { %2982 = vst [vmem:[%s4647_s19 + $0x140] sm:$0xff] %v2918_v53  ;;  %v2920_v59 = vadd.f32 %v3471_v54, %v4641_v7 }
 0x23a   : > { %2983 = vst [vmem:[%s4647_s19 + $0x148] sm:$0xff] %v2919_v57  ;;  %v2921_v60 = vadd.f32 %v3472_v58, %v4643_v10 }
 0x23b   : > { %2984 = vst [vmem:[%s4647_s19 + $0x150] sm:$0xff] %v2920_v59  ;;  %v1851_v61 = vpop.f32.mrb[44].mxu1 }
 0x23c   : > { %2985 = vst [vmem:[%s4647_s19 + $0x158] sm:$0xff] %v2921_v60  ;;  %v2753_v62 = vpop.f32.mrb[44].mxu0  ;;  %v1853_v1 = vpop.f32.mrb[45].mxu1 }
 0x23d   : > { %v3473_v63 = vadd.f32 %v2753_v62, %v1851_v61  ;;  %v2755_v2 = vpop.f32.mrb[45].mxu0  ;;  %v1855_v4 = vpop.f32.mrb[46].mxu1 }
 0x23e   : > { %v3474_v3 = vadd.f32 %v2755_v2, %v1853_v1  ;;  %v2757_v5 = vpop.f32.mrb[46].mxu0  ;;  %v1857_v8 = vpop.f32.mrb[47].mxu1 }
 0x23f   : > { %v2922_v6 = vadd.f32 %v3473_v63, %v4641_v7  ;;  %v3475_v0 = vadd.f32 %v2757_v5, %v1855_v4  ;;  %v2759_v9 = vpop.f32.mrb[47].mxu0 }
 0x240   : > { %v2923_v11 = vadd.f32 %v3474_v3, %v4643_v10  ;;  %v3476_v12 = vadd.f32 %v2759_v9, %v1857_v8 }
 0x241   : > { %2986 = vst [vmem:[%s4647_s19 + $0x160] sm:$0xff] %v2922_v6  ;;  %v2924_v13 = vadd.f32 %v3475_v0, %v4641_v7 }
 0x242   : > { %2987 = vst [vmem:[%s4647_s19 + $0x168] sm:$0xff] %v2923_v11  ;;  %v2925_v14 = vadd.f32 %v3476_v12, %v4643_v10 }
 0x243   : > { %2988 = vst [vmem:[%s4647_s19 + $0x170] sm:$0xff] %v2924_v13  ;;  %v1861_v15 = vpop.f32.mrb[48].mxu1 }
 0x244   : > { %2989 = vst [vmem:[%s4647_s19 + $0x178] sm:$0xff] %v2925_v14  ;;  %v2763_v16 = vpop.f32.mrb[48].mxu0  ;;  %v1863_v18 = vpop.f32.mrb[49].mxu1 }
 0x245   : > { %v3477_v17 = vadd.f32 %v2763_v16, %v1861_v15  ;;  %v2765_v19 = vpop.f32.mrb[49].mxu0  ;;  %v1865_v21 = vpop.f32.mrb[50].mxu1 }
 0x246   : > { %v3478_v20 = vadd.f32 %v2765_v19, %v1863_v18  ;;  %v2767_v22 = vpop.f32.mrb[50].mxu0  ;;  %v1867_v25 = vpop.f32.mrb[51].mxu1 }
 0x247   : > { %v2926_v23 = vadd.f32 %v3477_v17, %v4641_v7  ;;  %v3479_v24 = vadd.f32 %v2767_v22, %v1865_v21  ;;  %v2769_v26 = vpop.f32.mrb[51].mxu0 }
 0x248   : > { %v2927_v27 = vadd.f32 %v3478_v20, %v4643_v10  ;;  %v3480_v28 = vadd.f32 %v2769_v26, %v1867_v25 }
 0x249   : > { %2990 = vst [vmem:[%s4647_s19 + $0x180] sm:$0xff] %v2926_v23  ;;  %v2928_v29 = vadd.f32 %v3479_v24, %v4641_v7 }
 0x24a   : > { %2991 = vst [vmem:[%s4647_s19 + $0x188] sm:$0xff] %v2927_v27  ;;  %v2929_v30 = vadd.f32 %v3480_v28, %v4643_v10 }
 0x24b   : > { %2992 = vst [vmem:[%s4647_s19 + $0x190] sm:$0xff] %v2928_v29  ;;  %v1871_v31 = vpop.f32.mrb[52].mxu1 }
 0x24c   : > { %2993 = vst [vmem:[%s4647_s19 + $0x198] sm:$0xff] %v2929_v30  ;;  %v2773_v32 = vpop.f32.mrb[52].mxu0  ;;  %v1873_v34 = vpop.f32.mrb[53].mxu1 }
 0x24d   : > { %v3481_v33 = vadd.f32 %v2773_v32, %v1871_v31  ;;  %v2775_v35 = vpop.f32.mrb[53].mxu0  ;;  %v1875_v37 = vpop.f32.mrb[54].mxu1 }
 0x24e   : > { %v3482_v36 = vadd.f32 %v2775_v35, %v1873_v34  ;;  %v2777_v38 = vpop.f32.mrb[54].mxu0  ;;  %v1877_v41 = vpop.f32.mrb[55].mxu1 }
 0x24f   : > { %v2930_v39 = vadd.f32 %v3481_v33, %v4641_v7  ;;  %v3483_v40 = vadd.f32 %v2777_v38, %v1875_v37  ;;  %v2779_v42 = vpop.f32.mrb[55].mxu0 }
 0x250   : > { %v2931_v43 = vadd.f32 %v3482_v36, %v4643_v10  ;;  %v3484_v44 = vadd.f32 %v2779_v42, %v1877_v41 }
 0x251   : > { %2994 = vst [vmem:[%s4647_s19 + $0x1a0] sm:$0xff] %v2930_v39  ;;  %v2932_v45 = vadd.f32 %v3483_v40, %v4641_v7 }
 0x252   : > { %2995 = vst [vmem:[%s4647_s19 + $0x1a8] sm:$0xff] %v2931_v43  ;;  %v2933_v46 = vadd.f32 %v3484_v44, %v4643_v10 }
 0x253   : > { %2996 = vst [vmem:[%s4647_s19 + $0x1b0] sm:$0xff] %v2932_v45  ;;  %v1881_v47 = vpop.f32.mrb[56].mxu1 }
 0x254   : > { %2997 = vst [vmem:[%s4647_s19 + $0x1b8] sm:$0xff] %v2933_v46  ;;  %v2783_v48 = vpop.f32.mrb[56].mxu0  ;;  %v1883_v50 = vpop.f32.mrb[57].mxu1 }
 0x255   : > { %v3485_v49 = vadd.f32 %v2783_v48, %v1881_v47  ;;  %v2785_v51 = vpop.f32.mrb[57].mxu0  ;;  %v1885_v53 = vpop.f32.mrb[58].mxu1 }
 0x256   : > { %v3486_v52 = vadd.f32 %v2785_v51, %v1883_v50  ;;  %v2787_v54 = vpop.f32.mrb[58].mxu0  ;;  %v1887_v57 = vpop.f32.mrb[59].mxu1 }
 0x257   : > { %v2934_v55 = vadd.f32 %v3485_v49, %v4641_v7  ;;  %v3487_v56 = vadd.f32 %v2787_v54, %v1885_v53  ;;  %v2789_v58 = vpop.f32.mrb[59].mxu0 }
 0x258   : > { %v2935_v59 = vadd.f32 %v3486_v52, %v4643_v10  ;;  %v3488_v60 = vadd.f32 %v2789_v58, %v1887_v57 }
 0x259   : > { %2998 = vst [vmem:[%s4647_s19 + $0x1c0] sm:$0xff] %v2934_v55  ;;  %v2936_v61 = vadd.f32 %v3487_v56, %v4641_v7 }
 0x25a   : > { %2999 = vst [vmem:[%s4647_s19 + $0x1c8] sm:$0xff] %v2935_v59  ;;  %v2937_v62 = vadd.f32 %v3488_v60, %v4643_v10 }
 0x25b   : > { %3000 = vst [vmem:[%s4647_s19 + $0x1d0] sm:$0xff] %v2936_v61  ;;  %v1891_v63 = vpop.f32.mrb[60].mxu1 }
 0x25c   : > { %3001 = vst [vmem:[%s4647_s19 + $0x1d8] sm:$0xff] %v2937_v62  ;;  %v2793_v1 = vpop.f32.mrb[60].mxu0  ;;  %v1893_v3 = vpop.f32.mrb[61].mxu1 }
 0x25d   : > { %v3489_v2 = vadd.f32 %v2793_v1, %v1891_v63  ;;  %v2795_v4 = vpop.f32.mrb[61].mxu0  ;;  %v1895_v6 = vpop.f32.mrb[62].mxu1 }
 0x25e   : > { %v3490_v5 = vadd.f32 %v2795_v4, %v1893_v3  ;;  %v2797_v0 = vpop.f32.mrb[62].mxu0  ;;  %v1897_v11 = vpop.f32.mrb[63].mxu1 }
 0x25f   : > { %v2938_v8 = vadd.f32 %v3489_v2, %v4641_v7  ;;  %v3491_v9 = vadd.f32 %v2797_v0, %v1895_v6  ;;  %v2799_v12 = vpop.f32.mrb[63].mxu0 }
 0x260   : > { %v2939_v13 = vadd.f32 %v3490_v5, %v4643_v10  ;;  %v3492_v14 = vadd.f32 %v2799_v12, %v1897_v11 }
 0x261   : > { %3002 = vst [vmem:[%s4647_s19 + $0x1e0] sm:$0xff] %v2938_v8  ;;  %v2940_v15 = vadd.f32 %v3491_v9, %v4641_v7 }
 0x262   : > { %3003 = vst [vmem:[%s4647_s19 + $0x1e8] sm:$0xff] %v2939_v13  ;;  %v2941_v16 = vadd.f32 %v3492_v14, %v4643_v10 }
 0x263   : > { %3004 = vst [vmem:[%s4647_s19 + $0x1f0] sm:$0xff] %v2940_v15 }
 0x264   : > { %3005 = vst [vmem:[%s4647_s19 + $0x1f8] sm:$0xff] %v2941_v16 }
 0x265   : > { %3901 = shalt.err (!%p3898_p13)
}
 0x266   : > { %s3902_s8 = scalar_lea.hbm %s4775_s30, 8192  ;;  %s3906_s20 = scalar_lea.hbm %s4854_s3, 65536 }
 0x267   : > { %p3903_p2 = scmp.ne.s32.totalorder %s4775_s30, %s3902_s8  ;;  %p3907_p5 = scmp.lt.u32.totalorder %s4775_s30, %s4854_s3 }
 0x268   : > { %p3908_p6 = scmp.lt.u32.totalorder %s3906_s20, %s3902_s8  ;;  %p3910_p8 = scmp.lt.u32.totalorder %s3902_s8, %s4775_s30 }
 0x269   : > { %p3904_p3 = pnand %p3903_p2, %p4143_p0 }
 0x26a   : > { %p3909_p7 = por %p3908_p6, %p3907_p5 }
 0x26b   : > { %p3905_p4 = pneg %p3904_p3 }
 0x26c   : > { %p3911_p9 = por %p3910_p8, %p3909_p7 }
 0x26e   : > { %p3912_p10 = pnand %p3911_p9, %p3905_p4 }
 0x270   : > { %3915 = shalt.err (!%p3912_p10)
}
 0x271   : > { %s4018_s6 = smov 256   ;;  %s4019_s7 = smov 512  }
 0x272   : > { %s4020_s29 = smov 16  }
 0x273   : > { %3621 = dma.vmem_to_hbm [thread:$0]  (%p4143_p0), %s4779_s28, 8192, %s4775_s30, %s4787_s25, %s4018_s6, %s4019_s7, %s4020_s29  }
 0x274 PF: > { %p3627_p11 = scmp.ge.s32.totalorder %s4014_s23, 2  ;;  %s3038_s9 = sand.u32 1, %s3970_s12  }
 0x275   : > { %s3039_s8 = scalar_lea.sflag [#allocation5], %s3038_s9 }
 0x276   : > { %p3624_p12 = pnand %p3627_p11, %p4147_p1 }
 0x278   : > { %3965 = dma.done.wait (!%p3624_p12), %s3039_s8, 8192  }
 0x279   : > { %3967 = vsyncadd (!%p3624_p12), %s3039_s8, 4294959104  ;;  %s16_s23 = sadd.s32 1, %s4014_s23   ;;  %s4861_s4 = sld [smem:[#allocation7_spill]] }
 0x27a   : > { %p13_p13 = scmp.ge.s32.totalorder %s16_s23, 10   ;;  %s4862_s12 = smov %s3974_s13 }
 0x27b   : > { %s4863_s13 = smov %s3978_s14  ;;  %s4864_s14 = smov %s4137_s11 }
 0x27c   : > { %s4865_s15 = smov %s3986_s16  ;;  %s4866_s16 = smov %s4124_s5 }
 0x27d   : > { %s4867_s17 = smov %s3994_s18  ;;  %s4868_s18 = smov %s4134_s10 }
 0x27e   : > { %s4869_s19 = smov %s4006_s21  ;;  %s4870_s20 = smov %s4010_s22 }
 0x27f   : > { %s4871_s21 = smov %s4874_s26  ;;  %s4872_s22 = smov %s4861_s4 }
 0x280   :  { %15 = sbr.rel (!%p13_p13) target bundleno = 7 (0x7), region = 168 }
 0x287   :  { %3044 = vsyncpa [#allocation5], 1 }
 0x288   :  { %3046 = vsyncpa [#allocation5 + $0x1], 1 }

</bundles_post_ra>
